<compile_context>
chip_gen: v7x
topology: tpu7x:2x2x1
jax: 0.10.0
libtpu: 0.0.40
codegen_flags: <defaults>
</compile_context>

<pallas_src>
import math
import functools
import numpy as np
import jax
import jax.numpy as jnp
from jax.experimental import pallas as pl
from jax.experimental.pallas import tpu as pltpu

NEG_INF = -1e9


# --------------------------- in-kernel helpers -------------------------------

def _rms(x, w, eps):
    # x: [M, D] f32, w: [1, D] f32
    ms = jnp.mean(x * x, axis=-1, keepdims=True)
    return x * jax.lax.rsqrt(ms + eps) * w


def _mm(a, w):
    # MXU matmul: bf16 operands, f32 accumulation.
    return jnp.dot(a.astype(jnp.bfloat16), w.astype(jnp.bfloat16),
                   preferred_element_type=jnp.float32)


# --------------------------- fused decoder-block kernel -----------------------

def decoder_block_kernel(S, Sk, D, H, eps, do_final,
                         x_ref, enc_ref, tpad_ref, spad_ref,
                         sa_norm_ref, sa_wqkv_ref, sa_bqkv_ref, sa_wo_ref, sa_bo_ref,
                         ca_norm_ref, ca_wq_ref, ca_bq_ref, ca_wkv_ref, ca_bkv_ref,
                         ca_wo_ref, ca_bo_ref,
                         ff_norm_ref, ff_w1_ref, ff_b1_ref, ff_w2_ref, ff_b2_ref,
                         fnorm_ref,
                         o_ref):
    hd = D // H
    scale = 1.0 / math.sqrt(hd)

    # One batch element per grid step (blocks carry a leading 1).
    x = x_ref[...].reshape(S, D)          # [S, D]  f32
    enc = enc_ref[...].reshape(Sk, D)     # [Sk, D] f32

    # Build masks in-kernel: causal from iota, key-padding from the O(S) pad rows.
    q_ids = jax.lax.broadcasted_iota(jnp.int32, (S, S), 0)
    k_ids = jax.lax.broadcasted_iota(jnp.int32, (S, S), 1)
    tpad = tpad_ref[...].reshape(1, S) != 0
    keep_d = (k_ids <= q_ids) & tpad                                   # [S, S]
    keep_p = jnp.broadcast_to(spad_ref[...].reshape(1, Sk) != 0, (S, Sk))  # [S, Sk]

    def mha(q, k, v, keep, wo_ref, bo_ref, kv_len):
        # q: [S, D] f32, k/v: [kv_len, D] f32, keep: [S, kv_len] bool
        qh = q.reshape(S, H, hd).astype(jnp.bfloat16)
        kh = k.reshape(kv_len, H, hd).astype(jnp.bfloat16)
        vh = v.reshape(kv_len, H, hd).astype(jnp.bfloat16)
        # head-batched score matmul on the MXU, f32 accumulation
        s = jnp.einsum('qhd,khd->hqk', qh, kh,
                       preferred_element_type=jnp.float32) * scale      # [H,S,kv]
        s = jnp.where(keep[None, :, :], s, NEG_INF)                     # masked_fill
        mx = jnp.max(s, axis=-1, keepdims=True)
        e = jnp.exp(s - mx)
        p = e * pl.reciprocal(jnp.sum(e, axis=-1, keepdims=True), approx=True)
        # head-batched PV matmul, output already query-major -> single head merge
        o = jnp.einsum('hqk,khd->qhd', p.astype(jnp.bfloat16), vh,
                       preferred_element_type=jnp.float32)               # [S,H,hd]
        # single output projection over the full D contraction
        return _mm(o.reshape(S, D), wo_ref[...]) + bo_ref[...]

    # ---- self-attention sub-layer (pre-norm, residual) ----
    xn = _rms(x, sa_norm_ref[...], eps)
    qkv = _mm(xn, sa_wqkv_ref[...]) + sa_bqkv_ref[...]                  # [S, 3D]
    x = x + mha(qkv[:, 0:D], qkv[:, D:2 * D], qkv[:, 2 * D:3 * D],
                keep_d, sa_wo_ref, sa_bo_ref, S)

    # ---- cross-attention sub-layer ----
    xn = _rms(x, ca_norm_ref[...], eps)
    q = _mm(xn, ca_wq_ref[...]) + ca_bq_ref[...]                        # [S, D]
    kv = _mm(enc, ca_wkv_ref[...]) + ca_bkv_ref[...]                    # [Sk, 2D]
    x = x + mha(q, kv[:, 0:D], kv[:, D:2 * D],
                keep_p, ca_wo_ref, ca_bo_ref, Sk)

    # ---- feed-forward sub-layer ----
    xn = _rms(x, ff_norm_ref[...], eps)
    h1 = jnp.maximum(_mm(xn, ff_w1_ref[...]) + ff_b1_ref[...], 0.0)
    x = x + _mm(h1, ff_w2_ref[...]) + ff_b2_ref[...]

    # ---- fused final decoder RMSNorm (last block only) ----
    if do_final:
        x = _rms(x, fnorm_ref[...], eps)

    o_ref[...] = x.reshape(1, S, D)


# --------------------------- pallas wrappers ---------------------------------

def _full_spec(arr):
    n = arr.ndim
    return pl.BlockSpec(arr.shape, lambda b, _n=n: (0,) * _n)


def pallas_decoder_block(p, x, enc, tpad, spad, n_heads, eps, final_norm=None):
    B, S, D = x.shape
    Sk = enc.shape[1]
    do_final = final_norm is not None
    fnorm = final_norm if do_final else p['ff_norm']   # dummy (unused) when not last
    weights = (p['sa_norm'], p['sa_wqkv'], p['sa_bqkv'], p['sa_wo'], p['sa_bo'],
               p['ca_norm'], p['ca_wq'], p['ca_bq'], p['ca_wkv'], p['ca_bkv'],
               p['ca_wo'], p['ca_bo'],
               p['ff_norm'], p['ff_w1'], p['ff_b1'], p['ff_w2'], p['ff_b2'],
               fnorm)
    kernel = functools.partial(decoder_block_kernel, S, Sk, D, n_heads, eps, do_final)

    in_specs = ([pl.BlockSpec((1, S, D), lambda b: (b, 0, 0)),     # x
                 pl.BlockSpec((1, Sk, D), lambda b: (b, 0, 0)),    # encoder output
                 pl.BlockSpec((1, 1, S), lambda b: (b, 0, 0)),     # tgt key-pad
                 pl.BlockSpec((1, 1, Sk), lambda b: (b, 0, 0))]    # src key-pad
                + [_full_spec(w) for w in weights])                # resident weights

    return pl.pallas_call(
        kernel,
        grid=(B,),
        out_shape=jax.ShapeDtypeStruct((B, S, D), jnp.float32),
        in_specs=in_specs,
        out_specs=pl.BlockSpec((1, S, D), lambda b: (b, 0, 0)),
        compiler_params=pltpu.CompilerParams(
            dimension_semantics=("parallel",),
            vmem_limit_bytes=64 * 1024 * 1024),
    )(x, enc, tpad, spad, *weights)


def decoder_forward_pallas(params, tgt, enc_out, d_mask, padding_mask, n_heads, eps):
    """tgt: [B,S,D]  enc_out: [B,Sk,D]  d_mask: [B,1,S,S]  padding_mask: [B,1,1,Sk]

    d_mask is the standard (key-pad & causal) decoder mask built by the surrounding
    Transformer; the causal part is rebuilt in-kernel, so only the key-pad rows
    (last, fully visible query row of d_mask) are shipped to the kernel.
    """
    B, S, D = tgt.shape
    Sk = enc_out.shape[1]
    tpad = (d_mask.reshape(B, S, S)[:, S - 1, :] != 0).astype(jnp.int32).reshape(B, 1, S)
    spad = (padding_mask.reshape(B, Sk) != 0).astype(jnp.int32).reshape(B, 1, Sk)

    x = tgt
    n = len(params['blocks'])
    for i, bp in enumerate(params['blocks']):
        fin = params['norm'] if i == n - 1 else None
        x = pallas_decoder_block(bp, x, enc_out, tpad, spad, n_heads, eps,
                                 final_norm=fin)
    return x


# --------------------------- pure-JAX reference -------------------------------

def decoder_forward_ref(params, tgt, enc_out, d_mask, padding_mask, n_heads, eps):
    B, S, D = tgt.shape
    Sk = enc_out.shape[1]
    hd = D // n_heads
    keep_d = d_mask.reshape(B, S, S) != 0
    keep_p = jnp.broadcast_to(padding_mask.reshape(B, 1, Sk) != 0, (B, S, Sk))

    def rms(t, w):
        return t * jax.lax.rsqrt(jnp.mean(t * t, -1, keepdims=True) + eps) * w

    def mm(a, w):
        return jnp.dot(a.astype(jnp.bfloat16), w.astype(jnp.bfloat16),
                       preferred_element_type=jnp.float32)

    def mha(q, k, v, keep, wo, bo, kv_len):
        q = q.reshape(B, S, n_heads, hd).transpose(0, 2, 1, 3)
        k = k.reshape(B, kv_len, n_heads, hd).transpose(0, 2, 1, 3)
        v = v.reshape(B, kv_len, n_heads, hd).transpose(0, 2, 1, 3)
        s = jnp.einsum('bhqd,bhkd->bhqk', q.astype(jnp.bfloat16), k.astype(jnp.bfloat16),
                       preferred_element_type=jnp.float32) / math.sqrt(hd)
        s = jnp.where(keep[:, None, :, :], s, NEG_INF)
        p_ = jax.nn.softmax(s, axis=-1)
        o = jnp.einsum('bhqk,bhkd->bhqd', p_.astype(jnp.bfloat16), v.astype(jnp.bfloat16),
                       preferred_element_type=jnp.float32)
        o = o.transpose(0, 2, 1, 3).reshape(B * S, D)
        return mm(o, wo) + bo

    x = tgt.reshape(B * S, D)
    enc = enc_out.reshape(B * Sk, D)
    for p in params['blocks']:
        xn = rms(x, p['sa_norm'])
        qkv = mm(xn, p['sa_wqkv']) + p['sa_bqkv']
        x = x + mha(qkv[:, :D], qkv[:, D:2 * D], qkv[:, 2 * D:],
                    keep_d, p['sa_wo'], p['sa_bo'], S)
        xn = rms(x, p['ca_norm'])
        q = mm(xn, p['ca_wq']) + p['ca_bq']
        kv = mm(enc, p['ca_wkv']) + p['ca_bkv']
        x = x + mha(q, kv[:, :D], kv[:, D:], keep_p, p['ca_wo'], p['ca_bo'], Sk)
        xn = rms(x, p['ff_norm'])
        h = jnp.maximum(mm(xn, p['ff_w1']) + p['ff_b1'], 0.0)
        x = x + mm(h, p['ff_w2']) + p['ff_b2']
    x = rms(x, params['norm'])
    return x.reshape(B, S, D)


# --------------------------- deterministic init --------------------------------

def init_decoder_params(key, n_layers, D, hidden, w_dtype=jnp.bfloat16):
    def linear(k, din, dout):
        k1, k2 = jax.random.split(k)
        w = jax.random.normal(k1, (din, dout), jnp.float32) * 0.06
        b = jax.random.normal(k2, (1, dout), jnp.float32) * 0.02
        return w, b

    def norm_w(k, d):
        return 1.0 + 0.1 * jax.random.normal(k, (1, d), jnp.float32)

    keys = jax.random.split(key, n_layers + 1)
    blocks = []
    for bkey in keys[:-1]:
        ks = jax.random.split(bkey, 13)
        wq, bq = linear(ks[0], D, D)
        wk, bk = linear(ks[1], D, D)
        wv, bv = linear(ks[2], D, D)
        wo, bo = linear(ks[3], D, D)
        cwq, cbq = linear(ks[4], D, D)
        cwk, cbk = linear(ks[5], D, D)
        cwv, cbv = linear(ks[6], D, D)
        cwo, cbo = linear(ks[7], D, D)
        w1, b1 = linear(ks[8], D, hidden)
        w2, b2 = linear(ks[9], hidden, D)
        blocks.append(dict(
            sa_norm=norm_w(ks[10], D),
            sa_wqkv=jnp.concatenate([wq, wk, wv], axis=1).astype(w_dtype),
            sa_bqkv=jnp.concatenate([bq, bk, bv], axis=1),
            sa_wo=wo.astype(w_dtype), sa_bo=bo,
            ca_norm=norm_w(ks[11], D),
            ca_wq=cwq.astype(w_dtype), ca_bq=cbq,
            ca_wkv=jnp.concatenate([cwk, cwv], axis=1).astype(w_dtype),
            ca_bkv=jnp.concatenate([cbk, cbv], axis=1),
            ca_wo=cwo.astype(w_dtype), ca_bo=cbo,
            ff_norm=norm_w(ks[12], D),
            ff_w1=w1.astype(w_dtype), ff_b1=b1,
            ff_w2=w2.astype(w_dtype), ff_b2=b2,
        ))
    return dict(blocks=blocks,
                norm=1.0 + 0.1 * jax.random.normal(keys[-1], (1, D), jnp.float32))


# --------------------------- main ----------------------------------------------

if __name__ == "__main__":
    B, S, D, H, HIDDEN, LAYERS = 2, 8, 32, 4, 64, 2
    EPS = 1e-6
    PAD = 0

    key = jax.random.PRNGKey(0)
    kp, kt, ke = jax.random.split(key, 3)
    params = init_decoder_params(kp, LAYERS, D, HIDDEN)

    # decoder input (already embedded) and encoder output
    tgt = jax.random.normal(kt, (B, S, D), jnp.float32)
    enc_out = jax.random.normal(ke, (B, S, D), jnp.float32)

    # masks exactly as the surrounding Transformer builds them
    tgt_tokens = jnp.array([[2, 11, 4, 7, 3, 0, 0, 0],
                            [5, 9, 13, 2, 8, 6, 1, 0]], jnp.int32)
    src_tokens = jnp.array([[3, 7, 12, 5, 9, 2, 0, 0],
                            [4, 1, 8, 6, 0, 0, 0, 0]], jnp.int32)
    lookahead = jnp.tril(jnp.ones((1, 1, S, S), dtype=bool))
    d_mask = (tgt_tokens != PAD)[:, None, None, :] & lookahead     # [B,1,S,S]
    padding_mask = (src_tokens != PAD)[:, None, None, :]           # [B,1,1,S]

    out = decoder_forward_pallas(params, tgt, enc_out, d_mask, padding_mask, H, EPS)
    out = jax.block_until_ready(out)

    ref = decoder_forward_ref(params, tgt, enc_out, d_mask, padding_mask, H, EPS)
    ref = jax.block_until_ready(ref)

    assert out.shape == (B, S, D)
    np.testing.assert_allclose(np.asarray(out), np.asarray(ref), rtol=2e-2, atol=2e-2)

    print("KERNEL_OK")
</pallas_src>

<mosaic_0001>
module attributes {stable_mosaic.version = 11 : i64} {
  func.func @decoder_block_kernel(%arg0: i32, %arg1: memref<1x8x32xf32, #tpu.memory_space<vmem>>, %arg2: memref<1x8x32xf32, #tpu.memory_space<vmem>>, %arg3: memref<1x1x8xi32, #tpu.memory_space<vmem>>, %arg4: memref<1x1x8xi32, #tpu.memory_space<vmem>>, %arg5: memref<1x32xf32, #tpu.memory_space<vmem>>, %arg6: memref<32x96xbf16, #tpu.memory_space<vmem>>, %arg7: memref<1x96xf32, #tpu.memory_space<vmem>>, %arg8: memref<32x32xbf16, #tpu.memory_space<vmem>>, %arg9: memref<1x32xf32, #tpu.memory_space<vmem>>, %arg10: memref<1x32xf32, #tpu.memory_space<vmem>>, %arg11: memref<32x32xbf16, #tpu.memory_space<vmem>>, %arg12: memref<1x32xf32, #tpu.memory_space<vmem>>, %arg13: memref<32x64xbf16, #tpu.memory_space<vmem>>, %arg14: memref<1x64xf32, #tpu.memory_space<vmem>>, %arg15: memref<32x32xbf16, #tpu.memory_space<vmem>>, %arg16: memref<1x32xf32, #tpu.memory_space<vmem>>, %arg17: memref<1x32xf32, #tpu.memory_space<vmem>>, %arg18: memref<32x64xbf16, #tpu.memory_space<vmem>>, %arg19: memref<1x64xf32, #tpu.memory_space<vmem>>, %arg20: memref<64x32xbf16, #tpu.memory_space<vmem>>, %arg21: memref<1x32xf32, #tpu.memory_space<vmem>>, %arg22: memref<1x32xf32, #tpu.memory_space<vmem>>, %arg23: memref<1x8x32xf32, #tpu.memory_space<vmem>>) attributes {dimension_semantics = [#tpu.dimension_semantics<parallel>], iteration_bounds = array<i64: 2>, scalar_prefetch = 0 : i64, scratch_operands = 0 : i64, tpu.core_type = #tpu.core_type<tc>, window_params = [{transform_indices = @transform_0, window_bounds = array<i64: 1, 8, 32>}, {transform_indices = @transform_1, window_bounds = array<i64: 1, 8, 32>}, {transform_indices = @transform_2, window_bounds = array<i64: 1, 1, 8>}, {transform_indices = @transform_3, window_bounds = array<i64: 1, 1, 8>}, {pipeline_mode = #tpu.pipeline_mode<synchronous>, transform_indices = @transform_4, window_bounds = array<i64: 1, 32>}, {pipeline_mode = #tpu.pipeline_mode<synchronous>, transform_indices = @transform_5, window_bounds = array<i64: 32, 96>}, {pipeline_mode = #tpu.pipeline_mode<synchronous>, transform_indices = @transform_6, window_bounds = array<i64: 1, 96>}, {pipeline_mode = #tpu.pipeline_mode<synchronous>, transform_indices = @transform_7, window_bounds = array<i64: 32, 32>}, {pipeline_mode = #tpu.pipeline_mode<synchronous>, transform_indices = @transform_8, window_bounds = array<i64: 1, 32>}, {pipeline_mode = #tpu.pipeline_mode<synchronous>, transform_indices = @transform_9, window_bounds = array<i64: 1, 32>}, {pipeline_mode = #tpu.pipeline_mode<synchronous>, transform_indices = @transform_10, window_bounds = array<i64: 32, 32>}, {pipeline_mode = #tpu.pipeline_mode<synchronous>, transform_indices = @transform_11, window_bounds = array<i64: 1, 32>}, {pipeline_mode = #tpu.pipeline_mode<synchronous>, transform_indices = @transform_12, window_bounds = array<i64: 32, 64>}, {pipeline_mode = #tpu.pipeline_mode<synchronous>, transform_indices = @transform_13, window_bounds = array<i64: 1, 64>}, {pipeline_mode = #tpu.pipeline_mode<synchronous>, transform_indices = @transform_14, window_bounds = array<i64: 32, 32>}, {pipeline_mode = #tpu.pipeline_mode<synchronous>, transform_indices = @transform_15, window_bounds = array<i64: 1, 32>}, {pipeline_mode = #tpu.pipeline_mode<synchronous>, transform_indices = @transform_16, window_bounds = array<i64: 1, 32>}, {pipeline_mode = #tpu.pipeline_mode<synchronous>, transform_indices = @transform_17, window_bounds = array<i64: 32, 64>}, {pipeline_mode = #tpu.pipeline_mode<synchronous>, transform_indices = @transform_18, window_bounds = array<i64: 1, 64>}, {pipeline_mode = #tpu.pipeline_mode<synchronous>, transform_indices = @transform_19, window_bounds = array<i64: 64, 32>}, {pipeline_mode = #tpu.pipeline_mode<synchronous>, transform_indices = @transform_20, window_bounds = array<i64: 1, 32>}, {pipeline_mode = #tpu.pipeline_mode<synchronous>, transform_indices = @transform_21, window_bounds = array<i64: 1, 32>}, {transform_indices = @transform_22, window_bounds = array<i64: 1, 8, 32>}]} {
    %c0 = arith.constant 0 : index
    %c0_0 = arith.constant 0 : index
    %c0_1 = arith.constant 0 : index
    %0 = vector.load %arg1[%c0, %c0_0, %c0_1] : memref<1x8x32xf32, #tpu.memory_space<vmem>>, vector<1x8x32xf32>
    %1 = vector.shape_cast %0 : vector<1x8x32xf32> to vector<8x32xf32>
    %c0_2 = arith.constant 0 : index
    %c0_3 = arith.constant 0 : index
    %c0_4 = arith.constant 0 : index
    %2 = vector.load %arg2[%c0_2, %c0_3, %c0_4] : memref<1x8x32xf32, #tpu.memory_space<vmem>>, vector<1x8x32xf32>
    %3 = vector.shape_cast %2 : vector<1x8x32xf32> to vector<8x32xf32>
    %4 = tpu.iota {dimensions = array<i32: 0>} : vector<8x8xi32>
    %5 = tpu.iota {dimensions = array<i32: 1>} : vector<8x8xi32>
    %c0_5 = arith.constant 0 : index
    %c0_6 = arith.constant 0 : index
    %c0_7 = arith.constant 0 : index
    %6 = vector.load %arg3[%c0_5, %c0_6, %c0_7] : memref<1x1x8xi32, #tpu.memory_space<vmem>>, vector<1x1x8xi32>
    %7 = vector.shape_cast %6 : vector<1x1x8xi32> to vector<1x8xi32>
    %c0_i32 = arith.constant 0 : i32
    %8 = vector.broadcast %c0_i32 : i32 to vector<1x8xi32>
    %9 = arith.cmpi ne, %7, %8 : vector<1x8xi32>
    %10 = arith.cmpi sle, %5, %4 : vector<8x8xi32>
    %11 = vector.broadcast %9 : vector<1x8xi1> to vector<8x8xi1>
    %12 = arith.andi %10, %11 : vector<8x8xi1>
    %c0_8 = arith.constant 0 : index
    %c0_9 = arith.constant 0 : index
    %c0_10 = arith.constant 0 : index
    %13 = vector.load %arg4[%c0_8, %c0_9, %c0_10] : memref<1x1x8xi32, #tpu.memory_space<vmem>>, vector<1x1x8xi32>
    %14 = vector.shape_cast %13 : vector<1x1x8xi32> to vector<1x8xi32>
    %c0_i32_11 = arith.constant 0 : i32
    %15 = vector.broadcast %c0_i32_11 : i32 to vector<1x8xi32>
    %16 = arith.cmpi ne, %14, %15 : vector<1x8xi32>
    %17 = vector.shape_cast %16 : vector<1x8xi1> to vector<1x8xi1>
    %18 = vector.broadcast %17 : vector<1x8xi1> to vector<8x8xi1>
    %c0_12 = arith.constant 0 : index
    %c0_13 = arith.constant 0 : index
    %19 = vector.load %arg5[%c0_12, %c0_13] : memref<1x32xf32, #tpu.memory_space<vmem>>, vector<1x32xf32>
    %20 = arith.mulf %1, %1 : vector<8x32xf32>
    %cst = arith.constant dense<0.000000e+00> : vector<8xf32>
    %21 = vector.multi_reduction <add>, %20, %cst [1] : vector<8x32xf32> to vector<8xf32>
    %22 = vector.shape_cast %21 : vector<8xf32> to vector<8x1xf32>
    %cst_14 = arith.constant 3.200000e+01 : f32
    %23 = vector.broadcast %cst_14 : f32 to vector<8x1xf32>
    %24 = arith.divf %22, %23 : vector<8x1xf32>
    %cst_15 = arith.constant 9.99999997E-7 : f32
    %25 = vector.broadcast %cst_15 : f32 to vector<8x1xf32>
    %26 = arith.addf %24, %25 : vector<8x1xf32>
    %27 = math.rsqrt %26 : vector<8x1xf32>
    %28 = vector.broadcast %27 : vector<8x1xf32> to vector<8x32xf32>
    %29 = arith.mulf %1, %28 : vector<8x32xf32>
    %30 = vector.broadcast %19 : vector<1x32xf32> to vector<8x32xf32>
    %31 = arith.mulf %29, %30 : vector<8x32xf32>
    %c0_16 = arith.constant 0 : index
    %c0_17 = arith.constant 0 : index
    %32 = vector.load %arg6[%c0_16, %c0_17] : memref<32x96xbf16, #tpu.memory_space<vmem>>, vector<32x96xbf16>
    %33 = arith.truncf %31 : vector<8x32xf32> to vector<8x32xbf16>
    %cst_18 = arith.constant dense<0.000000e+00> : vector<8x96xf32>
    %34 = tpu.matmul %33, %32, %cst_18 {dimension_numbers = #tpu.dot_dimension_numbers<[1], [0], [0], [1], [0, 0, 1, 1], [], []>} : vector<8x32xbf16>, vector<32x96xbf16>, vector<8x96xf32> -> vector<8x96xf32>
    %c0_19 = arith.constant 0 : index
    %c0_20 = arith.constant 0 : index
    %35 = vector.load %arg7[%c0_19, %c0_20] : memref<1x96xf32, #tpu.memory_space<vmem>>, vector<1x96xf32>
    %36 = vector.broadcast %35 : vector<1x96xf32> to vector<8x96xf32>
    %37 = arith.addf %34, %36 : vector<8x96xf32>
    %38 = vector.extract_strided_slice %37 {offsets = [0, 0], sizes = [8, 32], strides = [1, 1]} : vector<8x96xf32> to vector<8x32xf32>
    %39 = vector.extract_strided_slice %37 {offsets = [0, 32], sizes = [8, 32], strides = [1, 1]} : vector<8x96xf32> to vector<8x32xf32>
    %40 = vector.extract_strided_slice %37 {offsets = [0, 64], sizes = [8, 32], strides = [1, 1]} : vector<8x96xf32> to vector<8x32xf32>
    %41 = vector.shape_cast %38 : vector<8x32xf32> to vector<8x4x8xf32>
    %42 = arith.truncf %41 : vector<8x4x8xf32> to vector<8x4x8xbf16>
    %43 = vector.shape_cast %39 : vector<8x32xf32> to vector<8x4x8xf32>
    %44 = arith.truncf %43 : vector<8x4x8xf32> to vector<8x4x8xbf16>
    %45 = vector.shape_cast %40 : vector<8x32xf32> to vector<8x4x8xf32>
    %46 = arith.truncf %45 : vector<8x4x8xf32> to vector<8x4x8xbf16>
    "tpu.trace_start"() <{level = 10 : i32, message = "qhd,khd->hqk"}> : () -> ()
    %cst_21 = arith.constant dense<0.000000e+00> : vector<4x8x8xf32>
    %47 = tpu.matmul %42, %44, %cst_21 {dimension_numbers = #tpu.dot_dimension_numbers<[2], [2], [0], [0], [0, 1, 0, 0, 1, 0], [1], [1]>} : vector<8x4x8xbf16>, vector<8x4x8xbf16>, vector<4x8x8xf32> -> vector<4x8x8xf32>
    "tpu.trace_stop"() : () -> ()
    %cst_22 = arith.constant 0.353553385 : f32
    %48 = vector.broadcast %cst_22 : f32 to vector<4x8x8xf32>
    %49 = arith.mulf %47, %48 : vector<4x8x8xf32>
    %50 = vector.shape_cast %12 : vector<8x8xi1> to vector<1x8x8xi1>
    %cst_23 = arith.constant -1.000000e+09 : f32
    %51 = vector.shape_cast %50 : vector<1x8x8xi1> to vector<1x8x8xi1>
    %52 = vector.broadcast %51 : vector<1x8x8xi1> to vector<4x8x8xi1>
    %53 = vector.broadcast %cst_23 : f32 to vector<4x8x8xf32>
    %54 = arith.select %52, %49, %53 : vector<4x8x8xi1>, vector<4x8x8xf32>
    %cst_24 = arith.constant dense<0xFF800000> : vector<4x8xf32>
    %55 = vector.multi_reduction <maximumf>, %54, %cst_24 [2] : vector<4x8x8xf32> to vector<4x8xf32>
    %56 = vector.shape_cast %55 : vector<4x8xf32> to vector<4x8x1xf32>
    %57 = vector.broadcast %56 : vector<4x8x1xf32> to vector<4x8x8xf32>
    %58 = arith.subf %54, %57 : vector<4x8x8xf32>
    %59 = math.exp %58 : vector<4x8x8xf32>
    %cst_25 = arith.constant dense<0.000000e+00> : vector<4x8xf32>
    %60 = vector.multi_reduction <add>, %59, %cst_25 [2] : vector<4x8x8xf32> to vector<4x8xf32>
    %61 = vector.shape_cast %60 : vector<4x8xf32> to vector<4x8x1xf32>
    %62 = tpu.reciprocal %61 {approx = true} : vector<4x8x1xf32> -> vector<4x8x1xf32>
    %63 = vector.broadcast %62 : vector<4x8x1xf32> to vector<4x8x8xf32>
    %64 = arith.mulf %59, %63 : vector<4x8x8xf32>
    %65 = arith.truncf %64 : vector<4x8x8xf32> to vector<4x8x8xbf16>
    "tpu.trace_start"() <{level = 10 : i32, message = "hqk,khd->qhd"}> : () -> ()
    %cst_26 = arith.constant dense<0.000000e+00> : vector<4x8x8xf32>
    %66 = tpu.matmul %46, %65, %cst_26 {dimension_numbers = #tpu.dot_dimension_numbers<[0], [2], [2], [1], [0, 1, 0, 2, 1, 1], [1], [0]>} : vector<8x4x8xbf16>, vector<4x8x8xbf16>, vector<4x8x8xf32> -> vector<4x8x8xf32>
    %67 = tpu.transpose %66, [2, 0, 1] : vector<4x8x8xf32> -> vector<8x4x8xf32>
    "tpu.trace_stop"() : () -> ()
    %68 = vector.shape_cast %67 : vector<8x4x8xf32> to vector<8x32xf32>
    %c0_27 = arith.constant 0 : index
    %c0_28 = arith.constant 0 : index
    %69 = vector.load %arg8[%c0_27, %c0_28] : memref<32x32xbf16, #tpu.memory_space<vmem>>, vector<32x32xbf16>
    %70 = arith.truncf %68 : vector<8x32xf32> to vector<8x32xbf16>
    %cst_29 = arith.constant dense<0.000000e+00> : vector<8x32xf32>
    %71 = tpu.matmul %70, %69, %cst_29 {dimension_numbers = #tpu.dot_dimension_numbers<[1], [0], [0], [1], [0, 0, 1, 1], [], []>} : vector<8x32xbf16>, vector<32x32xbf16>, vector<8x32xf32> -> vector<8x32xf32>
    %c0_30 = arith.constant 0 : index
    %c0_31 = arith.constant 0 : index
    %72 = vector.load %arg9[%c0_30, %c0_31] : memref<1x32xf32, #tpu.memory_space<vmem>>, vector<1x32xf32>
    %73 = vector.broadcast %72 : vector<1x32xf32> to vector<8x32xf32>
    %74 = arith.addf %71, %73 : vector<8x32xf32>
    %75 = arith.addf %1, %74 : vector<8x32xf32>
    %c0_32 = arith.constant 0 : index
    %c0_33 = arith.constant 0 : index
    %76 = vector.load %arg10[%c0_32, %c0_33] : memref<1x32xf32, #tpu.memory_space<vmem>>, vector<1x32xf32>
    %77 = arith.mulf %75, %75 : vector<8x32xf32>
    %cst_34 = arith.constant dense<0.000000e+00> : vector<8xf32>
    %78 = vector.multi_reduction <add>, %77, %cst_34 [1] : vector<8x32xf32> to vector<8xf32>
    %79 = vector.shape_cast %78 : vector<8xf32> to vector<8x1xf32>
    %cst_35 = arith.constant 3.200000e+01 : f32
    %80 = vector.broadcast %cst_35 : f32 to vector<8x1xf32>
    %81 = arith.divf %79, %80 : vector<8x1xf32>
    %cst_36 = arith.constant 9.99999997E-7 : f32
    %82 = vector.broadcast %cst_36 : f32 to vector<8x1xf32>
    %83 = arith.addf %81, %82 : vector<8x1xf32>
    %84 = math.rsqrt %83 : vector<8x1xf32>
    %85 = vector.broadcast %84 : vector<8x1xf32> to vector<8x32xf32>
    %86 = arith.mulf %75, %85 : vector<8x32xf32>
    %87 = vector.broadcast %76 : vector<1x32xf32> to vector<8x32xf32>
    %88 = arith.mulf %86, %87 : vector<8x32xf32>
    %c0_37 = arith.constant 0 : index
    %c0_38 = arith.constant 0 : index
    %89 = vector.load %arg11[%c0_37, %c0_38] : memref<32x32xbf16, #tpu.memory_space<vmem>>, vector<32x32xbf16>
    %90 = arith.truncf %88 : vector<8x32xf32> to vector<8x32xbf16>
    %cst_39 = arith.constant dense<0.000000e+00> : vector<8x32xf32>
    %91 = tpu.matmul %90, %89, %cst_39 {dimension_numbers = #tpu.dot_dimension_numbers<[1], [0], [0], [1], [0, 0, 1, 1], [], []>} : vector<8x32xbf16>, vector<32x32xbf16>, vector<8x32xf32> -> vector<8x32xf32>
    %c0_40 = arith.constant 0 : index
    %c0_41 = arith.constant 0 : index
    %92 = vector.load %arg12[%c0_40, %c0_41] : memref<1x32xf32, #tpu.memory_space<vmem>>, vector<1x32xf32>
    %93 = vector.broadcast %92 : vector<1x32xf32> to vector<8x32xf32>
    %94 = arith.addf %91, %93 : vector<8x32xf32>
    %c0_42 = arith.constant 0 : index
    %c0_43 = arith.constant 0 : index
    %95 = vector.load %arg13[%c0_42, %c0_43] : memref<32x64xbf16, #tpu.memory_space<vmem>>, vector<32x64xbf16>
    %96 = arith.truncf %3 : vector<8x32xf32> to vector<8x32xbf16>
    %cst_44 = arith.constant dense<0.000000e+00> : vector<8x64xf32>
    %97 = tpu.matmul %96, %95, %cst_44 {dimension_numbers = #tpu.dot_dimension_numbers<[1], [0], [0], [1], [0, 0, 1, 1], [], []>} : vector<8x32xbf16>, vector<32x64xbf16>, vector<8x64xf32> -> vector<8x64xf32>
    %c0_45 = arith.constant 0 : index
    %c0_46 = arith.constant 0 : index
    %98 = vector.load %arg14[%c0_45, %c0_46] : memref<1x64xf32, #tpu.memory_space<vmem>>, vector<1x64xf32>
    %99 = vector.broadcast %98 : vector<1x64xf32> to vector<8x64xf32>
    %100 = arith.addf %97, %99 : vector<8x64xf32>
    %101 = vector.extract_strided_slice %100 {offsets = [0, 0], sizes = [8, 32], strides = [1, 1]} : vector<8x64xf32> to vector<8x32xf32>
    %102 = vector.extract_strided_slice %100 {offsets = [0, 32], sizes = [8, 32], strides = [1, 1]} : vector<8x64xf32> to vector<8x32xf32>
    %103 = vector.shape_cast %94 : vector<8x32xf32> to vector<8x4x8xf32>
    %104 = arith.truncf %103 : vector<8x4x8xf32> to vector<8x4x8xbf16>
    %105 = vector.shape_cast %101 : vector<8x32xf32> to vector<8x4x8xf32>
    %106 = arith.truncf %105 : vector<8x4x8xf32> to vector<8x4x8xbf16>
    %107 = vector.shape_cast %102 : vector<8x32xf32> to vector<8x4x8xf32>
    %108 = arith.truncf %107 : vector<8x4x8xf32> to vector<8x4x8xbf16>
    "tpu.trace_start"() <{level = 10 : i32, message = "qhd,khd->hqk"}> : () -> ()
    %cst_47 = arith.constant dense<0.000000e+00> : vector<4x8x8xf32>
    %109 = tpu.matmul %104, %106, %cst_47 {dimension_numbers = #tpu.dot_dimension_numbers<[2], [2], [0], [0], [0, 1, 0, 0, 1, 0], [1], [1]>} : vector<8x4x8xbf16>, vector<8x4x8xbf16>, vector<4x8x8xf32> -> vector<4x8x8xf32>
    "tpu.trace_stop"() : () -> ()
    %cst_48 = arith.constant 0.353553385 : f32
    %110 = vector.broadcast %cst_48 : f32 to vector<4x8x8xf32>
    %111 = arith.mulf %109, %110 : vector<4x8x8xf32>
    %112 = vector.shape_cast %18 : vector<8x8xi1> to vector<1x8x8xi1>
    %cst_49 = arith.constant -1.000000e+09 : f32
    %113 = vector.shape_cast %112 : vector<1x8x8xi1> to vector<1x8x8xi1>
    %114 = vector.broadcast %113 : vector<1x8x8xi1> to vector<4x8x8xi1>
    %115 = vector.broadcast %cst_49 : f32 to vector<4x8x8xf32>
    %116 = arith.select %114, %111, %115 : vector<4x8x8xi1>, vector<4x8x8xf32>
    %cst_50 = arith.constant dense<0xFF800000> : vector<4x8xf32>
    %117 = vector.multi_reduction <maximumf>, %116, %cst_50 [2] : vector<4x8x8xf32> to vector<4x8xf32>
    %118 = vector.shape_cast %117 : vector<4x8xf32> to vector<4x8x1xf32>
    %119 = vector.broadcast %118 : vector<4x8x1xf32> to vector<4x8x8xf32>
    %120 = arith.subf %116, %119 : vector<4x8x8xf32>
    %121 = math.exp %120 : vector<4x8x8xf32>
    %cst_51 = arith.constant dense<0.000000e+00> : vector<4x8xf32>
    %122 = vector.multi_reduction <add>, %121, %cst_51 [2] : vector<4x8x8xf32> to vector<4x8xf32>
    %123 = vector.shape_cast %122 : vector<4x8xf32> to vector<4x8x1xf32>
    %124 = tpu.reciprocal %123 {approx = true} : vector<4x8x1xf32> -> vector<4x8x1xf32>
    %125 = vector.broadcast %124 : vector<4x8x1xf32> to vector<4x8x8xf32>
    %126 = arith.mulf %121, %125 : vector<4x8x8xf32>
    %127 = arith.truncf %126 : vector<4x8x8xf32> to vector<4x8x8xbf16>
    "tpu.trace_start"() <{level = 10 : i32, message = "hqk,khd->qhd"}> : () -> ()
    %cst_52 = arith.constant dense<0.000000e+00> : vector<4x8x8xf32>
    %128 = tpu.matmul %108, %127, %cst_52 {dimension_numbers = #tpu.dot_dimension_numbers<[0], [2], [2], [1], [0, 1, 0, 2, 1, 1], [1], [0]>} : vector<8x4x8xbf16>, vector<4x8x8xbf16>, vector<4x8x8xf32> -> vector<4x8x8xf32>
    %129 = tpu.transpose %128, [2, 0, 1] : vector<4x8x8xf32> -> vector<8x4x8xf32>
    "tpu.trace_stop"() : () -> ()
    %130 = vector.shape_cast %129 : vector<8x4x8xf32> to vector<8x32xf32>
    %c0_53 = arith.constant 0 : index
    %c0_54 = arith.constant 0 : index
    %131 = vector.load %arg15[%c0_53, %c0_54] : memref<32x32xbf16, #tpu.memory_space<vmem>>, vector<32x32xbf16>
    %132 = arith.truncf %130 : vector<8x32xf32> to vector<8x32xbf16>
    %cst_55 = arith.constant dense<0.000000e+00> : vector<8x32xf32>
    %133 = tpu.matmul %132, %131, %cst_55 {dimension_numbers = #tpu.dot_dimension_numbers<[1], [0], [0], [1], [0, 0, 1, 1], [], []>} : vector<8x32xbf16>, vector<32x32xbf16>, vector<8x32xf32> -> vector<8x32xf32>
    %c0_56 = arith.constant 0 : index
    %c0_57 = arith.constant 0 : index
    %134 = vector.load %arg16[%c0_56, %c0_57] : memref<1x32xf32, #tpu.memory_space<vmem>>, vector<1x32xf32>
    %135 = vector.broadcast %134 : vector<1x32xf32> to vector<8x32xf32>
    %136 = arith.addf %133, %135 : vector<8x32xf32>
    %137 = arith.addf %75, %136 : vector<8x32xf32>
    %c0_58 = arith.constant 0 : index
    %c0_59 = arith.constant 0 : index
    %138 = vector.load %arg17[%c0_58, %c0_59] : memref<1x32xf32, #tpu.memory_space<vmem>>, vector<1x32xf32>
    %139 = arith.mulf %137, %137 : vector<8x32xf32>
    %cst_60 = arith.constant dense<0.000000e+00> : vector<8xf32>
    %140 = vector.multi_reduction <add>, %139, %cst_60 [1] : vector<8x32xf32> to vector<8xf32>
    %141 = vector.shape_cast %140 : vector<8xf32> to vector<8x1xf32>
    %cst_61 = arith.constant 3.200000e+01 : f32
    %142 = vector.broadcast %cst_61 : f32 to vector<8x1xf32>
    %143 = arith.divf %141, %142 : vector<8x1xf32>
    %cst_62 = arith.constant 9.99999997E-7 : f32
    %144 = vector.broadcast %cst_62 : f32 to vector<8x1xf32>
    %145 = arith.addf %143, %144 : vector<8x1xf32>
    %146 = math.rsqrt %145 : vector<8x1xf32>
    %147 = vector.broadcast %146 : vector<8x1xf32> to vector<8x32xf32>
    %148 = arith.mulf %137, %147 : vector<8x32xf32>
    %149 = vector.broadcast %138 : vector<1x32xf32> to vector<8x32xf32>
    %150 = arith.mulf %148, %149 : vector<8x32xf32>
    %c0_63 = arith.constant 0 : index
    %c0_64 = arith.constant 0 : index
    %151 = vector.load %arg18[%c0_63, %c0_64] : memref<32x64xbf16, #tpu.memory_space<vmem>>, vector<32x64xbf16>
    %152 = arith.truncf %150 : vector<8x32xf32> to vector<8x32xbf16>
    %cst_65 = arith.constant dense<0.000000e+00> : vector<8x64xf32>
    %153 = tpu.matmul %152, %151, %cst_65 {dimension_numbers = #tpu.dot_dimension_numbers<[1], [0], [0], [1], [0, 0, 1, 1], [], []>} : vector<8x32xbf16>, vector<32x64xbf16>, vector<8x64xf32> -> vector<8x64xf32>
    %c0_66 = arith.constant 0 : index
    %c0_67 = arith.constant 0 : index
    %154 = vector.load %arg19[%c0_66, %c0_67] : memref<1x64xf32, #tpu.memory_space<vmem>>, vector<1x64xf32>
    %155 = vector.broadcast %154 : vector<1x64xf32> to vector<8x64xf32>
    %156 = arith.addf %153, %155 : vector<8x64xf32>
    %cst_68 = arith.constant 0.000000e+00 : f32
    %157 = vector.broadcast %cst_68 : f32 to vector<8x64xf32>
    %158 = arith.maximumf %156, %157 : vector<8x64xf32>
    %c0_69 = arith.constant 0 : index
    %c0_70 = arith.constant 0 : index
    %159 = vector.load %arg20[%c0_69, %c0_70] : memref<64x32xbf16, #tpu.memory_space<vmem>>, vector<64x32xbf16>
    %160 = arith.truncf %158 : vector<8x64xf32> to vector<8x64xbf16>
    %cst_71 = arith.constant dense<0.000000e+00> : vector<8x32xf32>
    %161 = tpu.matmul %160, %159, %cst_71 {dimension_numbers = #tpu.dot_dimension_numbers<[1], [0], [0], [1], [0, 0, 1, 1], [], []>} : vector<8x64xbf16>, vector<64x32xbf16>, vector<8x32xf32> -> vector<8x32xf32>
    %162 = arith.addf %137, %161 : vector<8x32xf32>
    %c0_72 = arith.constant 0 : index
    %c0_73 = arith.constant 0 : index
    %163 = vector.load %arg21[%c0_72, %c0_73] : memref<1x32xf32, #tpu.memory_space<vmem>>, vector<1x32xf32>
    %164 = vector.broadcast %163 : vector<1x32xf32> to vector<8x32xf32>
    %165 = arith.addf %162, %164 : vector<8x32xf32>
    %166 = vector.shape_cast %165 : vector<8x32xf32> to vector<1x8x32xf32>
    %c0_74 = arith.constant 0 : index
    %c0_75 = arith.constant 0 : index
    %c0_76 = arith.constant 0 : index
    %167 = vector.load %arg23[%c0_74, %c0_75, %c0_76] : memref<1x8x32xf32, #tpu.memory_space<vmem>>, vector<1x8x32xf32>
    tpu.vector_store %arg23[%c0_74, %c0_75, %c0_76], %166 {strides = array<i32>} : memref<1x8x32xf32, #tpu.memory_space<vmem>>, vector<1x8x32xf32>,
    return
  }
  func.func @transform_0(%arg0: i32) -> (i32, i32, i32) {
    %c0_i32 = arith.constant 0 : i32
    %c0_i32_0 = arith.constant 0 : i32
    %c0_i32_1 = arith.constant 0 : i32
    return %arg0, %c0_i32, %c0_i32_0 : i32, i32, i32
  }
  func.func @transform_1(%arg0: i32) -> (i32, i32, i32) {
    %c0_i32 = arith.constant 0 : i32
    %c0_i32_0 = arith.constant 0 : i32
    %c0_i32_1 = arith.constant 0 : i32
    return %arg0, %c0_i32, %c0_i32_0 : i32, i32, i32
  }
  func.func @transform_2(%arg0: i32) -> (i32, i32, i32) {
    %c0_i32 = arith.constant 0 : i32
    %c0_i32_0 = arith.constant 0 : i32
    %c0_i32_1 = arith.constant 0 : i32
    return %arg0, %c0_i32, %c0_i32_0 : i32, i32, i32
  }
  func.func @transform_3(%arg0: i32) -> (i32, i32, i32) {
    %c0_i32 = arith.constant 0 : i32
    %c0_i32_0 = arith.constant 0 : i32
    %c0_i32_1 = arith.constant 0 : i32
    return %arg0, %c0_i32, %c0_i32_0 : i32, i32, i32
  }
  func.func @transform_4(%arg0: i32) -> (i32, i32) {
    %c0_i32 = arith.constant 0 : i32
    %c0_i32_0 = arith.constant 0 : i32
    %c0_i32_1 = arith.constant 0 : i32
    return %c0_i32, %c0_i32_0 : i32, i32
  }
  func.func @transform_5(%arg0: i32) -> (i32, i32) {
    %c0_i32 = arith.constant 0 : i32
    %c0_i32_0 = arith.constant 0 : i32
    %c0_i32_1 = arith.constant 0 : i32
    return %c0_i32, %c0_i32_0 : i32, i32
  }
  func.func @transform_6(%arg0: i32) -> (i32, i32) {
    %c0_i32 = arith.constant 0 : i32
    %c0_i32_0 = arith.constant 0 : i32
    %c0_i32_1 = arith.constant 0 : i32
    return %c0_i32, %c0_i32_0 : i32, i32
  }
  func.func @transform_7(%arg0: i32) -> (i32, i32) {
    %c0_i32 = arith.constant 0 : i32
    %c0_i32_0 = arith.constant 0 : i32
    %c0_i32_1 = arith.constant 0 : i32
    return %c0_i32, %c0_i32_0 : i32, i32
  }
  func.func @transform_8(%arg0: i32) -> (i32, i32) {
    %c0_i32 = arith.constant 0 : i32
    %c0_i32_0 = arith.constant 0 : i32
    %c0_i32_1 = arith.constant 0 : i32
    return %c0_i32, %c0_i32_0 : i32, i32
  }
  func.func @transform_9(%arg0: i32) -> (i32, i32) {
    %c0_i32 = arith.constant 0 : i32
    %c0_i32_0 = arith.constant 0 : i32
    %c0_i32_1 = arith.constant 0 : i32
    return %c0_i32, %c0_i32_0 : i32, i32
  }
  func.func @transform_10(%arg0: i32) -> (i32, i32) {
    %c0_i32 = arith.constant 0 : i32
    %c0_i32_0 = arith.constant 0 : i32
    %c0_i32_1 = arith.constant 0 : i32
    return %c0_i32, %c0_i32_0 : i32, i32
  }
  func.func @transform_11(%arg0: i32) -> (i32, i32) {
    %c0_i32 = arith.constant 0 : i32
    %c0_i32_0 = arith.constant 0 : i32
    %c0_i32_1 = arith.constant 0 : i32
    return %c0_i32, %c0_i32_0 : i32, i32
  }
  func.func @transform_12(%arg0: i32) -> (i32, i32) {
    %c0_i32 = arith.constant 0 : i32
    %c0_i32_0 = arith.constant 0 : i32
    %c0_i32_1 = arith.constant 0 : i32
    return %c0_i32, %c0_i32_0 : i32, i32
  }
  func.func @transform_13(%arg0: i32) -> (i32, i32) {
    %c0_i32 = arith.constant 0 : i32
    %c0_i32_0 = arith.constant 0 : i32
    %c0_i32_1 = arith.constant 0 : i32
    return %c0_i32, %c0_i32_0 : i32, i32
  }
  func.func @transform_14(%arg0: i32) -> (i32, i32) {
    %c0_i32 = arith.constant 0 : i32
    %c0_i32_0 = arith.constant 0 : i32
    %c0_i32_1 = arith.constant 0 : i32
    return %c0_i32, %c0_i32_0 : i32, i32
  }
  func.func @transform_15(%arg0: i32) -> (i32, i32) {
    %c0_i32 = arith.constant 0 : i32
    %c0_i32_0 = arith.constant 0 : i32
    %c0_i32_1 = arith.constant 0 : i32
    return %c0_i32, %c0_i32_0 : i32, i32
  }
  func.func @transform_16(%arg0: i32) -> (i32, i32) {
    %c0_i32 = arith.constant 0 : i32
    %c0_i32_0 = arith.constant 0 : i32
    %c0_i32_1 = arith.constant 0 : i32
    return %c0_i32, %c0_i32_0 : i32, i32
  }
  func.func @transform_17(%arg0: i32) -> (i32, i32) {
    %c0_i32 = arith.constant 0 : i32
    %c0_i32_0 = arith.constant 0 : i32
    %c0_i32_1 = arith.constant 0 : i32
    return %c0_i32, %c0_i32_0 : i32, i32
  }
  func.func @transform_18(%arg0: i32) -> (i32, i32) {
    %c0_i32 = arith.constant 0 : i32
    %c0_i32_0 = arith.constant 0 : i32
    %c0_i32_1 = arith.constant 0 : i32
    return %c0_i32, %c0_i32_0 : i32, i32
  }
  func.func @transform_19(%arg0: i32) -> (i32, i32) {
    %c0_i32 = arith.constant 0 : i32
    %c0_i32_0 = arith.constant 0 : i32
    %c0_i32_1 = arith.constant 0 : i32
    return %c0_i32, %c0_i32_0 : i32, i32
  }
  func.func @transform_20(%arg0: i32) -> (i32, i32) {
    %c0_i32 = arith.constant 0 : i32
    %c0_i32_0 = arith.constant 0 : i32
    %c0_i32_1 = arith.constant 0 : i32
    return %c0_i32, %c0_i32_0 : i32, i32
  }
  func.func @transform_21(%arg0: i32) -> (i32, i32) {
    %c0_i32 = arith.constant 0 : i32
    %c0_i32_0 = arith.constant 0 : i32
    %c0_i32_1 = arith.constant 0 : i32
    return %c0_i32, %c0_i32_0 : i32, i32
  }
  func.func @transform_22(%arg0: i32) -> (i32, i32, i32) {
    %c0_i32 = arith.constant 0 : i32
    %c0_i32_0 = arith.constant 0 : i32
    %c0_i32_1 = arith.constant 0 : i32
    return %arg0, %c0_i32, %c0_i32_0 : i32, i32, i32
  }
}

</mosaic_0001>

<bundles_post_ra>
// kernel: tpu_custom_call.1
= control target key start
LH: loop header
LB: loop body
LE: loop exit
PB: predicated region body
PF: predicated region fallthrough
CT: control target
= control target key end

     0   :  { %s8411_s0 = inlined_call_operand.hbm [shape: f32[2,8,32], index: 0, kind: input, shape index: {}]   ;;  %s8412_s1 = inlined_call_operand.hbm [shape: f32[2,8,32], index: 1, kind: input, shape index: {}]   ;;  %s8413_s2 = inlined_call_operand.hbm [shape: s32[2,1,8], index: 2, kind: input, shape index: {}]   ;;  %s8414_s3 = inlined_call_operand.hbm [shape: s32[2,1,8], index: 3, kind: input, shape index: {}]   ;;  %s8415_s4 = inlined_call_operand.hbm [shape: f32[1,32], index: 4, kind: input, shape index: {}]   ;;  %s8416_s5 = inlined_call_operand.hbm [shape: bf16[32,96], index: 5, kind: input, shape index: {}]   ;;  %s8417_s6 = inlined_call_operand.hbm [shape: f32[1,96], index: 6, kind: input, shape index: {}]   ;;  %s8418_s7 = inlined_call_operand.hbm [shape: bf16[32,32], index: 7, kind: input, shape index: {}]   ;;  %s8419_s8 = inlined_call_operand.hbm [shape: f32[1,32], index: 8, kind: input, shape index: {}]   ;;  %s8420_s9 = inlined_call_operand.hbm [shape: f32[1,32], index: 9, kind: input, shape index: {}]   ;;  %s8421_s10 = inlined_call_operand.hbm [shape: bf16[32,32], index: 10, kind: input, shape index: {}]   ;;  %s8422_s11 = inlined_call_operand.hbm [shape: f32[1,32], index: 11, kind: input, shape index: {}]   ;;  %s8423_s12 = inlined_call_operand.hbm [shape: bf16[32,64], index: 12, kind: input, shape index: {}]   ;;  %s8424_s13 = inlined_call_operand.hbm [shape: f32[1,64], index: 13, kind: input, shape index: {}]   ;;  %s8425_s14 = inlined_call_operand.hbm [shape: bf16[32,32], index: 14, kind: input, shape index: {}]   ;;  %s8426_s15 = inlined_call_operand.hbm [shape: f32[1,32], index: 15, kind: input, shape index: {}]   ;;  %s8427_s16 = inlined_call_operand.hbm [shape: f32[1,32], index: 16, kind: input, shape index: {}]   ;;  %s8428_s17 = inlined_call_operand.hbm [shape: bf16[32,64], index: 17, kind: input, shape index: {}]   ;;  %s8429_s18 = inlined_call_operand.hbm [shape: f32[1,64], index: 18, kind: input, shape index: {}]   ;;  %s8430_s19 = inlined_call_operand.hbm [shape: bf16[64,32], index: 19, kind: input, shape index: {}]   ;;  %s8431_s20 = inlined_call_operand.hbm [shape: f32[1,32], index: 20, kind: input, shape index: {}]   ;;  %s8432_s21 = inlined_call_operand.hbm [shape: f32[1,32], index: 21, kind: input, shape index: {}]   ;;  %s8433_s22 = inlined_call_operand.hbm [shape: f32[2,8,32], index: 22, kind: output, shape index: {}]  }
   0x1   :  { %8477 = sst [smem:[#allocation55_spill]] %s8411_s0 }
   0x2   :  { %8478 = sst [smem:[#allocation56_spill]] %s8412_s1 }
   0x3   :  { %8479 = sst [smem:[#allocation57_spill]] %s8413_s2 }
   0x4   :  { %8480 = sst [smem:[#allocation58_spill]] %s8414_s3 }
   0x5   :  { %8481 = sst [smem:[#allocation59_spill]] %s8415_s4 }
   0x6   :  { %8482 = sst [smem:[#allocation60_spill]] %s8416_s5 }
   0x7   :  { %8483 = sst [smem:[#allocation61_spill]] %s8417_s6 }
   0x8   :  { %8484 = sst [smem:[#allocation62_spill]] %s8418_s7 }
   0x9   :  { %8485 = sst [smem:[#allocation63_spill]] %s8419_s8 }
   0xa   :  { %8486 = sst [smem:[#allocation64_spill]] %s8420_s9 }
   0xb   :  { %8487 = sst [smem:[#allocation65_spill]] %s8421_s10 }
   0xc   :  { %8488 = sst [smem:[#allocation66_spill]] %s8422_s11 }
   0xd   :  { %8489 = sst [smem:[#allocation67_spill]] %s8423_s12 }
   0xe   :  { %8490 = sst [smem:[#allocation68_spill]] %s8424_s13 }
   0xf   :  { %8491 = sst [smem:[#allocation69_spill]] %s8425_s14 }
  0x10   :  { %8492 = sst [smem:[#allocation70_spill]] %s8426_s15 }
  0x11   :  { %8493 = sst [smem:[#allocation71_spill]] %s8427_s16 }
  0x12   :  { %8494 = sst [smem:[#allocation72_spill]] %s8428_s17 }
  0x13   :  { %8495 = sst [smem:[#allocation73_spill]] %s8429_s18 }
  0x14   :  { %8496 = sst [smem:[#allocation74_spill]] %s8430_s19 }
  0x15   :  { %8497 = sst [smem:[#allocation75_spill]] %s8431_s20 }
  0x16   :  { %8498 = sst [smem:[#allocation76_spill]] %s8432_s21 }
  0x17   :  { %8499 = sst [smem:[#allocation77_spill]] %s8433_s22 }
  0x18   :  { %27 = vsyncpa [#allocation3], 0 }
  0x19   :  { %29 = vsyncpa [#allocation3 + $0x1], 0 }
  0x1a   :  { %30 = vsyncpa [#allocation6], 0 }
  0x1b   :  { %32 = vsyncpa [#allocation6 + $0x1], 0 }
  0x1c   :  { %33 = vsyncpa [#allocation9], 0 }
  0x1d   :  { %35 = vsyncpa [#allocation9 + $0x1], 0 }
  0x1e   :  { %36 = vsyncpa [#allocation12], 0 }
  0x1f   :  { %37 = vsyncpa [#allocation15], 0 }
  0x20   :  { %38 = vsyncpa [#allocation18], 0 }
  0x21   :  { %39 = vsyncpa [#allocation21], 0 }
  0x22   :  { %40 = vsyncpa [#allocation24], 0 }
  0x23   :  { %41 = vsyncpa [#allocation27], 0 }
  0x24   :  { %42 = vsyncpa [#allocation30], 0 }
  0x25   :  { %43 = vsyncpa [#allocation33], 0 }
  0x26   :  { %44 = vsyncpa [#allocation36], 0 }
  0x27   :  { %45 = vsyncpa [#allocation4], 0 }
  0x28   :  { %47 = vsyncpa [#allocation4 + $0x1], 0  ;;  %s7182_s3 = smov 0   ;;  %s7184_s28 = smov 0  }
  0x29   :  { %s7186_s29 = smov 0   ;;  %s7188_s30 = smov 0  }
  0x2a LB: > { %8500 = sst [smem:[#allocation52_spill]] %s7023_s29  ;;  %s7029_s4 = smov [#allocation10]   ;;  %s7027_s30 = sphi %s7188_s30, %s8577_s30   ;;  %s7023_s29 = sphi %s7186_s29, %s8574_s29   ;;  %s7019_s28 = sphi %s7184_s28, %s8576_s28   ;;  %s7015_s3 = sphi %s7182_s3, %s8575_s3  }
  0x2b   : > { %s579_s0 = sshll.u32 %s7029_s4, 4  ;;  %s7203_s23 = sadd.s32 4294967295, %s7027_s30   ;;  %s7208_s0 = int_to_ptr.vmem [resolvable:$true] %s579_s0 }
  0x2c   : > { %p5653_p0 = scmp.ge.s32.totalorder %s7027_s30, 1  ;;  %p8451_p1 = scmp.eq.s32.totalorder %s7203_s23, 0 }
  0x2d   : > { %p566_p2 = scmp.lt.s32.totalorder %s7027_s30, 3  ;;  %s7030_s5 = smov [#allocation11]  }
  0x2e   : > { %s589_s24 = sshll.u32 %s7030_s5, 4  ;;  %s7031_s25 = smov [#allocation14]   ;;  %s7217_s24 = int_to_ptr.vmem [resolvable:$true] %s589_s24 }
  0x2f   : > { %p7210_p3 = pnand %p5653_p0, %p566_p2  ;;  %s613_s26 = sshll.u32 %s7031_s25, 4  ;;  %s7225_s26 = int_to_ptr.vmem [resolvable:$true] %s613_s26 }
  0x30   : > { %s8504_s4 = sld [smem:[#allocation59_spill]] }
  0x31   : > { %s8501_s1 = scalar_select %p7210_p3, 1, 0 }
  0x32   : > { %p6059_p5 = pneg %p7210_p3 }
  0x33   : > { %8502 = sst [smem:[#allocation53_spill]] %s8501_s1 }
  0x34   : > { %p7221_p6 = pnand %p6059_p5, %p8451_p1 }
  0x36   : > { %s8503_s6 = scalar_select %p7221_p6, 1, 0 }
  0x37   : > { %s6289_s22 = scalar_lea.hbm %s8504_s4, 16  ;;  %p7235_p8 = pneg %p7221_p6 }
  0x38   : > { %p6290_p7 = scmp.ne.s32.totalorder %s8504_s4, %s6289_s22  ;;  %p6296_p11 = scmp.lt.u32.totalorder %s6289_s22, %s8504_s4 }
  0x39   : > { %s8505_s5 = scalar_select %p7235_p8, 1, 0 }
  0x3a   : > { %p6292_p9 = pnand %p7235_p8, %p6290_p7 }
  0x3c   : > { %p6293_p10 = pneg %p6292_p9 }
  0x3e   : > { %p6298_p12 = pnand %p6296_p11, %p6293_p10 }
  0x40   : > { %6301 = shalt.err (!%p6298_p12)
}
  0x41   : > { %s6302_s21 = scalar_lea.vmem %s7208_s0, 16  ;;  %s6309_s1 = scalar_lea.vmem %s7208_s0, 32 }
  0x42   : > { %p6303_p13 = scmp.ne.s32.totalorder %s7208_s0, %s6302_s21  ;;  %p6310_p5 = scmp.lt.s32.totalorder %s7208_s0, %s7208_s0 }
  0x43   : > { %p6311_p7 = scmp.lt.s32.totalorder %s6309_s1, %s6302_s21 }
  0x44   : > { %p6305_p0 = pnand %p6303_p13, %p7235_p8 }
  0x45   : > { %p6312_p9 = por %p6311_p7, %p6310_p5 }
  0x46   : > { %p6306_p2 = pneg %p6305_p0 }
  0x48   : > { %p6313_p4 = pnand %p6312_p9, %p6306_p2 }
  0x4a   : > { %6316 = shalt.err (!%p6313_p4)
}
  0x4b   : > { %6062 = dma.hbm_to_vmem [thread:$0]  (!%p7221_p6), %s8504_s4, 16, %s7208_s0, [#allocation9]  }
  0x4c   : > { %s8506_s25 = sld [smem:[#allocation60_spill]] }
  0x52   : > { %s6317_s18 = scalar_lea.hbm %s8506_s25, 256 }
  0x53   : > { %p6318_p10 = scmp.ne.s32.totalorder %s8506_s25, %s6317_s18  ;;  %p6324_p4 = scmp.lt.u32.totalorder %s6317_s18, %s8506_s25 }
  0x55   : > { %p6320_p11 = pnand %p6318_p10, %p7235_p8 }
  0x57   : > { %p6321_p12 = pneg %p6320_p11 }
  0x59   : > { %p6326_p13 = pnand %p6324_p4, %p6321_p12 }
  0x5b   : > { %6329 = shalt.err (!%p6326_p13)
}
  0x5c   : > { %s6330_s0 = scalar_lea.vmem %s7217_s24, 256  ;;  %p6338_p7 = scmp.lt.s32.totalorder %s7217_s24, %s7217_s24 }
  0x5d   : > { %p6331_p0 = scmp.ne.s32.totalorder %s7217_s24, %s6330_s0  ;;  %p6339_p9 = scmp.lt.s32.totalorder %s6330_s0, %s6330_s0 }
  0x5f   : > { %p6333_p2 = pnand %p6331_p0, %p7235_p8  ;;  %p6340_p10 = por %p6339_p9, %p6338_p7 }
  0x61   : > { %p6334_p5 = pneg %p6333_p2 }
  0x63   : > { %p6341_p11 = pnand %p6340_p10, %p6334_p5 }
  0x65   : > { %6344 = shalt.err (!%p6341_p11)
}
  0x66   : > { %s8453_s14 = smov 64   ;;  %s8455_s16 = smov 4  }
  0x67   : > { %6065 = dma.hbm_to_vmem [thread:$0]  (!%p7221_p6), %s8506_s25, 256, %s7217_s24, [#allocation12], %s8453_s14, %s8453_s14, %s8455_s16  }
  0x68   : > { %s8507_s7 = sld [smem:[#allocation62_spill]] }
  0x6e   : > { %s6345_s27 = scalar_lea.hbm %s8507_s7, 256 }
  0x6f   : > { %p6346_p12 = scmp.ne.s32.totalorder %s8507_s7, %s6345_s27  ;;  %p6352_p0 = scmp.lt.u32.totalorder %s6345_s27, %s8507_s7 }
  0x71   : > { %p6348_p4 = pnand %p6346_p12, %p7235_p8 }
  0x73   : > { %p6349_p13 = pneg %p6348_p4 }
  0x75   : > { %p6354_p2 = pnand %p6352_p0, %p6349_p13 }
  0x77   : > { %6357 = shalt.err (!%p6354_p2)
}
  0x78   : > { %s6358_s24 = scalar_lea.vmem %s7225_s26, 256  ;;  %p6366_p10 = scmp.lt.s32.totalorder %s7225_s26, %s7225_s26 }
  0x79   : > { %p6359_p5 = scmp.ne.s32.totalorder %s7225_s26, %s6358_s24  ;;  %p6367_p11 = scmp.lt.s32.totalorder %s6358_s24, %s6358_s24 }
  0x7b   : > { %p6361_p7 = pnand %p6359_p5, %p7235_p8  ;;  %p6368_p12 = por %p6367_p11, %p6366_p10 }
  0x7d   : > { %p6362_p9 = pneg %p6361_p7 }
  0x7f   : > { %p6369_p4 = pnand %p6368_p12, %p6362_p9 }
  0x81   : > { %6372 = shalt.err (!%p6369_p4)
}
  0x82   : > { %6071 = dma.hbm_to_vmem [thread:$0]  (!%p7221_p6), %s8507_s7, 256, %s7225_s26, [#allocation15], %s8453_s14, %s8453_s14, %s8455_s16  }
  0x83   : > { %s7034_s20 = smov [#allocation17]   ;;  %s7035_s2 = smov [#allocation20]  }
  0x84   : > { %s638_s22 = sshll.u32 %s7034_s20, 4  ;;  %s662_s27 = sshll.u32 %s7035_s2, 4  ;;  %s639_s22 = int_to_ptr.vmem [resolvable:$true] %s638_s22  ;;  %s663_s27 = int_to_ptr.vmem [resolvable:$true] %s662_s27 }
  0x85   : > { %s8508_s9 = sld [smem:[#allocation64_spill]] }
  0x8b   : > { %s6373_s0 = scalar_lea.hbm %s8508_s9, 16 }
  0x8c   : > { %p6374_p13 = scmp.ne.s32.totalorder %s8508_s9, %s6373_s0  ;;  %p6380_p5 = scmp.lt.u32.totalorder %s6373_s0, %s8508_s9 }
  0x8e   : > { %p6376_p0 = pnand %p6374_p13, %p7235_p8 }
  0x90   : > { %p6377_p2 = pneg %p6376_p0 }
  0x92   : > { %p6382_p7 = pnand %p6380_p5, %p6377_p2 }
  0x94   : > { %6385 = shalt.err (!%p6382_p7)
}
  0x95   : > { %s6386_s26 = scalar_lea.vmem %s639_s22, 16  ;;  %s6393_s18 = scalar_lea.vmem %s639_s22, 32 }
  0x96   : > { %p6387_p9 = scmp.ne.s32.totalorder %s639_s22, %s6386_s26  ;;  %p6394_p12 = scmp.lt.s32.totalorder %s639_s22, %s639_s22 }
  0x97   : > { %p6395_p4 = scmp.lt.s32.totalorder %s6393_s18, %s6386_s26 }
  0x98   : > { %p6389_p10 = pnand %p6387_p9, %p7235_p8 }
  0x99   : > { %p6396_p1 = por %p6395_p4, %p6394_p12 }
  0x9a   : > { %p6390_p11 = pneg %p6389_p10 }
  0x9c   : > { %p6397_p3 = pnand %p6396_p1, %p6390_p11 }
  0x9e   : > { %6400 = shalt.err (!%p6397_p3)
}
  0x9f   : > { %6077 = dma.hbm_to_vmem [thread:$0]  (!%p7221_p6), %s8508_s9, 16, %s639_s22, [#allocation18]  }
  0xa0   : > { %s8509_s11 = sld [smem:[#allocation66_spill]] }
  0xa6   : > { %s6401_s21 = scalar_lea.hbm %s8509_s11, 16 }
  0xa7   : > { %p6402_p13 = scmp.ne.s32.totalorder %s8509_s11, %s6401_s21  ;;  %p6408_p3 = scmp.lt.u32.totalorder %s6401_s21, %s8509_s11 }
  0xa9   : > { %p6404_p0 = pnand %p6402_p13, %p7235_p8 }
  0xab   : > { %p6405_p1 = pneg %p6404_p0 }
  0xad   : > { %p6410_p2 = pnand %p6408_p3, %p6405_p1 }
  0xaf   : > { %6413 = shalt.err (!%p6410_p2)
}
  0xb0   : > { %s6414_s26 = scalar_lea.vmem %s663_s27, 16  ;;  %s6421_s22 = scalar_lea.vmem %s663_s27, 32 }
  0xb1   : > { %p6415_p5 = scmp.ne.s32.totalorder %s663_s27, %s6414_s26  ;;  %p6422_p10 = scmp.lt.s32.totalorder %s663_s27, %s663_s27 }
  0xb2   : > { %p6423_p11 = scmp.lt.s32.totalorder %s6421_s22, %s6414_s26 }
  0xb3   : > { %p6417_p7 = pnand %p6415_p5, %p7235_p8 }
  0xb4   : > { %p6424_p12 = por %p6423_p11, %p6422_p10 }
  0xb5   : > { %p6418_p9 = pneg %p6417_p7 }
  0xb7   : > { %p6425_p4 = pnand %p6424_p12, %p6418_p9 }
  0xb9   : > { %6428 = shalt.err (!%p6425_p4)
}
  0xba   : > { %6083 = dma.hbm_to_vmem [thread:$0]  (!%p7221_p6), %s8509_s11, 16, %s663_s27, [#allocation21]  }
  0xbb   : > { %s7036_s20 = smov [#allocation23]   ;;  %s7037_s2 = smov [#allocation26]  }
  0xbc   : > { %s686_s12 = sshll.u32 %s7036_s20, 4  ;;  %s710_s21 = sshll.u32 %s7037_s2, 4  ;;  %s687_s12 = int_to_ptr.vmem [resolvable:$true] %s686_s12  ;;  %s711_s21 = int_to_ptr.vmem [resolvable:$true] %s710_s21 }
  0xbd   : > { %s8510_s13 = sld [smem:[#allocation68_spill]] }
  0xc3   : > { %s6429_s24 = scalar_lea.hbm %s8510_s13, 16 }
  0xc4   : > { %p6430_p13 = scmp.ne.s32.totalorder %s8510_s13, %s6429_s24  ;;  %p6436_p3 = scmp.lt.u32.totalorder %s6429_s24, %s8510_s13 }
  0xc6   : > { %p6432_p0 = pnand %p6430_p13, %p7235_p8 }
  0xc8   : > { %p6433_p1 = pneg %p6432_p0 }
  0xca   : > { %p6438_p2 = pnand %p6436_p3, %p6433_p1 }
  0xcc   : > { %6441 = shalt.err (!%p6438_p2)
}
  0xcd   : > { %s6442_s27 = scalar_lea.vmem %s687_s12, 16  ;;  %s6449_s25 = scalar_lea.vmem %s687_s12, 32 }
  0xce   : > { %p6443_p5 = scmp.ne.s32.totalorder %s687_s12, %s6442_s27  ;;  %p6450_p10 = scmp.lt.s32.totalorder %s687_s12, %s687_s12 }
  0xcf   : > { %p6451_p11 = scmp.lt.s32.totalorder %s6449_s25, %s6442_s27 }
  0xd0   : > { %p6445_p7 = pnand %p6443_p5, %p7235_p8 }
  0xd1   : > { %p6452_p12 = por %p6451_p11, %p6450_p10 }
  0xd2   : > { %p6446_p9 = pneg %p6445_p7 }
  0xd4   : > { %p6453_p4 = pnand %p6452_p12, %p6446_p9 }
  0xd6   : > { %6456 = shalt.err (!%p6453_p4)
}
  0xd7   : > { %6089 = dma.hbm_to_vmem [thread:$0]  (!%p7221_p6), %s8510_s13, 16, %s687_s12, [#allocation24]  }
  0xd8   : > { %s8511_s15 = sld [smem:[#allocation70_spill]] }
  0xde   : > { %s6457_s24 = scalar_lea.hbm %s8511_s15, 16 }
  0xdf   : > { %p6458_p13 = scmp.ne.s32.totalorder %s8511_s15, %s6457_s24  ;;  %p6464_p3 = scmp.lt.u32.totalorder %s6457_s24, %s8511_s15 }
  0xe1   : > { %p6460_p0 = pnand %p6458_p13, %p7235_p8 }
  0xe3   : > { %p6461_p1 = pneg %p6460_p0 }
  0xe5   : > { %p6466_p2 = pnand %p6464_p3, %p6461_p1 }
  0xe7   : > { %6469 = shalt.err (!%p6466_p2)
}
  0xe8   : > { %s6470_s27 = scalar_lea.vmem %s711_s21, 16  ;;  %s6477_s12 = scalar_lea.vmem %s711_s21, 32 }
  0xe9   : > { %p6471_p5 = scmp.ne.s32.totalorder %s711_s21, %s6470_s27  ;;  %p6478_p10 = scmp.lt.s32.totalorder %s711_s21, %s711_s21 }
  0xea   : > { %p6479_p11 = scmp.lt.s32.totalorder %s6477_s12, %s6470_s27 }
  0xeb   : > { %p6473_p7 = pnand %p6471_p5, %p7235_p8 }
  0xec   : > { %p6480_p12 = por %p6479_p11, %p6478_p10 }
  0xed   : > { %p6474_p9 = pneg %p6473_p7 }
  0xef   : > { %p6481_p4 = pnand %p6480_p12, %p6474_p9 }
  0xf1   : > { %6484 = shalt.err (!%p6481_p4)
}
  0xf2   : > { %6095 = dma.hbm_to_vmem [thread:$0]  (!%p7221_p6), %s8511_s15, 16, %s711_s21, [#allocation27]  }
  0xf3   : > { %s7038_s2 = smov [#allocation29]   ;;  %s7039_s0 = smov [#allocation32]  }
  0xf4   : > { %s731_s1 = sshll.u32 %s7038_s2, 4  ;;  %s755_s24 = sshll.u32 %s7039_s0, 4  ;;  %s732_s1 = int_to_ptr.vmem [resolvable:$true] %s731_s1  ;;  %s756_s24 = int_to_ptr.vmem [resolvable:$true] %s755_s24 }
  0xf5   : > { %s8512_s17 = sld [smem:[#allocation72_spill]] }
  0xfb   : > { %s6485_s22 = scalar_lea.hbm %s8512_s17, 256 }
  0xfc   : > { %p6486_p13 = scmp.ne.s32.totalorder %s8512_s17, %s6485_s22  ;;  %p6492_p3 = scmp.lt.u32.totalorder %s6485_s22, %s8512_s17 }
  0xfe   : > { %p6488_p0 = pnand %p6486_p13, %p7235_p8 }
 0x100   : > { %p6489_p1 = pneg %p6488_p0 }
 0x102   : > { %p6494_p2 = pnand %p6492_p3, %p6489_p1 }
 0x104   : > { %6497 = shalt.err (!%p6494_p2)
}
 0x105   : > { %s6498_s21 = scalar_lea.vmem %s732_s1, 256  ;;  %p6506_p10 = scmp.lt.s32.totalorder %s732_s1, %s732_s1 }
 0x106   : > { %p6499_p5 = scmp.ne.s32.totalorder %s732_s1, %s6498_s21  ;;  %p6507_p11 = scmp.lt.s32.totalorder %s6498_s21, %s6498_s21 }
 0x108   : > { %p6501_p7 = pnand %p6499_p5, %p7235_p8  ;;  %p6508_p12 = por %p6507_p11, %p6506_p10 }
 0x10a   : > { %p6502_p9 = pneg %p6501_p7 }
 0x10c   : > { %p6509_p4 = pnand %p6508_p12, %p6502_p9 }
 0x10e   : > { %6512 = shalt.err (!%p6509_p4)
}
 0x10f   : > { %6101 = dma.hbm_to_vmem [thread:$0]  (!%p7221_p6), %s8512_s17, 256, %s732_s1, [#allocation30], %s8453_s14, %s8453_s14, %s8455_s16  }
 0x110   : > { %s8513_s19 = sld [smem:[#allocation74_spill]] }
 0x116   : > { %s6513_s26 = scalar_lea.hbm %s8513_s19, 512 }
 0x117   : > { %p6514_p13 = scmp.ne.s32.totalorder %s8513_s19, %s6513_s26  ;;  %p6520_p3 = scmp.lt.u32.totalorder %s6513_s26, %s8513_s19 }
 0x119   : > { %p6516_p0 = pnand %p6514_p13, %p7235_p8 }
 0x11b   : > { %p6517_p1 = pneg %p6516_p0 }
 0x11d   : > { %p6522_p2 = pnand %p6520_p3, %p6517_p1 }
 0x11f   : > { %6525 = shalt.err (!%p6522_p2)
}
 0x120   : > { %s6526_s25 = scalar_lea.vmem %s756_s24, 512  ;;  %p6534_p10 = scmp.lt.s32.totalorder %s756_s24, %s756_s24 }
 0x121   : > { %p6527_p5 = scmp.ne.s32.totalorder %s756_s24, %s6526_s25  ;;  %p6535_p11 = scmp.lt.s32.totalorder %s6526_s25, %s6526_s25 }
 0x123   : > { %p6529_p7 = pnand %p6527_p5, %p7235_p8  ;;  %p6536_p12 = por %p6535_p11, %p6534_p10 }
 0x125   : > { %p6530_p9 = pneg %p6529_p7 }
 0x127   : > { %p6537_p4 = pnand %p6536_p12, %p6530_p9 }
 0x129   : > { %6540 = shalt.err (!%p6537_p4)
}
 0x12a   : > { %6107 = dma.hbm_to_vmem [thread:$0]  (!%p7221_p6), %s8513_s19, 512, %s756_s24, [#allocation33], %s8453_s14, %s8453_s14, %s8455_s16  }
 0x12b   : > { %s5652_s20 = sadd.s32 4294967294, %s7027_s30   ;;  %s7425_s2 = sadd.s32 1, %s7027_s30  }
 0x12c   : > { %s60_s0 = sadd.s32 1, %s7023_s29  ;;  %s57_s4 = ssub.s32 %s7027_s30, %s7425_s2 }
 0x12d   : > { %p67_p13 = scmp.ne.s32.totalorder %s7023_s29, %s7019_s28  ;;  %p58_p0 = scmp.eq.s32.totalorder %s57_s4, 0 }
 0x12e   : > { %p68_p1 = scmp.eq.s32.totalorder %s7027_s30, 0  ;;  %p73_p3 = scmp.ne.s32.totalorder %s7019_s28, %s7015_s3 }
 0x12f   : > { %p553_p2 = scmp.eq.s32.totalorder %s7203_s23, 1  ;;  %p8515_p7 = scmp.eq.s32.totalorder %s7203_s23, 0 }
 0x130   : > { %s7437_s26 = scalar_select %p58_p0, %s7023_s29, %s60_s0  }
 0x131   : > { %p69_p5 = por %p68_p1, %p67_p13  ;;  %p7441_p9 = por %p8515_p7, %p73_p3 }
 0x132   : > { %8514 = sst [smem:[#allocation54_spill]] %s7437_s26  ;;  %p7445_p10 = por %p553_p2, %p67_p13 }
 0x133   : > { %s8516_s24 = scalar_select %p7441_p9, 1, 0 }
 0x134   : > { %s8517_s22 = scalar_select %p7445_p10, 1, 0 }
 0x135   : > { %p559_p11 = scmp.eq.s32.totalorder %s5652_s20, 1  ;;  %p6149_p12 = scmp.lt.s32.totalorder %s7027_s30, 2 }
 0x136   : > { %s7451_s18 = sand.u32 1, %s7023_s29   ;;  %s8458_s25 = sshll.u32 %s7027_s30, 7 }
 0x137   : > { %p7453_p4 = por %p559_p11, %p73_p3  ;;  %s8457_s12 = sshll.u32 %s7451_s18, 3 }
 0x138   : > { %p7459_p0 = pnand %p6149_p12, %p69_p5  ;;  %s8460_s21 = sand.u32 1, %s7027_s30  }
 0x139   : > { %s8518_s27 = scalar_select %p7453_p4, 1, 0 }
 0x13a   : > { %s8519_s1 = scalar_select %p7459_p0, 1, 0 }
 0x13b   : > { %s8520_s4 = sld [smem:[#allocation56_spill]]  ;;  %s813_s16 = scalar_lea.vmem [#allocation5], %s8457_s12 }
 0x13c   : > { %s820_s7 = sshll.u32 %s813_s16, 4  ;;  %s7477_s9 = scalar_lea.sflag [#allocation6], %s8460_s21  ;;  %s7473_s7 = int_to_ptr.vmem [resolvable:$true] %s820_s7 }
 0x13d   : > { %p7483_p1 = pneg %p7459_p0 }
 0x13f   : > { %s8521_s13 = scalar_select %p7483_p1, 1, 0 }
 0x141   : > { %s7469_s14 = scalar_lea.hbm %s8520_s4, %s8458_s25  ;;  %s6546_s16 = scalar_lea.hbm %s8520_s4, 256 }
 0x142   : > { %s6541_s11 = scalar_lea.hbm %s7469_s14, 128  ;;  %p6547_p5 = scmp.lt.u32.totalorder %s7469_s14, %s8520_s4 }
 0x143   : > { %p6542_p13 = scmp.ne.s32.totalorder %s7469_s14, %s6541_s11  ;;  %p6548_p7 = scmp.lt.u32.totalorder %s6546_s16, %s6541_s11 }
 0x144   : > { %p6550_p12 = scmp.lt.u32.totalorder %s6541_s11, %s7469_s14 }
 0x145   : > { %p6544_p3 = pnand %p7483_p1, %p6542_p13  ;;  %p6549_p11 = por %p6548_p7, %p6547_p5 }
 0x147   : > { %p6545_p2 = pneg %p6544_p3  ;;  %p6551_p4 = por %p6550_p12, %p6549_p11 }
 0x149   : > { %p6552_p10 = pnand %p6551_p4, %p6545_p2 }
 0x14b   : > { %6555 = shalt.err (!%p6552_p10)
}
 0x14c   : > { %s6556_s21 = scalar_lea.vmem %s7473_s7, 128  ;;  %s7040_s0 = smov [#allocation5]  }
 0x14d   : > { %p6557_p13 = scmp.ne.s32.totalorder %s7473_s7, %s6556_s21  ;;  %s6561_s20 = sshll.u32 %s7040_s0, 4  ;;  %s6562_s20 = int_to_ptr.vmem [resolvable:$false] %s6561_s20 }
 0x14e   : > { %s6563_s12 = scalar_lea.vmem %s6562_s20, 256  ;;  %p6564_p6 = scmp.lt.s32.totalorder %s7473_s7, %s6562_s20 }
 0x14f   : > { %p6559_p3 = pnand %p6557_p13, %p7483_p1  ;;  %p6565_p8 = scmp.lt.s32.totalorder %s6563_s12, %s6556_s21 }
 0x151   : > { %p6560_p9 = pneg %p6559_p3  ;;  %p6566_p5 = por %p6565_p8, %p6564_p6 }
 0x153   : > { %p6567_p7 = pnand %p6566_p5, %p6560_p9 }
 0x155   : > { %6570 = shalt.err (!%p6567_p7)
}
 0x156   : > { %6120 = dma.hbm_to_vmem [thread:$0]  (!%p7459_p0), %s7469_s14, 128, %s7473_s7, %s7477_s9  }
 0x157   : > { %s7041_s11 = smov [#allocation13]   ;;  %s7042_s16 = smov [#allocation16]  }
 0x158   : > { %s603_s25 = sshll.u32 %s7041_s11, 4  ;;  %s627_s4 = sshll.u32 %s7042_s16, 4  ;;  %s604_s25 = int_to_ptr.vmem [resolvable:$true] %s603_s25  ;;  %s7507_s4 = int_to_ptr.vmem [resolvable:$true] %s627_s4 }
 0x159   : > { %s8522_s21 = sld [smem:[#allocation61_spill]]  ;;  %p8523_p8 = scmp.ne.s32.totalorder %s8505_s5, 0 }
 0x15f   : > { %s6571_s12 = scalar_lea.hbm %s8522_s21, 16 }
 0x160   : > { %p6572_p6 = scmp.ne.s32.totalorder %s8522_s21, %s6571_s12  ;;  %p6578_p4 = scmp.lt.u32.totalorder %s6571_s12, %s8522_s21 }
 0x162   : > { %p6574_p9 = pnand %p6572_p6, %p8523_p8 }
 0x164   : > { %p6575_p10 = pneg %p6574_p9 }
 0x166   : > { %p6580_p2 = pnand %p6578_p4, %p6575_p10 }
 0x168   : > { %6583 = shalt.err (!%p6580_p2)
}
 0x169   : > { %s6584_s14 = scalar_lea.vmem %s604_s25, 16  ;;  %s6591_s11 = scalar_lea.vmem %s604_s25, 32 }
 0x16a   : > { %p6585_p11 = scmp.ne.s32.totalorder %s604_s25, %s6584_s14  ;;  %p6592_p3 = scmp.lt.s32.totalorder %s604_s25, %s604_s25 }
 0x16b   : > { %p6593_p5 = scmp.lt.s32.totalorder %s6591_s11, %s6584_s14 }
 0x16c   : > { %p6587_p12 = pnand %p6585_p11, %p8523_p8 }
 0x16d   : > { %p6594_p7 = por %p6593_p5, %p6592_p3 }
 0x16e   : > { %p6588_p13 = pneg %p6587_p12 }
 0x170   : > { %p6595_p0 = pnand %p6594_p7, %p6588_p13 }
 0x172   : > { %6598 = shalt.err (!%p6595_p0)
}
 0x173   : > { %p8524_p6 = scmp.ne.s32.totalorder %s8503_s6, 0  ;;  %s8525_s8 = sld [smem:[#allocation63_spill]] }
 0x175   : > { %6068 = dma.hbm_to_vmem [thread:$0]  (!%p8524_p6), %s8522_s21, 16, %s604_s25, [#allocation12]  }
 0x179   : > { %s6599_s0 = scalar_lea.hbm %s8525_s8, 16 }
 0x17a   : > { %p6600_p9 = scmp.ne.s32.totalorder %s8525_s8, %s6599_s0  ;;  %p6606_p0 = scmp.lt.u32.totalorder %s6599_s0, %s8525_s8 }
 0x17c   : > { %p6602_p10 = pnand %p6600_p9, %p8523_p8 }
 0x17e   : > { %p6603_p4 = pneg %p6602_p10 }
 0x180   : > { %p6608_p2 = pnand %p6606_p0, %p6603_p4 }
 0x182   : > { %6611 = shalt.err (!%p6608_p2)
}
 0x183   : > { %s6612_s25 = scalar_lea.vmem %s7507_s4, 16  ;;  %s6619_s11 = scalar_lea.vmem %s7507_s4, 32 }
 0x184   : > { %p6613_p11 = scmp.ne.s32.totalorder %s7507_s4, %s6612_s25  ;;  %p6620_p3 = scmp.lt.s32.totalorder %s7507_s4, %s7507_s4 }
 0x185   : > { %p6621_p5 = scmp.lt.s32.totalorder %s6619_s11, %s6612_s25 }
 0x186   : > { %p6615_p12 = pnand %p6613_p11, %p8523_p8 }
 0x187   : > { %p6622_p7 = por %p6621_p5, %p6620_p3 }
 0x188   : > { %p6616_p13 = pneg %p6615_p12 }
 0x18a   : > { %p6623_p9 = pnand %p6622_p7, %p6616_p13 }
 0x18c   : > { %6626 = shalt.err (!%p6623_p9)
}
 0x18d   : > { %6074 = dma.hbm_to_vmem [thread:$0]  (!%p8524_p6), %s8525_s8, 16, %s7507_s4, [#allocation15]  }
 0x18e   : > { %s7043_s19 = smov [#allocation19]   ;;  %s7044_s0 = smov [#allocation22]  }
 0x18f   : > { %s648_s16 = sshll.u32 %s7043_s19, 4  ;;  %s672_s20 = sshll.u32 %s7044_s0, 4  ;;  %s649_s16 = int_to_ptr.vmem [resolvable:$true] %s648_s16  ;;  %s7551_s20 = int_to_ptr.vmem [resolvable:$true] %s672_s20 }
 0x190   : > { %s8526_s10 = sld [smem:[#allocation65_spill]] }
 0x196   : > { %s6627_s14 = scalar_lea.hbm %s8526_s10, 256 }
 0x197   : > { %p6628_p10 = scmp.ne.s32.totalorder %s8526_s10, %s6627_s14  ;;  %p6634_p2 = scmp.lt.u32.totalorder %s6627_s14, %s8526_s10 }
 0x199   : > { %p6630_p4 = pnand %p6628_p10, %p8523_p8 }
 0x19b   : > { %p6631_p0 = pneg %p6630_p4 }
 0x19d   : > { %p6636_p11 = pnand %p6634_p2, %p6631_p0 }
 0x19f   : > { %6639 = shalt.err (!%p6636_p11)
}
 0x1a0   : > { %s6640_s17 = scalar_lea.vmem %s649_s16, 256  ;;  %p6648_p5 = scmp.lt.s32.totalorder %s649_s16, %s649_s16 }
 0x1a1   : > { %p6641_p12 = scmp.ne.s32.totalorder %s649_s16, %s6640_s17  ;;  %p6649_p7 = scmp.lt.s32.totalorder %s6640_s17, %s6640_s17 }
 0x1a3   : > { %p6643_p13 = pnand %p6641_p12, %p8523_p8  ;;  %p6650_p9 = por %p6649_p7, %p6648_p5 }
 0x1a5   : > { %p6644_p3 = pneg %p6643_p13 }
 0x1a7   : > { %p6651_p1 = pnand %p6650_p9, %p6644_p3 }
 0x1a9   : > { %6654 = shalt.err (!%p6651_p1)
}
 0x1aa   : > { %s8527_s19 = smov 4   ;;  %s8528_s0 = smov 64  }
 0x1ab   : > { %6080 = dma.hbm_to_vmem [thread:$0]  (!%p8524_p6), %s8526_s10, 256, %s649_s16, [#allocation18], %s8528_s0, %s8528_s0, %s8527_s19  }
 0x1ac   : > { %s8529_s11 = sld [smem:[#allocation67_spill]] }
 0x1b2   : > { %s6655_s15 = scalar_lea.hbm %s8529_s11, 256 }
 0x1b3   : > { %p6656_p10 = scmp.ne.s32.totalorder %s8529_s11, %s6655_s15  ;;  %p6662_p0 = scmp.lt.u32.totalorder %s6655_s15, %s8529_s11 }
 0x1b5   : > { %p6658_p1 = pnand %p6656_p10, %p8523_p8 }
 0x1b7   : > { %p6659_p4 = pneg %p6658_p1 }
 0x1b9   : > { %p6664_p2 = pnand %p6662_p0, %p6659_p4 }
 0x1bb   : > { %6667 = shalt.err (!%p6664_p2)
}
 0x1bc   : > { %s6668_s16 = scalar_lea.vmem %s7551_s20, 256  ;;  %p6676_p3 = scmp.lt.s32.totalorder %s7551_s20, %s7551_s20 }
 0x1bd   : > { %p6669_p11 = scmp.ne.s32.totalorder %s7551_s20, %s6668_s16  ;;  %p6677_p5 = scmp.lt.s32.totalorder %s6668_s16, %s6668_s16 }
 0x1bf   : > { %p6671_p12 = pnand %p6669_p11, %p8523_p8  ;;  %p6678_p7 = por %p6677_p5, %p6676_p3 }
 0x1c1   : > { %p6672_p13 = pneg %p6671_p12 }
 0x1c3   : > { %p6679_p9 = pnand %p6678_p7, %p6672_p13 }
 0x1c5   : > { %6682 = shalt.err (!%p6679_p9)
}
 0x1c6   : > { %6086 = dma.hbm_to_vmem [thread:$0]  (!%p8524_p6), %s8529_s11, 256, %s7551_s20, [#allocation21], %s8528_s0, %s8528_s0, %s8527_s19  }
 0x1c7   : > { %s7045_s12 = smov [#allocation25]   ;;  %s7046_s14 = smov [#allocation28]  }
 0x1c8   : > { %s696_s7 = sshll.u32 %s7045_s12, 4  ;;  %s721_s25 = sshll.u32 %s7046_s14, 4  ;;  %s697_s7 = int_to_ptr.vmem [resolvable:$true] %s696_s7  ;;  %s7600_s25 = int_to_ptr.vmem [resolvable:$true] %s721_s25 }
 0x1c9   : > { %s8530_s17 = sld [smem:[#allocation69_spill]] }
 0x1cf   : > { %s6683_s16 = scalar_lea.hbm %s8530_s17, 256 }
 0x1d0   : > { %p6684_p10 = scmp.ne.s32.totalorder %s8530_s17, %s6683_s16  ;;  %p6690_p0 = scmp.lt.u32.totalorder %s6683_s16, %s8530_s17 }
 0x1d2   : > { %p6686_p1 = pnand %p6684_p10, %p8523_p8 }
 0x1d4   : > { %p6687_p4 = pneg %p6686_p1 }
 0x1d6   : > { %p6692_p2 = pnand %p6690_p0, %p6687_p4 }
 0x1d8   : > { %6695 = shalt.err (!%p6692_p2)
}
 0x1d9   : > { %s6696_s21 = scalar_lea.vmem %s697_s7, 256  ;;  %p6704_p3 = scmp.lt.s32.totalorder %s697_s7, %s697_s7 }
 0x1da   : > { %p6697_p11 = scmp.ne.s32.totalorder %s697_s7, %s6696_s21  ;;  %p6705_p5 = scmp.lt.s32.totalorder %s6696_s21, %s6696_s21 }
 0x1dc   : > { %p6699_p12 = pnand %p6697_p11, %p8523_p8  ;;  %p6706_p7 = por %p6705_p5, %p6704_p3 }
 0x1de   : > { %p6700_p13 = pneg %p6699_p12 }
 0x1e0   : > { %p6707_p9 = pnand %p6706_p7, %p6700_p13 }
 0x1e2   : > { %6710 = shalt.err (!%p6707_p9)
}
 0x1e3   : > { %6092 = dma.hbm_to_vmem [thread:$0]  (!%p8524_p6), %s8530_s17, 256, %s697_s7, [#allocation24], %s8528_s0, %s8528_s0, %s8527_s19  }
 0x1e4   : > { %s8531_s15 = sld [smem:[#allocation71_spill]] }
 0x1ea   : > { %s6711_s4 = scalar_lea.hbm %s8531_s15, 16 }
 0x1eb   : > { %p6712_p10 = scmp.ne.s32.totalorder %s8531_s15, %s6711_s4  ;;  %p6718_p0 = scmp.lt.u32.totalorder %s6711_s4, %s8531_s15 }
 0x1ed   : > { %p6714_p1 = pnand %p6712_p10, %p8523_p8 }
 0x1ef   : > { %p6715_p4 = pneg %p6714_p1 }
 0x1f1   : > { %p6720_p2 = pnand %p6718_p0, %p6715_p4 }
 0x1f3   : > { %6723 = shalt.err (!%p6720_p2)
}
 0x1f4   : > { %s6724_s19 = scalar_lea.vmem %s7600_s25, 16  ;;  %s6731_s0 = scalar_lea.vmem %s7600_s25, 32 }
 0x1f5   : > { %p6725_p11 = scmp.ne.s32.totalorder %s7600_s25, %s6724_s19  ;;  %p6732_p3 = scmp.lt.s32.totalorder %s7600_s25, %s7600_s25 }
 0x1f6   : > { %p6733_p5 = scmp.lt.s32.totalorder %s6731_s0, %s6724_s19 }
 0x1f7   : > { %p6727_p12 = pnand %p6725_p11, %p8523_p8 }
 0x1f8   : > { %p6734_p7 = por %p6733_p5, %p6732_p3 }
 0x1f9   : > { %p6728_p13 = pneg %p6727_p12 }
 0x1fb   : > { %p6735_p9 = pnand %p6734_p7, %p6728_p13 }
 0x1fd   : > { %6738 = shalt.err (!%p6735_p9)
}
 0x1fe   : > { %6098 = dma.hbm_to_vmem [thread:$0]  (!%p8524_p6), %s8531_s15, 16, %s7600_s25, [#allocation27]  }
 0x1ff   : > { %s7047_s26 = smov [#allocation31]   ;;  %s7048_s14 = smov [#allocation34]  }
 0x200   : > { %s745_s12 = sshll.u32 %s7047_s26, 4  ;;  %s769_s4 = sshll.u32 %s7048_s14, 4  ;;  %s746_s12 = int_to_ptr.vmem [resolvable:$true] %s745_s12  ;;  %s7647_s4 = int_to_ptr.vmem [resolvable:$true] %s769_s4 }
 0x201   : > { %s8532_s20 = sld [smem:[#allocation73_spill]] }
 0x207   : > { %s6739_s21 = scalar_lea.hbm %s8532_s20, 16 }
 0x208   : > { %p6740_p10 = scmp.ne.s32.totalorder %s8532_s20, %s6739_s21  ;;  %p6746_p0 = scmp.lt.u32.totalorder %s6739_s21, %s8532_s20 }
 0x20a   : > { %p6742_p1 = pnand %p6740_p10, %p8523_p8 }
 0x20c   : > { %p6743_p4 = pneg %p6742_p1 }
 0x20e   : > { %p6748_p2 = pnand %p6746_p0, %p6743_p4 }
 0x210   : > { %6751 = shalt.err (!%p6748_p2)
}
 0x211   : > { %s6752_s10 = scalar_lea.vmem %s746_s12, 16  ;;  %s6759_s26 = scalar_lea.vmem %s746_s12, 32 }
 0x212   : > { %p6753_p11 = scmp.ne.s32.totalorder %s746_s12, %s6752_s10  ;;  %p6760_p3 = scmp.lt.s32.totalorder %s746_s12, %s746_s12 }
 0x213   : > { %p6761_p5 = scmp.lt.s32.totalorder %s6759_s26, %s6752_s10 }
 0x214   : > { %p6755_p12 = pnand %p6753_p11, %p8523_p8 }
 0x215   : > { %p6762_p7 = por %p6761_p5, %p6760_p3 }
 0x216   : > { %p6756_p13 = pneg %p6755_p12 }
 0x218   : > { %p6763_p9 = pnand %p6762_p7, %p6756_p13 }
 0x21a   : > { %6766 = shalt.err (!%p6763_p9)
}
 0x21b   : > { %6104 = dma.hbm_to_vmem [thread:$0]  (!%p8524_p6), %s8532_s20, 16, %s746_s12, [#allocation30]  }
 0x21c   : > { %s8533_s19 = sld [smem:[#allocation75_spill]] }
 0x222   : > { %s6767_s0 = scalar_lea.hbm %s8533_s19, 16 }
 0x223   : > { %p6768_p10 = scmp.ne.s32.totalorder %s8533_s19, %s6767_s0  ;;  %p6774_p0 = scmp.lt.u32.totalorder %s6767_s0, %s8533_s19 }
 0x225   : > { %p6770_p1 = pnand %p6768_p10, %p8523_p8 }
 0x227   : > { %p6771_p4 = pneg %p6770_p1 }
 0x229   : > { %p6776_p2 = pnand %p6774_p0, %p6771_p4 }
 0x22b   : > { %6779 = shalt.err (!%p6776_p2)
}
 0x22c   : > { %s6780_s12 = scalar_lea.vmem %s7647_s4, 16  ;;  %s6787_s14 = scalar_lea.vmem %s7647_s4, 32 }
 0x22d   : > { %p6781_p11 = scmp.ne.s32.totalorder %s7647_s4, %s6780_s12  ;;  %p6788_p3 = scmp.lt.s32.totalorder %s7647_s4, %s7647_s4 }
 0x22e   : > { %p6789_p5 = scmp.lt.s32.totalorder %s6787_s14, %s6780_s12 }
 0x22f   : > { %p6783_p12 = pnand %p6781_p11, %p8523_p8 }
 0x230   : > { %p6790_p7 = por %p6789_p5, %p6788_p3 }
 0x231   : > { %p6784_p13 = pneg %p6783_p12 }
 0x233   : > { %p6791_p9 = pnand %p6790_p7, %p6784_p13 }
 0x235   : > { %6794 = shalt.err (!%p6791_p9)
}
 0x236   : > { %6110 = dma.hbm_to_vmem [thread:$0]  (!%p8524_p6), %s8533_s19, 16, %s7647_s4, [#allocation33]  }
 0x237   : > { %s7049_s21 = smov [#allocation35]   ;;  %s8534_s7 = sshll.u32 %s7027_s30, 7 }
 0x238   : > { %s780_s0 = sshll.u32 %s7049_s21, 4  ;;  %s8535_s26 = sld [smem:[#allocation55_spill]]  ;;  %s781_s0 = int_to_ptr.vmem [resolvable:$true] %s780_s0 }
 0x239   : > { %s8536_s15 = sld [smem:[#allocation76_spill]] }
 0x23e   : > { %s7696_s12 = scalar_lea.hbm %s8535_s26, %s8534_s7 }
 0x23f   : > { %s6795_s17 = scalar_lea.hbm %s8536_s15, 16 }
 0x240   : > { %p6796_p10 = scmp.ne.s32.totalorder %s8536_s15, %s6795_s17  ;;  %p6802_p0 = scmp.lt.u32.totalorder %s6795_s17, %s8536_s15 }
 0x242   : > { %p6798_p1 = pnand %p6796_p10, %p8523_p8 }
 0x244   : > { %p6799_p4 = pneg %p6798_p1 }
 0x246   : > { %p6804_p2 = pnand %p6802_p0, %p6799_p4 }
 0x248   : > { %6807 = shalt.err (!%p6804_p2)
}
 0x249   : > { %s6808_s8 = scalar_lea.vmem %s781_s0, 16  ;;  %s6815_s11 = scalar_lea.vmem %s781_s0, 32 }
 0x24a   : > { %p6809_p11 = scmp.ne.s32.totalorder %s781_s0, %s6808_s8  ;;  %p6816_p3 = scmp.lt.s32.totalorder %s781_s0, %s781_s0 }
 0x24b   : > { %p6817_p5 = scmp.lt.s32.totalorder %s6815_s11, %s6808_s8 }
 0x24c   : > { %p6811_p12 = pnand %p6809_p11, %p8523_p8 }
 0x24d   : > { %p6818_p7 = por %p6817_p5, %p6816_p3 }
 0x24e   : > { %p6812_p13 = pneg %p6811_p12 }
 0x250   : > { %p6819_p9 = pnand %p6818_p7, %p6812_p13 }
 0x252   : > { %6822 = shalt.err (!%p6819_p9)
}
 0x253   : > { %6113 = dma.hbm_to_vmem [thread:$0]  (!%p8524_p6), %s8536_s15, 16, %s781_s0, [#allocation36]  }
 0x254   : > { %s8537_s5 = sshll.u32 %s7451_s18, 3  ;;  %s5677_s7 = sshll.u32 %s7027_s30, 4 }
 0x255   : > { %s795_s17 = scalar_lea.vmem [#allocation2], %s8537_s5  ;;  %s792_s25 = scalar_lea.sflag [#allocation3], %s7451_s18 }
 0x256   : > { %s802_s21 = sshll.u32 %s795_s17, 4  ;;  %s6823_s6 = scalar_lea.hbm %s7696_s12, 128  ;;  %s7718_s21 = int_to_ptr.vmem [resolvable:$true] %s802_s21 }
 0x257   : > { %p6824_p8 = scmp.ne.s32.totalorder %s7696_s12, %s6823_s6  ;;  %p8538_p10 = scmp.ne.s32.totalorder %s8521_s13, 0 }
 0x258   : > { %s6828_s4 = scalar_lea.hbm %s8535_s26, 256  ;;  %p6829_p6 = scmp.lt.u32.totalorder %s7696_s12, %s8535_s26 }
 0x259   : > { %p6826_p1 = pnand %p6824_p8, %p8538_p10  ;;  %p6830_p0 = scmp.lt.u32.totalorder %s6828_s4, %s6823_s6 }
 0x25a   : > { %p6832_p11 = scmp.lt.u32.totalorder %s6823_s6, %s7696_s12 }
 0x25b   : > { %p6827_p4 = pneg %p6826_p1  ;;  %p6831_p2 = por %p6830_p0, %p6829_p6 }
 0x25d   : > { %p6833_p12 = por %p6832_p11, %p6831_p2 }
 0x25f   : > { %p6834_p13 = pnand %p6833_p12, %p6827_p4 }
 0x261   : > { %6837 = shalt.err (!%p6834_p13)
}
 0x262   : > { %s6838_s0 = scalar_lea.vmem %s7718_s21, 128  ;;  %s7050_s11 = smov [#allocation2]  }
 0x263   : > { %p6839_p3 = scmp.ne.s32.totalorder %s7718_s21, %s6838_s0  ;;  %s6843_s29 = sshll.u32 %s7050_s11, 4  ;;  %s6844_s29 = int_to_ptr.vmem [resolvable:$false] %s6843_s29 }
 0x264   : > { %s6845_s20 = scalar_lea.vmem %s6844_s29, 256  ;;  %p6846_p9 = scmp.lt.s32.totalorder %s7718_s21, %s6844_s29 }
 0x265   : > { %p6841_p5 = pnand %p6839_p3, %p8538_p10  ;;  %p6847_p8 = scmp.lt.s32.totalorder %s6845_s20, %s6838_s0 }
 0x267   : > { %p6842_p7 = pneg %p6841_p5  ;;  %p6848_p1 = por %p6847_p8, %p6846_p9 }
 0x269   : > { %p6849_p6 = pnand %p6848_p1, %p6842_p7 }
 0x26b   : > { %6852 = shalt.err (!%p6849_p6)
}
 0x26c   : > { %p8539_p4 = scmp.ne.s32.totalorder %s8519_s1, 0  ;;  %s8540_s6 = sld [smem:[#allocation57_spill]] }
 0x26d   : > { %s830_s14 = scalar_lea.vmem [#allocation7], %s7451_s18 }
 0x26e   : > { %6117 = dma.hbm_to_vmem [thread:$0]  (!%p8539_p4), %s7696_s12, 128, %s7718_s21, %s792_s25  }
 0x26f   : > { %s837_s4 = sshll.u32 %s830_s14, 4  ;;  %s838_s4 = int_to_ptr.vmem [resolvable:$true] %s837_s4 }
 0x272   : > { %s7748_s10 = scalar_lea.hbm %s8540_s6, %s5677_s7  ;;  %s6858_s21 = scalar_lea.hbm %s8540_s6, 32 }
 0x273   : > { %s6853_s16 = scalar_lea.hbm %s7748_s10, 16  ;;  %p6859_p12 = scmp.lt.u32.totalorder %s7748_s10, %s8540_s6 }
 0x274   : > { %p6854_p0 = scmp.ne.s32.totalorder %s7748_s10, %s6853_s16  ;;  %p6860_p13 = scmp.lt.u32.totalorder %s6858_s21, %s6853_s16 }
 0x275   : > { %p6862_p5 = scmp.lt.u32.totalorder %s6853_s16, %s7748_s10 }
 0x276   : > { %p6856_p2 = pnand %p6854_p0, %p8538_p10  ;;  %p6861_p3 = por %p6860_p13, %p6859_p12 }
 0x278   : > { %p6857_p11 = pneg %p6856_p2  ;;  %p6863_p7 = por %p6862_p5, %p6861_p3 }
 0x27a   : > { %p6864_p9 = pnand %p6863_p7, %p6857_p11 }
 0x27c   : > { %6867 = shalt.err (!%p6864_p9)
}
 0x27d   : > { %s6868_s11 = scalar_lea.vmem %s838_s4, 16  ;;  %s7051_s29 = smov [#allocation7]  }
 0x27e   : > { %p6869_p8 = scmp.ne.s32.totalorder %s838_s4, %s6868_s11  ;;  %s6873_s20 = sshll.u32 %s7051_s29, 4  ;;  %s6874_s20 = int_to_ptr.vmem [resolvable:$false] %s6873_s20 }
 0x27f   : > { %s6875_s5 = scalar_lea.vmem %s6874_s20, 32  ;;  %p6876_p0 = scmp.lt.s32.totalorder %s838_s4, %s6874_s20 }
 0x280   : > { %p6871_p1 = pnand %p6869_p8, %p8538_p10  ;;  %p6877_p2 = scmp.lt.s32.totalorder %s6875_s5, %s6868_s11 }
 0x282   : > { %p6872_p6 = pneg %p6871_p1  ;;  %p6878_p4 = por %p6877_p2, %p6876_p0 }
 0x284   : > { %p6879_p12 = pnand %p6878_p4, %p6872_p6 }
 0x286   : > { %6882 = shalt.err (!%p6879_p12)
}
 0x287   : > { %p8541_p13 = scmp.ne.s32.totalorder %s8519_s1, 0  ;;  %s8542_s16 = sld [smem:[#allocation58_spill]] }
 0x288   : > { %s847_s12 = scalar_lea.vmem [#allocation8], %s7451_s18  ;;  %s8543_s25 = sand.u32 1, %s7027_s30  }
 0x289   : > { %6123 = dma.hbm_to_vmem [thread:$0]  (!%p8541_p13), %s7748_s10, 16, %s838_s4, %s7477_s9  }
 0x28a   : > { %s854_s21 = sshll.u32 %s847_s12, 4  ;;  %s845_s0 = scalar_lea.sflag [#allocation9], %s8543_s25  ;;  %s855_s21 = int_to_ptr.vmem [resolvable:$true] %s854_s21 }
 0x28d   : > { %s7774_s8 = scalar_lea.hbm %s8542_s16, %s5677_s7  ;;  %s6888_s4 = scalar_lea.hbm %s8542_s16, 32 }
 0x28e   : > { %s6883_s11 = scalar_lea.hbm %s7774_s8, 16  ;;  %p6889_p5 = scmp.lt.u32.totalorder %s7774_s8, %s8542_s16 }
 0x28f   : > { %p6884_p4 = scmp.ne.s32.totalorder %s7774_s8, %s6883_s11  ;;  %p6890_p7 = scmp.lt.u32.totalorder %s6888_s4, %s6883_s11 }
 0x290   : > { %p6892_p8 = scmp.lt.u32.totalorder %s6883_s11, %s7774_s8 }
 0x291   : > { %p6886_p11 = pnand %p6884_p4, %p8538_p10  ;;  %p6891_p9 = por %p6890_p7, %p6889_p5 }
 0x293   : > { %p6887_p3 = pneg %p6886_p11  ;;  %p6893_p1 = por %p6892_p8, %p6891_p9 }
 0x295   : > { %p6894_p6 = pnand %p6893_p1, %p6887_p3 }
 0x297   : > { %6897 = shalt.err (!%p6894_p6)
}
 0x298   : > { %s6898_s18 = scalar_lea.vmem %s855_s21, 16  ;;  %s7052_s20 = smov [#allocation8]  }
 0x299   : > { %p6899_p0 = scmp.ne.s32.totalorder %s855_s21, %s6898_s18  ;;  %s6903_s5 = sshll.u32 %s7052_s20, 4  ;;  %s6904_s5 = int_to_ptr.vmem [resolvable:$false] %s6903_s5 }
 0x29a   : > { %s6905_s17 = scalar_lea.vmem %s6904_s5, 32  ;;  %p6906_p4 = scmp.lt.s32.totalorder %s855_s21, %s6904_s5 }
 0x29b   : > { %p6901_p2 = pnand %p6899_p0, %p8538_p10  ;;  %p6907_p11 = scmp.lt.s32.totalorder %s6905_s17, %s6898_s18 }
 0x29d   : > { %p6902_p12 = pneg %p6901_p2  ;;  %p6908_p13 = por %p6907_p11, %p6906_p4 }
 0x29f   : > { %p6909_p5 = pnand %p6908_p13, %p6902_p12 }
 0x2a1   : > { %6912 = shalt.err (!%p6909_p5)
}
 0x2a2   : > { %p8544_p7 = scmp.ne.s32.totalorder %s8519_s1, 0  ;;  %s8545_s14 = sld [smem:[#allocation53_spill]] }
 0x2a4   : > { %6126 = dma.hbm_to_vmem [thread:$0]  (!%p8544_p7), %s7774_s8, 16, %s855_s21, %s845_s0  }
 0x2a8   : > { %p8546_p3 = scmp.ne.s32.totalorder %s8545_s14, 0 }
 0x2a9   : > { %s7799_s13 = sand.u32 (!%p8546_p3), 1, %s7019_s28   ;;  %p8547_p10 = scmp.ne.s32.totalorder (!%p8546_p3), %s8516_s24, 0 }
 0x2aa   : > { %863 = sbr.rel (%p8546_p3) target bundleno = 5598 (0x15de), region = 108  ;;  %s7802_s12 = sshll.u32 (!%p8546_p3), %s7799_s13, 3 }
 0x2ab   : > { %s866_s25 = scalar_lea.sflag (!%p8546_p3), [#allocation3], %s7799_s13  ;;  %s869_s11 = scalar_lea.vmem (!%p8546_p3), [#allocation2], %s7802_s12 }
 0x2b1   : > { %6958 = dma.done.wait (%p8547_p10), %s866_s25, 128  }
 0x2b2   : > { %6960 = vsyncadd (%p8547_p10), %s866_s25, 4294967168  ;;  %s874_s1 = sand.u32 1, %s7203_s23   ;;  %s878_s21 = scalar_lea.vmem [#allocation5], %s7802_s12 }
 0x2b3   : > { %s875_s8 = scalar_lea.sflag [#allocation6], %s874_s1 }
 0x2b4   : > { %6962 = dma.done.wait (%p8547_p10), %s875_s8, 144  }
 0x2b5   : > { %6964 = vsyncadd (%p8547_p10), %s875_s8, 4294967152  ;;  %s886_s0 = scalar_lea.vmem [#allocation7], %s7799_s13  ;;  %s892_s9 = scalar_lea.sflag [#allocation9], %s874_s1 }
 0x2b6   : > { %s894_s10 = scalar_lea.vmem [#allocation8], %s7799_s13 }
 0x2b7   : > { %6966 = dma.done.wait (%p8547_p10), %s892_s9, 16  }
 0x2b8   : > { %6968 = vsyncadd (%p8547_p10), %s892_s9, 4294967280  ;;  %p8548_p13 = scmp.eq.s32.totalorder %s7203_s23, 0 }
 0x2ba   : > { %6970 = dma.done.wait (%p8548_p13), [#allocation9], 16   ;;  %p8549_p9 = pmov %p8548_p13 }
 0x2bc   : > { %6972 = vsyncadd (%p8549_p9), [#allocation9], 4294967280  ;;  %p8550_p8 = pmov %p8549_p9 }
 0x2be   : > { %6974 = dma.done.wait (%p8550_p8), [#allocation12], 272   ;;  %p8551_p1 = pmov %p8550_p8 }
 0x2c0   : > { %6976 = vsyncadd (%p8551_p1), [#allocation12], 4294967024  ;;  %p8552_p6 = pmov %p8551_p1 }
 0x2c1   : > { %p8553_p0 = pmov %p8551_p1 }
 0x2c2   : > { %6978 = dma.done.wait (%p8552_p6), [#allocation15], 272  }
 0x2c3   : > { %6980 = vsyncadd (%p8553_p0), [#allocation15], 4294967024  ;;  %p8554_p2 = pmov %p8553_p0 }
 0x2c4   : > { %p8555_p12 = pmov %p8553_p0 }
 0x2c5   : > { %6982 = dma.done.wait (%p8554_p2), [#allocation18], 272  }
 0x2c6   : > { %6984 = vsyncadd (%p8555_p12), [#allocation18], 4294967024  ;;  %p8556_p4 = pmov %p8553_p0 }
 0x2c7   : > { %p8557_p11 = pmov %p8553_p0 }
 0x2c8   : > { %6986 = dma.done.wait (%p8556_p4), [#allocation21], 272  }
 0x2c9   : > { %6988 = vsyncadd (%p8557_p11), [#allocation21], 4294967024  ;;  %p8558_p5 = pmov %p8553_p0 }
 0x2ca   : > { %p8559_p7 = pmov %p8553_p0 }
 0x2cb   : > { %6990 = dma.done.wait (%p8558_p5), [#allocation24], 272  }
 0x2cc   : > { %6992 = vsyncadd (%p8559_p7), [#allocation24], 4294967024  ;;  %p8560_p3 = pmov %p8553_p0 }
 0x2cd   : > { %p8561_p10 = pmov %p8553_p0 }
 0x2ce   : > { %6994 = dma.done.wait (%p8560_p3), [#allocation27], 32  }
 0x2cf   : > { %6996 = vsyncadd (%p8561_p10), [#allocation27], 4294967264  ;;  %p8562_p13 = pmov %p8553_p0 }
 0x2d0   : > { %p8563_p9 = pmov %p8553_p0 }
 0x2d1   : > { %6998 = dma.done.wait (%p8562_p13), [#allocation30], 272  }
 0x2d2   : > { %7000 = vsyncadd (%p8563_p9), [#allocation30], 4294967024  ;;  %p8564_p8 = pmov %p8553_p0 }
 0x2d3   : > { %p8565_p1 = pmov %p8553_p0 }
 0x2d4   : > { %7002 = dma.done.wait (%p8564_p8), [#allocation33], 528  }
 0x2d5   : > { %7004 = vsyncadd (%p8565_p1), [#allocation33], 4294966768  ;;  %p8566_p6 = pmov %p8553_p0 }
 0x2d7   : > { %7006 = dma.done.wait (%p8566_p6), [#allocation36], 16  }
 0x2d8   : > { %7008 = vsyncadd (%p8553_p0), [#allocation36], 4294967280  ;;  %v1041_v0 = vld [vmem:[%s869_s11] sm:$0xff]  ;;  %vm1061_vm0 = vcmask 261120   ;;  %v7053_v4 = vmov 0.0   ;;  %vm7054_vm1 = vmmov 0   ;;  %v1043_v25 = vlaneseq }
 0x2d9   : > { %v1060_v1 = vmul.f32 %v1041_v0, %v1041_v0  ;;  %v6234_v3 = vld [vmem:[#allocation11] sm:$0xff]   ;;  %5821 = vmatprep.subr.bf16.mxu0 %v7053_v4  ;;  %5825 = vmatprep.mubr.msk.bf16.mxu0 %vm7054_vm1, %v7053_v4  ;;  %v6235_v5 = vld [vmem:[#allocation11 + $0x8] sm:$0xff]   ;;  %v5701_v10 = vld [vmem:[#allocation10] ss:$0 sm:$0xff]  ;;  %s7055_s24 = smov 112   ;;  %s7056_s4 = smov 120  }
 0x2da   : > { %5822 = vmatpush3.bf16.msra.mxu0 %v6234_v3  ;;  %5835 = vmatprep.subr.bf16.mxu1 %v7053_v4  ;;  %v5702_v14 = vld [vmem:[#allocation13] ss:$0 sm:$0xff]  ;;  %s7057_s7 = smov 104   ;;  %s7058_s29 = smov 96   ;;  %v7059_v26 = vmov 1983009808  }
 0x2db   : > { %v1062_v2 = vsel %vm1061_vm0, %v1060_v1, 0.0  ;;  %5823 = vmatprep.subr.bf16.mxu0 %v7053_v4  ;;  %5837 = vmatprep.mubr.msk.bf16.mxu1 %vm7054_vm1, %v7053_v4  ;;  %v1157_v27 = vunpack.c.l.s4 %v7059_v26  ;;  %v7899_v29 = vshrl.u32 %v1043_v25, 7  ;;  %v7060_v31 = vmov 1934713408   ;;  %s7062_s18 = smov 64   ;;  %s7063_s20 = smov 16  }
 0x2dc   : > { %1063 = vadd.xlane.f32.xlu0 %v1062_v2  ;;  %v1189_v32 = vunpack.c.l.s4 %v7060_v31  ;;  %vm1890_vm2 = vcmask 1043456   ;;  %vm1886_vm3 = vcmask 64512   ;;  %s7064_s5 = smov 8   ;;  %s7065_s17 = smov 24   ;;  %vm3009_vm8 = vcmask 130048  }
 0x2dd   : > { %v1158_v30 = vunpack.c.0.s8 %v1157_v27  ;;  %vm3011_vm9 = vcmask 195584   ;;  %vm5283_vm12 = vcmask 523264   ;;  %s5763_s14 = sshll.u32 %s7203_s23, 7  ;;  %s1039_s25 = scalar_lea.vmem [#allocation37], %s7802_s12 }
 0x2de   : > { %5824 = vmatpush3.bf16.msra.mxu0 %v6235_v5  ;;  %v1190_v37 = vunpack.c.0.s8 %v1189_v32  ;;  %s5338_s23 = scalar_lea.sflag [#allocation4], %s7799_s13  ;;  %p8570_p12 = scmp.ne.s32.totalorder %s8517_s22, 0 }
 0x2df   : > { %5829 = vmatprep.subr.bf16.mxu0 %v7053_v4  ;;  %v7902_v36 = vsub.s32 %v1158_v30, %v7899_v29  ;;  %s7066_s9 = smov [#allocation37]  }
 0x2e0   : > { %v7909_v44 = vsub.s32 %v1190_v37, %v7899_v29 }
 0x369   : > { %v1064_v6 = vpop.xlane.xlu0 %1063 }
 0x36a   : > { %v1066_v7 = vmul.f32 0.03125, %v1064_v6 }
 0x36c   : > { %v1067_v8 = vadd.f32 1e-06, %v1066_v7 }
 0x36e   : > { %6250 = vrsqrt.f32 %v1067_v8 }
 0x378   : > { %v6251_v9 = vpop.eup %6250 }
 0x379   : > { %v1069_v11 = vmul.f32 %v6251_v9, %v1041_v0 }
 0x37b   : > { %v1076_v12 = vmul.f32 %v5701_v10, %v1069_v11 }
 0x37d   : > { %v1081_v13 = vpack.c.bf16 %v1076_v12, %v1076_v12 }
 0x37f   : > { %5826 = vmatmul.mubr.msk.bf16.vlgmr.msra.gmra.mrb[0].mxu0 %vm1061_vm0, %v1081_v13 }
 0x380   : > { %5831 = vmatprep.mubr.msk.bf16.mxu0 %vm7054_vm1, %v7053_v4 }
 0x452   : > { %v1138_v15 = vpop.f32.mrb[0].mxu0 }
 0x453   : > { %v7876_v16 = vadd.f32 %v5702_v14, %v1138_v15  ;;  %v5827_v17 = vpop.f32.mrb[1].mxu0 }
 0x454   : > { %v1141_v18 = vpop.f32.mrb[2].mxu0 }
 0x455   : > { %1148 = vrot.lane.b32.xlu1 %v7876_v16, %s7055_s24  ;;  %1145 = vrot.lane.b32.xlu0 %v7876_v16, %s7056_s4  ;;  %v5828_v19 = vpop.f32.mrb[3].mxu0 }
 0x459   : > { %1151 = vrot.lane.b32.xlu1 %v7876_v16, %s7057_s7 }
 0x45d   : > { %1230 = vrot.lane.b32.xlu1 %v7876_v16, %s7058_s29 }
 0x4c7   : > { %v7886_v20 = vpop.permute.xlu0 %1145  ;;  %v7890_v21 = vpop.permute.xlu1 %1148 }
 0x4c8   : > { %1232 = vrot.lane.b32.xlu1 %v7886_v20, %s7058_s29 }
 0x4cb   : > { %v7894_v22 = vpop.permute.xlu1 %1151 }
 0x4cc   : > { %1234 = vrot.lane.b32.xlu1 %v7890_v21, %s7058_s29 }
 0x4cf   : > { %v1231_v23 = vpop.permute.xlu1 %1230 }
 0x4d0   : > { %1236 = vrot.lane.b32.xlu1 %v7894_v22, %s7058_s29 }
 0x53a   : > { %v1233_v24 = vpop.permute.xlu1 %1232 }
 0x53e   : > { %v1235_v28 = vpop.permute.xlu1 %1234 }
 0x53f   : > { %v1242_v33 = vcombine.low %v1231_v23, %v1235_v28  ;;  %v1243_v34 = vcombine.high %v1231_v23, %v1235_v28 }
 0x541   : > { %v1250_v40 = vrot.slane %v1242_v33, %v7902_v36  ;;  %v1257_v41 = vrot.slane %v1243_v34, %v7902_v36 }
 0x542   : > { %v1237_v35 = vpop.permute.xlu1 %1236 }
 0x543   : > { %v1258_v38 = vcombine.low %v1233_v24, %v1237_v35  ;;  %v1259_v39 = vcombine.high %v1233_v24, %v1237_v35 }
 0x545   : > { %v1266_v42 = vrot.slane %v1258_v38, %v7902_v36  ;;  %v1273_v43 = vrot.slane %v1259_v39, %v7902_v36  ;;  %v7061_v39 = vmov 0  }
 0x547   : > { %v1275_v45 = vcombine.high %v1250_v40, %v1266_v42  ;;  %v1274_v46 = vcombine.low %v1250_v40, %v1266_v42  ;;  %v1290_v47 = vcombine.low %v1257_v41, %v1273_v43  ;;  %v1291_v50 = vcombine.high %v1257_v41, %v1273_v43 }
 0x549   : > { %v1289_v48 = vrot.slane %v1275_v45, %v7909_v44  ;;  %v1282_v49 = vrot.slane %v1274_v46, %v7909_v44  ;;  %v1298_v53 = vrot.slane %v1290_v47, %v7909_v44  ;;  %v1305_v55 = vrot.slane %v1291_v50, %v7909_v44 }
 0x54b   : > { %v1312_v51 = vpack.c.bf16 %v1289_v48, %v1289_v48  ;;  %v1310_v52 = vpack.c.bf16 %v1282_v49, %v1282_v49  ;;  %v1307_v54 = vcombine.high %v1289_v48, %v7053_v4  ;;  %v1314_v56 = vpack.c.bf16 %v1298_v53, %v1298_v53 }
 0x54c   : > { %v1308_v58 = vcombine.high %v1298_v53, %v7053_v4  ;;  %v1306_v59 = vcombine.high %v1282_v49, %v7053_v4  ;;  %v1309_v62 = vcombine.high %v1305_v55, %v7053_v4  ;;  %v1316_v0 = vpack.c.bf16 %v1305_v55, %v1305_v55 }
 0x54d   : > { %1500 = vxpose.xlu0.c.b16.start.end [1/1] (short) (narrow) %v1312_v51, 16  ;;  %1468 = vxpose.xlu1.c.b16.start.end [1/1] (short) (narrow) %v1310_v52, 16  ;;  %v1313_v57 = vpack.c.bf16 %v1307_v54, %v1307_v54  ;;  %v1170_v55 = vcombine.low %v7886_v20, %v7894_v22 }
 0x54e   : > { %v1315_v60 = vpack.c.bf16 %v1308_v58, %v1308_v58  ;;  %v1311_v61 = vpack.c.bf16 %v1306_v59, %v1306_v59  ;;  %v1317_v63 = vpack.c.bf16 %v1309_v62, %v1309_v62  ;;  %v1155_v58 = vcombine.high %v7876_v16, %v7890_v21 }
 0x54f   : > { %v1178_v59 = vrot.slane %v1170_v55, %v7902_v36 }
 0x550   : > { %v1169_v62 = vrot.slane %v1155_v58, %v7902_v36 }
 0x551   : > { %1532 = vxpose.xlu0.c.b16.start.end [1/1] (short) (narrow) %v1314_v56, 16  ;;  %1516 = vxpose.xlu1.c.b16.start.end [1/1] (short) (narrow) %v1313_v57, 16  ;;  %v1171_v56 = vcombine.high %v7886_v20, %v7894_v22  ;;  %v1154_v57 = vcombine.low %v7876_v16, %v7890_v21 }
 0x555   : > { %1548 = vxpose.xlu1.c.b16.start.end [1/1] (short) (narrow) %v1315_v60, 16  ;;  %1484 = vxpose.xlu0.c.b16.start.end [1/1] (short) (narrow) %v1311_v61, 16  ;;  %v1185_v60 = vrot.slane %v1171_v56, %v7902_v36  ;;  %v1162_v61 = vrot.slane %v1154_v57, %v7902_v36 }
 0x559   : > { %1580 = vxpose.xlu1.c.b16.start.end [1/1] (short) (narrow) %v1317_v63, 16  ;;  %1564 = vxpose.xlu0.c.b16.start.end [1/1] (short) (narrow) %v1316_v0, 16  ;;  %v1186_v63 = vcombine.low %v1162_v61, %v1178_v59  ;;  %v1187_v0 = vcombine.high %v1162_v61, %v1178_v59 }
 0x5b3   : > { %v1508_v1 = vpop.trf.xlu0  ;;  %v1476_v2 = vpop.trf.xlu1 }
 0x5b7   : > { %v1540_v3 = vpop.trf.xlu0  ;;  %v1524_v5 = vpop.trf.xlu1 }
 0x5b8   : > { %v1596_v8 = vcombine.low %v1476_v2, %v1540_v3  ;;  %v1203_v2 = vcombine.high %v1169_v62, %v1185_v60 }
 0x5ba   : > { %v1603_v14 = vrot.slane %v1596_v8, %v7902_v36 }
 0x5bb   : > { %v1556_v6 = vpop.trf.xlu1  ;;  %v1492_v7 = vpop.trf.xlu0 }
 0x5bc   : > { %v1630_v9 = vcombine.low %v1492_v7, %v1556_v6 }
 0x5be   : > { %v1637_v15 = vrot.slane %v1630_v9, %v7902_v36 }
 0x5bf   : > { %v1588_v10 = vpop.trf.xlu1  ;;  %v1572_v11 = vpop.trf.xlu0 }
 0x5c0   : > { %v1638_v12 = vcombine.low %v1524_v5, %v1588_v10  ;;  %v1604_v13 = vcombine.low %v1508_v1, %v1572_v11  ;;  %v1202_v1 = vcombine.low %v1169_v62, %v1185_v60 }
 0x5c2   : > { %v1645_v17 = vrot.slane %v1638_v12, %v7902_v36  ;;  %v1611_v18 = vrot.slane %v1604_v13, %v7902_v36  ;;  %v1210_v3 = vrot.slane %v1202_v1, %v7909_v44 }
 0x5c4   : > { %v1646_v19 = vcombine.low %v1637_v15, %v1645_v17  ;;  %v1647_v23 = vcombine.high %v1637_v15, %v1645_v17  ;;  %v1612_v24 = vcombine.low %v1603_v14, %v1611_v18  ;;  %v1613_v26 = vcombine.high %v1603_v14, %v1611_v18 }
 0x5c5   : > { %v1220_v8 = vcombine.high %v1210_v3, %v7053_v4 }
 0x5c6   : > { %v1620_v27 = vrot.slane %v1612_v24, %v7909_v44  ;;  %v1654_v28 = vrot.slane %v1646_v19, %v7909_v44  ;;  %v1627_v30 = vrot.slane %v1613_v26, %v7909_v44  ;;  %v1661_v31 = vrot.slane %v1647_v23, %v7909_v44 }
 0x5c8   : > { %v1666_v32 = vpack.i.b16 %v1654_v28, %v1620_v27  ;;  %v1668_v33 = vshrl.u32 %v1620_v27, 16  ;;  %v1669_v34 = vshrl.u32 %v1654_v28, 16  ;;  %v1684_v35 = vshrl.u32 %v1627_v30, 16 }
 0x5c9   : > { %v1685_v38 = vshrl.u32 %v1661_v31, 16  ;;  %v1628_v40 = vcombine.high %v1620_v27, %v7061_v39  ;;  %v1662_v41 = vcombine.high %v1654_v28, %v7061_v39  ;;  %v1682_v42 = vpack.i.b16 %v1661_v31, %v1627_v30 }
 0x5ca   : > { %1696 = vxpose.xlu0.c.b16.start.end [1/1] (short) (narrow) %v1666_v32, 16  ;;  %v1670_v37 = vpack.i.b16 %v1669_v34, %v1668_v33  ;;  %v1629_v43 = vcombine.high %v1627_v30, %v7061_v39  ;;  %v1663_v48 = vcombine.high %v1661_v31, %v7061_v39 }
 0x5cb   : > { %v1686_v45 = vpack.i.b16 %v1685_v38, %v1684_v35  ;;  %v1676_v46 = vshrl.u32 %v1628_v40, 16  ;;  %v1677_v47 = vshrl.u32 %v1662_v41, 16  ;;  %v1674_v49 = vpack.i.b16 %v1662_v41, %v1628_v40 }
 0x5cc   : > { %1712 = vxpose.xlu1.c.b16.start.end [1/1] (short) (narrow) %v1670_v37, 16  ;;  %v1692_v51 = vshrl.u32 %v1629_v43, 16  ;;  %v1693_v52 = vshrl.u32 %v1663_v48, 16  ;;  %v1690_v53 = vpack.i.b16 %v1663_v48, %v1629_v43 }
 0x5cd   : > { %v1678_v50 = vpack.i.b16 %v1677_v47, %v1676_v46 }
 0x5ce   : > { %1760 = vxpose.xlu0.c.b16.start.end [1/1] (short) (narrow) %v1682_v42, 16  ;;  %v1694_v54 = vpack.i.b16 %v1693_v52, %v1692_v51 }
 0x5d0   : > { %1776 = vxpose.xlu1.c.b16.start.end [1/1] (short) (narrow) %v1686_v45, 16 }
 0x5d2   : > { %1728 = vxpose.xlu0.c.b16.start.end [1/1] (short) (narrow) %v1674_v49, 16 }
 0x5d4   : > { %1744 = vxpose.xlu1.c.b16.start.end [1/1] (short) (narrow) %v1678_v50, 16 }
 0x5d6   : > { %1792 = vxpose.xlu0.c.b16.start.end [1/1] (short) (narrow) %v1690_v53, 16 }
 0x5d8   : > { %1808 = vxpose.xlu1.c.b16.start.end [1/1] (short) (narrow) %v1694_v54, 16 }
 0x5dc   : > { %1320 = vrot.lane.b32.xlu1 %v7886_v20, %s7062_s18  ;;  %v1194_v20 = vrot.slane %v1186_v63, %v7909_v44 }
 0x5de   : > { %v1218_v6 = vcombine.high %v1194_v20, %v7053_v4  ;;  %v5706_v15 = vpack.c.bf16 %v1210_v3, %v1194_v20 }
 0x5df   : > { %1318 = vrot.lane.b32.xlu0 %v7876_v16, %s7062_s18  ;;  %v1217_v16 = vrot.slane %v1203_v2, %v7909_v44 }
 0x5e0   : > { %1322 = vrot.lane.b32.xlu1 %v7890_v21, %s7062_s18  ;;  %v5708_v12 = vpack.c.bf16 %v1220_v8, %v1218_v6  ;;  %v1413_v30 = vrot.slane %v5706_v15, %v7902_v36  ;;  %v1047_v6 = vld [vmem:[%s886_s0] sm:$0x1] }
 0x5e1   : > { %v1221_v9 = vcombine.high %v1217_v16, %v7053_v4  ;;  %vm1048_vm4 = vcmp.ne.s32.totalorder %v1047_v6, 0 }
 0x5e2   : > { %v1438_v24 = vrot.slane %v5708_v12, %v7902_v36  ;;  %v1050_v8 = vsel %vm1048_vm4, 1, %v7061_v39 }
 0x5e3   : > { %1324 = vrot.lane.b32.xlu0 %v7894_v22, %s7062_s18  ;;  %v1201_v22 = vrot.slane %v1187_v0, %v7909_v44 }
 0x5e5   : > { %v1219_v7 = vcombine.high %v1201_v22, %v7053_v4  ;;  %v5707_v17 = vpack.c.bf16 %v1217_v16, %v1201_v22 }
 0x5e7   : > { %v5709_v13 = vpack.c.bf16 %v1221_v9, %v1219_v7  ;;  %v1421_v31 = vrot.slane %v5707_v17, %v7902_v36  ;;  %v1053_v7 = vsub.s32 0, %v7899_v29  ;;  %v1046_v9 = vand.u32 127, %v1043_v25 }
 0x5e9   : > { %v1446_v26 = vrot.slane %v5709_v13, %v7902_v36  ;;  %v1422_v42 = vcombine.low %v1413_v30, %v1421_v31  ;;  %vm1049_vm5 = vcmp.le.s32.totalorder %v1046_v9, %v7899_v29 }
 0x5eb   : > { %v1447_v37 = vcombine.low %v1438_v24, %v1446_v26  ;;  %v1429_v49 = vrot.slane %v1422_v42, %v7909_v44 }
 0x5ed   : > { %v1454_v46 = vrot.slane %v1447_v37, %v7909_v44  ;;  %v1459_v62 = vshrl.u32 %v1429_v49, 16  ;;  %v1430_v22 = vcombine.high %v1429_v49, %v7061_v39 }
 0x5ef   : > { %v1460_v54 = vshrl.u32 %v1454_v46, 16  ;;  %v1458_v61 = vpack.i.b16 %v1454_v46, %v1429_v49  ;;  %v1455_v2 = vcombine.high %v1454_v46, %v7061_v39 }
 0x5f1   : > { %v1461_v1 = vpack.i.b16 %v1460_v54, %v1459_v62  ;;  %v1466_v3 = vshrl.u32 %v1455_v2, 16  ;;  %v1464_v16 = vpack.i.b16 %v1455_v2, %v1430_v22 }
 0x630   : > { %v1704_v21 = vpop.trf.xlu0 }
 0x632   : > { %v1720_v5 = vpop.trf.xlu1 }
 0x634   : > { %v1768_v10 = vpop.trf.xlu0 }
 0x635   : > { %v1824_v19 = vcombine.low %v1704_v21, %v1768_v10  ;;  %v1465_v21 = vshrl.u32 %v1430_v22, 16  ;;  %v1054_v10 = vrot.slane %v1050_v8, %v1053_v7 }
 0x636   : > { %v1784_v11 = vpop.trf.xlu1 }
 0x637   : > { %v1849_v27 = vcombine.low %v1720_v5, %v1784_v11  ;;  %v1831_v33 = vrot.slane %v1824_v19, %v7902_v36  ;;  %v1467_v5 = vpack.i.b16 %v1466_v3, %v1465_v21  ;;  %vm1055_vm6 = vcmp.eq.s32.totalorder %v1054_v10, 1 }
 0x638   : > { %v1736_v14 = vpop.trf.xlu0  ;;  %vm7999_vm7 = vmand %vm1049_vm5, %vm1055_vm6 }
 0x639   : > { %v1856_v38 = vrot.slane %v1849_v27, %v7902_v36 }
 0x63a   : > { %v1752_v18 = vpop.trf.xlu1 }
 0x63c   : > { %v1800_v23 = vpop.trf.xlu0 }
 0x63d   : > { %v1832_v28 = vcombine.low %v1736_v14, %v1800_v23 }
 0x63e   : > { %v1816_v32 = vpop.trf.xlu1 }
 0x63f   : > { %v1839_v34 = vrot.slane %v1832_v28, %v7902_v36  ;;  %v1857_v35 = vcombine.low %v1752_v18, %v1816_v32 }
 0x641   : > { %v1840_v40 = vcombine.low %v1831_v33, %v1839_v34  ;;  %v1864_v41 = vrot.slane %v1857_v35, %v7902_v36 }
 0x643   : > { %v1847_v43 = vrot.slane %v1840_v40, %v7909_v44  ;;  %v1865_v45 = vcombine.low %v1856_v38, %v1864_v41 }
 0x645   : > { %v1872_v47 = vrot.slane %v1865_v45, %v7909_v44  ;;  %v1848_v48 = vcombine.high %v1847_v43, %v7061_v39  ;;  %v1877_v51 = vshrl.u32 %v1847_v43, 16 }
 0x647   : > { %v1876_v50 = vpack.i.b16 %v1872_v47, %v1847_v43  ;;  %v1878_v52 = vshrl.u32 %v1872_v47, 16  ;;  %v1873_v53 = vcombine.high %v1872_v47, %v7061_v39  ;;  %v1883_v55 = vshrl.u32 %v1848_v48, 16 }
 0x649   : > { %v1892_v56 = vsel %vm1890_vm2, %v1876_v50, 0  ;;  %v1879_v57 = vpack.i.b16 %v1878_v52, %v1877_v51  ;;  %v1882_v58 = vpack.i.b16 %v1873_v53, %v1848_v48  ;;  %v1884_v59 = vshrl.u32 %v1873_v53, 16 }
 0x64a   : > { %5830 = vmatpush3.bf16.msra.mxu0 %v1892_v56 }
 0x64b   : > { %v1938_v60 = vsel %vm1890_vm2, %v1879_v57, 0  ;;  %5841 = vmatprep.subr.bf16.mxu0 %v7053_v4  ;;  %v1885_v63 = vpack.i.b16 %v1884_v59, %v1883_v55  ;;  %v1984_v0 = vsel %vm1890_vm2, %v1882_v58, 0 }
 0x64c   : > { %5836 = vmatpush3.bf16.msra.mxu1 %v1938_v60 }
 0x64d   : > { %5832 = vmatmul.mubr.msk.bf16.vlgmr.msra.gmra.mrb[4].mxu0 %vm1886_vm3, %v1458_v61  ;;  %5847 = vmatprep.subr.bf16.mxu1 %v7053_v4  ;;  %v2030_v20 = vsel %vm1890_vm2, %v1885_v63, 0 }
 0x64e   : > { %5842 = vmatpush3.bf16.msra.mxu0 %v1984_v0  ;;  %5843 = vmatprep.mubr.msk.bf16.mxu0 %vm7054_vm1, %v7053_v4  ;;  %v1321_v42 = vpop.permute.xlu1 %1320 }
 0x64f   : > { %5838 = vmatmul.mubr.msk.bf16.vlgmr.msra.gmra.mrb[0].mxu1 %vm1886_vm3, %v1461_v1  ;;  %5853 = vmatprep.subr.bf16.mxu0 %v7053_v4 }
 0x650   : > { %5848 = vmatpush3.bf16.msra.mxu1 %v2030_v20  ;;  %5849 = vmatprep.mubr.msk.bf16.mxu1 %vm7054_vm1, %v7053_v4 }
 0x651   : > { %5859 = vmatprep.subr.bf16.mxu1 %v7053_v4  ;;  %v1319_v41 = vpop.permute.xlu0 %1318 }
 0x652   : > { %v1323_v45 = vpop.permute.xlu1 %1322 }
 0x653   : > { %v1330_v47 = vcombine.low %v1319_v41, %v1323_v45  ;;  %v1331_v62 = vcombine.high %v1319_v41, %v1323_v45 }
 0x655   : > { %5844 = vmatmul.mubr.msk.bf16.vlgmr.msra.gmra.mrb[8].mxu0 %vm1886_vm3, %v1464_v16  ;;  %v1325_v43 = vpop.permute.xlu0 %1324  ;;  %v1338_v49 = vrot.slane %v1330_v47, %v7902_v36  ;;  %v1345_v1 = vrot.slane %v1331_v62, %v7902_v36 }
 0x656   : > { %5855 = vmatprep.mubr.msk.bf16.mxu0 %vm7054_vm1, %v7053_v4  ;;  %v1346_v46 = vcombine.low %v1321_v42, %v1325_v43  ;;  %v1347_v61 = vcombine.high %v1321_v42, %v1325_v43 }
 0x657   : > { %5850 = vmatmul.mubr.msk.bf16.vlgmr.msra.gmra.mrb[4].mxu1 %vm1886_vm3, %v1467_v5 }
 0x658   : > { %5861 = vmatprep.mubr.msk.bf16.mxu1 %vm7054_vm1, %v7053_v4  ;;  %v1354_v48 = vrot.slane %v1346_v46, %v7902_v36  ;;  %v1361_v63 = vrot.slane %v1347_v61, %v7902_v36 }
 0x65a   : > { %v1362_v50 = vcombine.low %v1338_v49, %v1354_v48  ;;  %v1363_v0 = vcombine.high %v1338_v49, %v1354_v48  ;;  %v1378_v20 = vcombine.low %v1345_v1, %v1361_v63  ;;  %v1379_v16 = vcombine.high %v1345_v1, %v1361_v63 }
 0x65c   : > { %v1370_v51 = vrot.slane %v1362_v50, %v7909_v44  ;;  %v1377_v2 = vrot.slane %v1363_v0, %v7909_v44  ;;  %v1386_v3 = vrot.slane %v1378_v20, %v7909_v44  ;;  %v1393_v8 = vrot.slane %v1379_v16, %v7909_v44 }
 0x65e   : > { %v1394_v52 = vcombine.high %v1370_v51, %v7053_v4  ;;  %v1398_v54 = vpack.c.bf16 %v1370_v51, %v1370_v51  ;;  %v1395_v22 = vcombine.high %v1377_v2, %v7053_v4  ;;  %v1400_v21 = vpack.c.bf16 %v1377_v2, %v1377_v2 }
 0x65f   : > { %v1396_v6 = vcombine.high %v1386_v3, %v7053_v4  ;;  %v1402_v9 = vpack.c.bf16 %v1386_v3, %v1386_v3  ;;  %v1404_v12 = vpack.c.bf16 %v1393_v8, %v1393_v8 }
 0x660   : > { %v1399_v53 = vpack.c.bf16 %v1394_v52, %v1394_v52  ;;  %v1401_v5 = vpack.c.bf16 %v1395_v22, %v1395_v22 }
 0x661   : > { %v1403_v10 = vpack.c.bf16 %v1396_v6, %v1396_v6 }
 0x720   : > { %v1928_v11 = vpop.f32.mrb[4].mxu0 }
 0x721   : > { %v2072_v13 = vmul.f32 0.35355338, %v1928_v11  ;;  %v5833_v14 = vpop.f32.mrb[5].mxu0  ;;  %v1397_v11 = vcombine.high %v1393_v8, %v7053_v4 }
 0x722   : > { %v1931_v15 = vpop.f32.mrb[6].mxu0  ;;  %v1974_v17 = vpop.f32.mrb[0].mxu1 }
 0x723   : > { %v2073_v18 = vmul.f32 0.35355338, %v1974_v17  ;;  %v5834_v19 = vpop.f32.mrb[7].mxu0  ;;  %v5839_v23 = vpop.f32.mrb[1].mxu1  ;;  %v8005_v25 = vsel %vm7999_vm7, %v2072_v13, -1e+09  ;;  %v1405_v13 = vpack.c.bf16 %v1397_v11, %v1397_v11 }
 0x724   : > { %v1977_v24 = vpop.f32.mrb[2].mxu1  ;;  %v2082_v26 = vsel %vm1886_vm3, %v8005_v25, -inf }
 0x725   : > { %v5840_v27 = vpop.f32.mrb[3].mxu1  ;;  %2083 = vmax.xlane.f32.xlu0 %v2082_v26  ;;  %v8011_v28 = vsel %vm7999_vm7, %v2073_v18, -1e+09 }
 0x726   : > { %v2085_v30 = vsel %vm1886_vm3, %v8011_v28, -inf }
 0x727   : > { %2086 = vmax.xlane.f32.xlu1 %v2085_v30 }
 0x728   : > { %v2020_v31 = vpop.f32.mrb[8].mxu0 }
 0x729   : > { %v5845_v32 = vpop.f32.mrb[9].mxu0  ;;  %v2074_v55 = vmul.f32 0.35355338, %v2020_v31 }
 0x72a   : > { %v2023_v33 = vpop.f32.mrb[10].mxu0  ;;  %v2066_v34 = vpop.f32.mrb[4].mxu1 }
 0x72b   : > { %v5846_v35 = vpop.f32.mrb[11].mxu0  ;;  %v5851_v37 = vpop.f32.mrb[5].mxu1  ;;  %v2075_v56 = vmul.f32 0.35355338, %v2066_v34  ;;  %v8021_v57 = vsel %vm7999_vm7, %v2074_v55, -1e+09 }
 0x72c   : > { %v2069_v38 = vpop.f32.mrb[6].mxu1  ;;  %v2088_v59 = vsel %vm1886_vm3, %v8021_v57, -inf }
 0x72d   : > { %v5852_v40 = vpop.f32.mrb[7].mxu1  ;;  %v8025_v58 = vsel %vm7999_vm7, %v2075_v56, -1e+09 }
 0x72e   : > { %v2091_v60 = vsel %vm1886_vm3, %v8025_v58, -inf }
 0x752   : > { %2146 = vxpose.xlu0.c.b16.start.end [1/1] (short) (narrow) %v1399_v53, 16 }
 0x754   : > { %2130 = vxpose.xlu1.c.b16.start.end [1/1] (short) (narrow) %v1398_v54, 16 }
 0x75f   : > { %2089 = vmax.xlane.f32.xlu0 %v2088_v59 }
 0x761   : > { %2092 = vmax.xlane.f32.xlu1 %v2091_v60 }
 0x78c   : > { %2162 = vxpose.xlu0.c.b16.start.end [1/1] (short) (narrow) %v1400_v21, 16 }
 0x78e   : > { %2178 = vxpose.xlu1.c.b16.start.end [1/1] (short) (narrow) %v1401_v5, 16 }
 0x790   : > { %2194 = vxpose.xlu0.c.b16.start.end [1/1] (short) (narrow) %v1402_v9, 16 }
 0x792   : > { %2210 = vxpose.xlu1.c.b16.start.end [1/1] (short) (narrow) %v1403_v10, 16 }
 0x794   : > { %2226 = vxpose.xlu0.c.b16.start.end [1/1] (short) (narrow) %v1404_v12, 16 }
 0x796   : > { %2242 = vxpose.xlu1.c.b16.start.end [1/1] (short) (narrow) %v1405_v13, 16 }
 0x7b2   : > { %v2084_v14 = vpop.xlane.xlu0 %2083 }
 0x7b3   : > { %v2094_v55 = vsub.f32 %v8005_v25, %v2084_v14 }
 0x7b4   : > { %v2087_v15 = vpop.xlane.xlu1 %2086 }
 0x7b5   : > { %v2095_v61 = vsub.f32 %v8011_v28, %v2087_v15  ;;  %v2098_v1 = vmul.f32 1.442695, %v2094_v55 }
 0x7b7   : > { %v2100_v3 = vmul.f32 1.442695, %v2095_v61  ;;  %6252 = vpow2.f32 %v2098_v1 }
 0x7b8   : > { %v2154_v17 = vpop.trf.xlu0 }
 0x7b9   : > { %6254 = vpow2.f32 %v2100_v3 }
 0x7ba   : > { %v2138_v18 = vpop.trf.xlu1 }
 0x7c1   : > { %v6253_v8 = vpop.eup %6252 }
 0x7c2   : > { %v2106_v9 = vsel %vm1886_vm3, %v6253_v8, 0.0 }
 0x7ec   : > { %v2090_v19 = vpop.xlane.xlu0 %2089 }
 0x7ed   : > { %v2096_v2 = vsub.f32 %v8021_v57, %v2090_v19  ;;  %v6255_v57 = vpop.eup %6254 }
 0x7ee   : > { %v2093_v23 = vpop.xlane.xlu1 %2092 }
 0x7ef   : > { %v2097_v25 = vsub.f32 %v8025_v58, %v2093_v23  ;;  %v2102_v5 = vmul.f32 1.442695, %v2096_v2  ;;  %v2109_v58 = vsel %vm1886_vm3, %v6255_v57, 0.0 }
 0x7f1   : > { %v2104_v6 = vmul.f32 1.442695, %v2097_v25  ;;  %6256 = vpow2.f32 %v2102_v5 }
 0x7f2   : > { %v2170_v24 = vpop.trf.xlu0 }
 0x7f3   : > { %6258 = vpow2.f32 %v2104_v6 }
 0x7f4   : > { %v2186_v26 = vpop.trf.xlu1 }
 0x7f6   : > { %v2202_v27 = vpop.trf.xlu0 }
 0x7f7   : > { %v2258_v31 = vcombine.low %v2138_v18, %v2202_v27 }
 0x7f8   : > { %v2218_v30 = vpop.trf.xlu1 }
 0x7f9   : > { %v2292_v33 = vcombine.low %v2154_v17, %v2218_v30  ;;  %v2265_v37 = vrot.slane %v2258_v31, %v7902_v36 }
 0x7fa   : > { %v2234_v32 = vpop.trf.xlu0 }
 0x7fb   : > { %v2266_v34 = vcombine.low %v2170_v24, %v2234_v32  ;;  %v2299_v41 = vrot.slane %v2292_v33, %v7902_v36  ;;  %v6257_v10 = vpop.eup %6256 }
 0x7fc   : > { %v2250_v35 = vpop.trf.xlu1  ;;  %v2112_v12 = vsel %vm1886_vm3, %v6257_v10, 0.0 }
 0x7fd   : > { %v2273_v38 = vrot.slane %v2266_v34, %v7902_v36  ;;  %v2300_v40 = vcombine.low %v2186_v26, %v2250_v35  ;;  %v6259_v11 = vpop.eup %6258 }
 0x7fe   : > { %v2115_v13 = vsel %vm1886_vm3, %v6259_v11, 0.0 }
 0x7ff   : > { %v2274_v42 = vcombine.low %v2265_v37, %v2273_v38  ;;  %v2307_v43 = vrot.slane %v2300_v40, %v7902_v36  ;;  %v2275_v49 = vcombine.high %v2265_v37, %v2273_v38 }
 0x801   : > { %v2308_v45 = vcombine.low %v2299_v41, %v2307_v43  ;;  %v2282_v46 = vrot.slane %v2274_v42, %v7909_v44  ;;  %v2309_v47 = vcombine.high %v2299_v41, %v2307_v43  ;;  %v2289_v0 = vrot.slane %v2275_v49, %v7909_v44 }
 0x803   : > { %v2316_v48 = vrot.slane %v2308_v45, %v7909_v44  ;;  %v2330_v50 = vshrl.u32 %v2282_v46, 16  ;;  %v2290_v53 = vcombine.high %v2282_v46, %v7061_v39  ;;  %v2323_v60 = vrot.slane %v2309_v47, %v7909_v44 }
 0x804   : > { %v2346_v21 = vshrl.u32 %v2289_v0, 16  ;;  %v2291_v15 = vcombine.high %v2289_v0, %v7061_v39 }
 0x805   : > { %v2328_v51 = vpack.i.b16 %v2316_v48, %v2282_v46  ;;  %v2331_v52 = vshrl.u32 %v2316_v48, 16  ;;  %v2324_v54 = vcombine.high %v2316_v48, %v7061_v39  ;;  %v2338_v63 = vshrl.u32 %v2290_v53, 16 }
 0x806   : > { %v2347_v22 = vshrl.u32 %v2323_v60, 16  ;;  %v2344_v16 = vpack.i.b16 %v2323_v60, %v2289_v0  ;;  %v2325_v14 = vcombine.high %v2323_v60, %v7061_v39  ;;  %v2354_v19 = vshrl.u32 %v2291_v15, 16 }
 0x807   : > { %2358 = vxpose.xlu0.c.b16.start.end [1/1] (short) (narrow) %v2328_v51, 16  ;;  %v2332_v56 = vpack.i.b16 %v2331_v52, %v2330_v50  ;;  %v2339_v59 = vshrl.u32 %v2324_v54, 16  ;;  %v2336_v62 = vpack.i.b16 %v2324_v54, %v2290_v53 }
 0x808   : > { %v2348_v28 = vpack.i.b16 %v2347_v22, %v2346_v21  ;;  %v2355_v17 = vshrl.u32 %v2325_v14, 16  ;;  %v2352_v18 = vpack.i.b16 %v2325_v14, %v2291_v15 }
 0x809   : > { %2374 = vxpose.xlu1.c.b16.start.end [1/1] (short) (narrow) %v2332_v56, 16  ;;  %v2340_v20 = vpack.i.b16 %v2339_v59, %v2338_v63 }
 0x80a   : > { %v2356_v23 = vpack.i.b16 %v2355_v17, %v2354_v19 }
 0x80b   : > { %2390 = vxpose.xlu0.c.b16.start.end [1/1] (short) (narrow) %v2336_v62, 16 }
 0x80d   : > { %2406 = vxpose.xlu1.c.b16.start.end [1/1] (short) (narrow) %v2340_v20, 16 }
 0x80f   : > { %2422 = vxpose.xlu0.c.b16.start.end [1/1] (short) (narrow) %v2344_v16, 16 }
 0x811   : > { %2438 = vxpose.xlu1.c.b16.start.end [1/1] (short) (narrow) %v2348_v28, 16 }
 0x81c   : > { %2107 = vadd.xlane.f32.xlu0 %v2106_v9 }
 0x81e   : > { %2110 = vadd.xlane.f32.xlu1 %v2109_v58 }
 0x820   : > { %2113 = vadd.xlane.f32.xlu0 %v2112_v12 }
 0x822   : > { %2116 = vadd.xlane.f32.xlu1 %v2115_v13 }
 0x84d   : > { %2454 = vxpose.xlu0.c.b16.start.end [1/1] (short) (narrow) %v2352_v18, 16 }
 0x84f   : > { %2470 = vxpose.xlu1.c.b16.start.end [1/1] (short) (narrow) %v2356_v23, 16 }
 0x86d   : > { %v2366_v24 = vpop.trf.xlu0 }
 0x86f   : > { %v2382_v26 = vpop.trf.xlu1 }
 0x871   : > { %v2398_v27 = vpop.trf.xlu0 }
 0x873   : > { %v2414_v30 = vpop.trf.xlu1 }
 0x875   : > { %v2430_v31 = vpop.trf.xlu0 }
 0x876   : > { %v2486_v38 = vcombine.low %v2366_v24, %v2430_v31 }
 0x877   : > { %v2446_v32 = vpop.trf.xlu1 }
 0x878   : > { %v2511_v42 = vcombine.low %v2382_v26, %v2446_v32  ;;  %v2493_v48 = vrot.slane %v2486_v38, %v7902_v36 }
 0x87a   : > { %v2518_v54 = vrot.slane %v2511_v42, %v7902_v36 }
 0x8a9   : > { %v2108_v33 = vpop.xlane.xlu0 %2107 }
 0x8aa   : > { %6260 = vrcp.f32 %v2108_v33 }
 0x8ab   : > { %v2111_v34 = vpop.xlane.xlu1 %2110 }
 0x8ac   : > { %6262 = vrcp.f32 %v2111_v34 }
 0x8ad   : > { %v2114_v35 = vpop.xlane.xlu0 %2113 }
 0x8ae   : > { %6264 = vrcp.f32 %v2114_v35 }
 0x8af   : > { %v2117_v37 = vpop.xlane.xlu1 %2116 }
 0x8b0   : > { %6266 = vrcp.f32 %v2117_v37 }
 0x8b3   : > { %v2462_v40 = vpop.trf.xlu0 }
 0x8b4   : > { %v6261_v41 = vpop.eup %6260  ;;  %v2494_v43 = vcombine.low %v2398_v27, %v2462_v40 }
 0x8b5   : > { %v2478_v45 = vpop.trf.xlu1  ;;  %v2122_v46 = vmul.f32 %v6261_v41, %v6253_v8 }
 0x8b6   : > { %v6263_v47 = vpop.eup %6262  ;;  %v2501_v49 = vrot.slane %v2494_v43, %v7902_v36  ;;  %v2519_v50 = vcombine.low %v2414_v30, %v2478_v45 }
 0x8b7   : > { %v2126_v51 = vpack.c.bf16 %v2122_v46, %v2122_v46  ;;  %v2123_v52 = vmul.f32 %v6263_v47, %v6255_v57 }
 0x8b8   : > { %v6265_v53 = vpop.eup %6264  ;;  %v2502_v55 = vcombine.low %v2493_v48, %v2501_v49  ;;  %v2526_v56 = vrot.slane %v2519_v50, %v7902_v36 }
 0x8b9   : > { %v2552_v59 = vsel %vm1886_vm3, %v2126_v51, 0  ;;  %v2127_v60 = vpack.c.bf16 %v2123_v52, %v2123_v52  ;;  %v2124_v61 = vmul.f32 %v6265_v53, %v6257_v10 }
 0x8ba   : > { %v6267_v62 = vpop.eup %6266  ;;  %v2509_v63 = vrot.slane %v2502_v55, %v7909_v44  ;;  %v2527_v0 = vcombine.low %v2518_v54, %v2526_v56  ;;  %5854 = vmatpush3.bf16.xpose.msra.mxu0 %v2552_v59  ;;  %v6236_v54 = vld [vmem:[#allocation14] sm:$0xff]  }
 0x8bb   : > { %v2598_v1 = vsel %vm1886_vm3, %v2127_v60, 0  ;;  %5865 = vmatprep.subr.bf16.mxu0 %v7053_v4  ;;  %v2125_v2 = vmul.f32 %v6267_v62, %v6259_v11  ;;  %v2128_v22 = vpack.c.bf16 %v2124_v61, %v2124_v61 }
 0x8bc   : > { %v2534_v20 = vrot.slane %v2527_v0, %v7909_v44  ;;  %5860 = vmatpush3.bf16.xpose.msra.mxu1 %v2598_v1  ;;  %v2539_v3 = vshrl.u32 %v2509_v63, 16  ;;  %v2510_v8 = vcombine.high %v2509_v63, %v7061_v39  ;;  %v6237_v1 = vld [vmem:[#allocation14 + $0x8] sm:$0xff]  }
 0x8bd   : > { %5871 = vmatprep.subr.bf16.mxu1 %v7053_v4  ;;  %v2129_v21 = vpack.c.bf16 %v2125_v2, %v2125_v2  ;;  %v2644_v6 = vsel %vm1886_vm3, %v2128_v22, 0 }
 0x8be   : > { %v2538_v25 = vpack.i.b16 %v2534_v20, %v2509_v63  ;;  %v2540_v16 = vshrl.u32 %v2534_v20, 16  ;;  %v2535_v28 = vcombine.high %v2534_v20, %v7061_v39  ;;  %v2545_v10 = vshrl.u32 %v2510_v8, 16 }
 0x8bf   : > { %v2690_v57 = vsel %vm1886_vm3, %v2129_v21, 0 }
 0x8c0   : > { %v2541_v5 = vpack.i.b16 %v2540_v16, %v2539_v3  ;;  %v2546_v9 = vshrl.u32 %v2535_v28, 16  ;;  %v2544_v58 = vpack.i.b16 %v2535_v28, %v2510_v8 }
 0x8c1   : > { %5856 = vmatmul.mubr.msk.bf16.vlgmr.msra.gmra.mrb[12].mxu0 %vm1886_vm3, %v2538_v25 }
 0x8c2   : > { %5866 = vmatpush3.bf16.xpose.msra.mxu0 %v2644_v6  ;;  %5867 = vmatprep.mubr.msk.bf16.mxu0 %vm7054_vm1, %v7053_v4  ;;  %v2547_v11 = vpack.i.b16 %v2546_v9, %v2545_v10 }
 0x8c3   : > { %5862 = vmatmul.mubr.msk.bf16.vlgmr.msra.gmra.mrb[8].mxu1 %vm1886_vm3, %v2541_v5  ;;  %5877 = vmatprep.subr.bf16.mxu0 %v7053_v4 }
 0x8c4   : > { %5872 = vmatpush3.bf16.xpose.msra.mxu1 %v2690_v57  ;;  %5873 = vmatprep.mubr.msk.bf16.mxu1 %vm7054_vm1, %v7053_v4 }
 0x8c5   : > { %5885 = vmatprep.subr.bf16.mxu1 %v7053_v4 }
 0x8c9   : > { %5868 = vmatmul.mubr.msk.bf16.vlgmr.msra.gmra.mrb[16].mxu0 %vm1886_vm3, %v2544_v58 }
 0x8ca   : > { %5881 = vmatprep.mubr.msk.bf16.mxu0 %vm7054_vm1, %v7053_v4  ;;  %5878 = vmatpush3.bf16.msra.mxu0 %v6236_v54 }
 0x8cb   : > { %5874 = vmatmul.mubr.msk.bf16.vlgmr.msra.gmra.mrb[12].mxu1 %vm1886_vm3, %v2547_v11  ;;  %5879 = vmatprep.subr.bf16.mxu0 %v7053_v4 }
 0x8cc   : > { %5889 = vmatprep.mubr.msk.bf16.mxu1 %vm7054_vm1, %v7053_v4 }
 0x8ce   : > { %5880 = vmatpush3.bf16.msra.mxu0 %v6237_v1 }
 0x8cf   : > { %5893 = vmatprep.subr.bf16.mxu0 %v7053_v4 }
 0x994   : > { %v2588_v12 = vpop.f32.mrb[12].mxu0 }
 0x995   : > { %2732 = vxpose.xlu0.b32.start.end [1/1] (short) (narrow) %v2588_v12, 8  ;;  %v5857_v13 = vpop.f32.mrb[13].mxu0 }
 0x996   : > { %v2591_v14 = vpop.f32.mrb[14].mxu0  ;;  %v2634_v15 = vpop.f32.mrb[8].mxu1 }
 0x997   : > { %2764 = vxpose.xlu1.b32.start.end [1/1] (short) (narrow) %v2634_v15, 8  ;;  %v5858_v17 = vpop.f32.mrb[15].mxu0  ;;  %v5863_v18 = vpop.f32.mrb[9].mxu1 }
 0x998   : > { %v2637_v19 = vpop.f32.mrb[10].mxu1 }
 0x999   : > { %v5864_v23 = vpop.f32.mrb[11].mxu1  ;;  %v6238_v19 = vld [vmem:[#allocation22] sm:$0xff]  }
 0x99c   : > { %v2680_v24 = vpop.f32.mrb[16].mxu0 }
 0x99d   : > { %2796 = vxpose.xlu0.b32.start.end [1/1] (short) (narrow) %v2680_v24, 8  ;;  %v5869_v26 = vpop.f32.mrb[17].mxu0  ;;  %v6239_v24 = vld [vmem:[#allocation22 + $0x8] sm:$0xff]  }
 0x99e   : > { %v2683_v27 = vpop.f32.mrb[18].mxu0  ;;  %v2726_v30 = vpop.f32.mrb[12].mxu1  ;;  %v1042_v26 = vld [vmem:[%s878_s21] sm:$0xff]  ;;  %s8569_s21 = sld [smem:[#allocation77_spill]] }
 0x99f   : > { %v5870_v31 = vpop.f32.mrb[19].mxu0  ;;  %v5875_v32 = vpop.f32.mrb[13].mxu1  ;;  %v3168_v27 = vpack.c.bf16 %v1042_v26, %v1042_v26 }
 0x9a0   : > { %v2729_v33 = vpop.f32.mrb[14].mxu1 }
 0x9a1   : > { %v5876_v34 = vpop.f32.mrb[15].mxu1  ;;  %2828 = vxpose.xlu0.b32.start.end [1/1] (short) (narrow) %v2726_v30, 8  ;;  %v5720_v30 = vld [vmem:[#allocation16] ss:$0 sm:$0xff] }
 0x9a4   : > { %s8366_s0 = scalar_lea.hbm %s8569_s21, %s5763_s14 }
 0xa15   : > { %v2748_v35 = vpop.trf.xlu0 }
 0xa17   : > { %v2780_v38 = vpop.trf.xlu1 }
 0xa1d   : > { %v2812_v37 = vpop.trf.xlu0 }
 0xa1e   : > { %v2860_v40 = vcombine.low %v2748_v35, %v2812_v37  ;;  %v2861_v41 = vcombine.high %v2748_v35, %v2812_v37  ;;  %v6288_v35 = vld [vmem:[%s869_s11] sm:$0xff]  ;;  %s5351_s11 = sshll.u32 %s1039_s25, 4  ;;  %s8368_s11 = int_to_ptr.vmem [resolvable:$true] %s5351_s11 }
 0xa1f   : > { %s6913_s12 = scalar_lea.vmem %s8368_s11, 128 }
 0xa20   : > { %v2868_v46 = vrot.slane %v2860_v40, %v7902_v36  ;;  %v2875_v47 = vrot.slane %v2861_v41, %v7902_v36  ;;  %v5729_v41 = vld [vmem:[#allocation23] ss:$0 sm:$0xff]  ;;  %p6914_p2 = scmp.ne.s32.totalorder %s8368_s11, %s6913_s12 }
 0xa21   : > { %v2844_v42 = vpop.trf.xlu0 }
 0xa22   : > { %v2876_v43 = vcombine.low %v2780_v38, %v2844_v42  ;;  %v2877_v45 = vcombine.high %v2780_v38, %v2844_v42  ;;  %p6915_p4 = pnand %p6914_p2, %p8570_p12 }
 0xa24   : > { %v2884_v48 = vrot.slane %v2876_v43, %v7902_v36  ;;  %v2891_v49 = vrot.slane %v2877_v45, %v7902_v36  ;;  %p6916_p11 = pneg %p6915_p4 }
 0xa26   : > { %v2892_v50 = vcombine.low %v2868_v46, %v2884_v48  ;;  %v2893_v51 = vcombine.high %v2868_v46, %v2884_v48  ;;  %v2908_v52 = vcombine.low %v2875_v47, %v2891_v49  ;;  %v2909_v53 = vcombine.high %v2875_v47, %v2891_v49  ;;  %v6240_v49 = vld [vmem:[#allocation19] sm:$0xff]  }
 0xa27   : > { %5886 = vmatpush3.bf16.msra.mxu1 %v6240_v49 }
 0xa28   : > { %v2900_v55 = vrot.slane %v2892_v50, %v7909_v44  ;;  %v2907_v56 = vrot.slane %v2893_v51, %v7909_v44  ;;  %v2916_v59 = vrot.slane %v2908_v52, %v7909_v44  ;;  %v2923_v60 = vrot.slane %v2909_v53, %v7909_v44  ;;  %v6241_v50 = vld [vmem:[#allocation19 + $0x8] sm:$0xff]   ;;  %5887 = vmatprep.subr.bf16.mxu1 %v7053_v4 }
 0xa2a   : > { %v2928_v61 = vcombine.low %v2900_v55, %v2907_v56  ;;  %v5718_v62 = vcombine.high %v2900_v55, %v2907_v56  ;;  %v2944_v63 = vcombine.low %v2916_v59, %v2923_v60  ;;  %v5719_v0 = vcombine.high %v2916_v59, %v2923_v60 }
 0xa2b   : > { %5888 = vmatpush3.bf16.msra.mxu1 %v6241_v50 }
 0xa2c   : > { %v2935_v2 = vrot.slane %v2928_v61, %v7902_v36  ;;  %v2943_v20 = vrot.slane %v5718_v62, %v7902_v36  ;;  %v2951_v22 = vrot.slane %v2944_v63, %v7902_v36  ;;  %v2959_v3 = vrot.slane %v5719_v0, %v7902_v36  ;;  %5901 = vmatprep.subr.bf16.mxu1 %v7053_v4 }
 0xa2e   : > { %v2961_v25 = vcombine.high %v2935_v2, %v2943_v20  ;;  %v2977_v16 = vcombine.high %v2951_v22, %v2959_v3  ;;  %v2960_v21 = vcombine.low %v2935_v2, %v2943_v20  ;;  %v2976_v5 = vcombine.low %v2951_v22, %v2959_v3 }
 0xa30   : > { %v2975_v28 = vrot.slane %v2961_v25, %v7909_v44  ;;  %v2991_v6 = vrot.slane %v2977_v16, %v7909_v44  ;;  %v2968_v8 = vrot.slane %v2960_v21, %v7909_v44  ;;  %v2984_v57 = vrot.slane %v2976_v5, %v7909_v44 }
 0xa32   : > { %v2994_v9 = vcombine.low %v2975_v28, %v2991_v6  ;;  %v2993_v10 = vcombine.high %v2968_v8, %v2984_v57  ;;  %v2992_v58 = vcombine.low %v2968_v8, %v2984_v57  ;;  %v2995_v11 = vcombine.high %v2975_v28, %v2991_v6 }
 0xa34   : > { %3001 = vrot.lane.b32.xlu1 %v2994_v9, %s7063_s20  ;;  %2997 = vrot.lane.b32.xlu0 %v2993_v10, %s7064_s5 }
 0xa38   : > { %3005 = vrot.lane.b32.xlu1 %v2995_v11, %s7065_s17 }
 0xaa6   : > { %v3002_v12 = vpop.permute.xlu1 %3001  ;;  %v2998_v13 = vpop.permute.xlu0 %2997 }
 0xaa7   : > { %v3008_v14 = vsel %vm1886_vm3, %v2992_v58, %v2998_v13 }
 0xaa8   : > { %v3010_v17 = vsel %vm3009_vm8, %v3008_v14, %v3002_v12 }
 0xaaa   : > { %v3006_v15 = vpop.permute.xlu1 %3005 }
 0xaab   : > { %v3012_v18 = vsel %vm3011_vm9, %v3010_v17, %v3006_v15 }
 0xaac   : > { %v3017_v23 = vpack.c.bf16 %v3012_v18, %v3012_v18  ;;  %v5724_v18 = vld [vmem:[#allocation17] ss:$0 sm:$0xff] }
 0xaae   : > { %5882 = vmatmul.mubr.msk.bf16.vlgmr.msra.gmra.mrb[20].mxu0 %vm1061_vm0, %v3017_v23 }
 0xaaf   : > { %5894 = vmatpush3.bf16.msra.mxu0 %v6238_v19  ;;  %5897 = vmatprep.mubr.msk.bf16.mxu0 %vm7054_vm1, %v7053_v4 }
 0xab0   : > { %5895 = vmatprep.subr.bf16.mxu0 %v7053_v4 }
 0xab3   : > { %5896 = vmatpush3.bf16.msra.mxu0 %v6239_v24 }
 0xab4   : > { %5907 = vmatprep.subr.bf16.mxu0 %v7053_v4 }
 0xab6   : > { %5898 = vmatmul.mubr.msk.bf16.vlgmr.msra.gmra.mrb[24].mxu0 %vm1061_vm0, %v3168_v27 }
 0xab7   : > { %5909 = vmatprep.mubr.msk.bf16.mxu0 %vm7054_vm1, %v7053_v4 }
 0xb81   : > { %v3074_v31 = vpop.f32.mrb[20].mxu0 }
 0xb82   : > { %v3075_v32 = vadd.f32 %v5720_v30, %v3074_v31  ;;  %v5883_v33 = vpop.f32.mrb[21].mxu0 }
 0xb83   : > { %v3077_v34 = vpop.f32.mrb[22].mxu0 }
 0xb84   : > { %v8123_v37 = vadd.f32 %v6288_v35, %v3075_v32  ;;  %v5884_v38 = vpop.f32.mrb[23].mxu0 }
 0xb86   : > { %v3082_v40 = vmul.f32 %v8123_v37, %v8123_v37 }
 0xb88   : > { %v3083_v42 = vsel %vm1061_vm0, %v3082_v40, 0.0 }
 0xb89   : > { %3084 = vadd.xlane.f32.xlu1 %v3083_v42  ;;  %v3225_v43 = vpop.f32.mrb[24].mxu0 }
 0xb8a   : > { %v8128_v45 = vadd.f32 %v5729_v41, %v3225_v43  ;;  %v5899_v46 = vpop.f32.mrb[25].mxu0 }
 0xb8b   : > { %v3228_v47 = vpop.f32.mrb[26].mxu0 }
 0xb8c   : > { %3318 = vrot.lane.b32.xlu0 %v8128_v45, %s7056_s4  ;;  %v5900_v48 = vpop.f32.mrb[27].mxu0 }
 0xb90   : > { %3321 = vrot.lane.b32.xlu0 %v8128_v45, %s7055_s24 }
 0xb94   : > { %3324 = vrot.lane.b32.xlu0 %v8128_v45, %s7057_s7 }
 0xbfe   : > { %v8138_v51 = vpop.permute.xlu0 %3318 }
 0xc02   : > { %v8140_v52 = vpop.permute.xlu0 %3321 }
 0xc03   : > { %v3327_v53 = vcombine.low %v8128_v45, %v8140_v52  ;;  %v3328_v59 = vcombine.high %v8128_v45, %v8140_v52 }
 0xc05   : > { %v3335_v60 = vrot.slane %v3327_v53, %v7902_v36  ;;  %v3342_v1 = vrot.slane %v3328_v59, %v7902_v36 }
 0xc06   : > { %v8144_v54 = vpop.permute.xlu0 %3324 }
 0xc07   : > { %v3343_v55 = vcombine.low %v8138_v51, %v8144_v54  ;;  %v3344_v56 = vcombine.high %v8138_v51, %v8144_v54 }
 0xc09   : > { %v3351_v61 = vrot.slane %v3343_v55, %v7902_v36  ;;  %v3358_v62 = vrot.slane %v3344_v56, %v7902_v36 }
 0xc0b   : > { %v3359_v63 = vcombine.low %v3335_v60, %v3351_v61  ;;  %v3360_v0 = vcombine.high %v3335_v60, %v3351_v61  ;;  %v3375_v25 = vcombine.low %v3342_v1, %v3358_v62  ;;  %v3376_v28 = vcombine.high %v3342_v1, %v3358_v62 }
 0xc0d   : > { %v3367_v2 = vrot.slane %v3359_v63, %v7909_v44  ;;  %v3374_v3 = vrot.slane %v3360_v0, %v7909_v44  ;;  %v3383_v5 = vrot.slane %v3375_v25, %v7909_v44  ;;  %v3390_v9 = vrot.slane %v3376_v28, %v7909_v44 }
 0xc0f   : > { %v3395_v20 = vpack.c.bf16 %v3367_v2, %v3367_v2  ;;  %v3391_v22 = vcombine.high %v3367_v2, %v7053_v4  ;;  %v3397_v21 = vpack.c.bf16 %v3374_v3, %v3374_v3  ;;  %v3399_v57 = vpack.c.bf16 %v3383_v5, %v3383_v5 }
 0xc10   : > { %v3401_v58 = vpack.c.bf16 %v3390_v9, %v3390_v9  ;;  %v3392_v11 = vcombine.high %v3374_v3, %v7053_v4  ;;  %v3393_v13 = vcombine.high %v3383_v5, %v7053_v4  ;;  %v3394_v15 = vcombine.high %v3390_v9, %v7053_v4 }
 0xc11   : > { %3553 = vxpose.xlu0.c.b16.start.end [1/1] (short) (narrow) %v3395_v20, 16  ;;  %v3396_v16 = vpack.c.bf16 %v3391_v22, %v3391_v22 }
 0xc12   : > { %v3398_v12 = vpack.c.bf16 %v3392_v11, %v3392_v11  ;;  %v3400_v14 = vpack.c.bf16 %v3393_v13, %v3393_v13  ;;  %v3402_v23 = vpack.c.bf16 %v3394_v15, %v3394_v15  ;;  %v5725_v13 = vld [vmem:[#allocation20] ss:$0 sm:$0xff] }
 0xc13   : > { %3569 = vxpose.xlu1.c.b16.start.end [1/1] (short) (narrow) %v3396_v16, 16 }
 0xc15   : > { %3585 = vxpose.xlu0.c.b16.start.end [1/1] (short) (narrow) %v3397_v21, 16 }
 0xc16   : > { %v3085_v6 = vpop.xlane.xlu1 %3084 }
 0xc17   : > { %v3086_v8 = vmul.f32 0.03125, %v3085_v6 }
 0xc19   : > { %v3087_v10 = vadd.f32 1e-06, %v3086_v8  ;;  %3617 = vxpose.xlu0.c.b16.start.end [1/1] (short) (narrow) %v3399_v57, 16 }
 0xc1b   : > { %6268 = vrsqrt.f32 %v3087_v10 }
 0xc1d   : > { %3649 = vxpose.xlu0.c.b16.start.end [1/1] (short) (narrow) %v3401_v58, 16 }
 0xc21   : > { %3601 = vxpose.xlu0.c.b16.start.end [1/1] (short) (narrow) %v3398_v12, 16 }
 0xc25   : > { %v6269_v17 = vpop.eup %6268  ;;  %3633 = vxpose.xlu0.c.b16.start.end [1/1] (short) (narrow) %v3400_v14, 16 }
 0xc26   : > { %v3089_v19 = vmul.f32 %v6269_v17, %v8123_v37 }
 0xc28   : > { %v3096_v24 = vmul.f32 %v5724_v18, %v3089_v19 }
 0xc29   : > { %3665 = vxpose.xlu0.c.b16.start.end [1/1] (short) (narrow) %v3402_v23, 16 }
 0xc2a   : > { %v3101_v26 = vpack.c.bf16 %v3096_v24, %v3096_v24 }
 0xc2c   : > { %5890 = vmatmul.mubr.msk.bf16.vlgmr.msra.gmra.mrb[16].mxu1 %vm1061_vm0, %v3101_v26 }
 0xc2d   : > { %5903 = vmatprep.mubr.msk.bf16.mxu1 %vm7054_vm1, %v7053_v4 }
 0xc77   : > { %v3561_v27 = vpop.trf.xlu0 }
 0xc79   : > { %v3577_v38 = vpop.trf.xlu1 }
 0xc7b   : > { %v3593_v30 = vpop.trf.xlu0 }
 0xc7f   : > { %v3625_v31 = vpop.trf.xlu0 }
 0xc80   : > { %v3681_v34 = vcombine.low %v3561_v27, %v3625_v31 }
 0xc82   : > { %v3688_v41 = vrot.slane %v3681_v34, %v7902_v36 }
 0xc83   : > { %v3657_v32 = vpop.trf.xlu0 }
 0xc84   : > { %v3689_v35 = vcombine.low %v3593_v30, %v3657_v32 }
 0xc86   : > { %v3696_v42 = vrot.slane %v3689_v35, %v7902_v36 }
 0xc87   : > { %v3609_v33 = vpop.trf.xlu0 }
 0xc88   : > { %v3698_v46 = vcombine.high %v3688_v41, %v3696_v42  ;;  %v3697_v48 = vcombine.low %v3688_v41, %v3696_v42 }
 0xc8a   : > { %v3712_v55 = vrot.slane %v3698_v46, %v7909_v44  ;;  %v3705_v60 = vrot.slane %v3697_v48, %v7909_v44 }
 0xc8b   : > { %v3641_v40 = vpop.trf.xlu0 }
 0xc8c   : > { %v3715_v43 = vcombine.low %v3577_v38, %v3641_v40  ;;  %v3714_v61 = vcombine.high %v3712_v55, %v7061_v39  ;;  %v3713_v63 = vcombine.high %v3705_v60, %v7061_v39  ;;  %v3753_v1 = vshrl.u32 %v3705_v60, 16 }
 0xc8d   : > { %v3769_v5 = vshrl.u32 %v3712_v55, 16 }
 0xc8e   : > { %v3722_v50 = vrot.slane %v3715_v43, %v7902_v36  ;;  %v3777_v16 = vshrl.u32 %v3714_v61, 16  ;;  %v3761_v58 = vshrl.u32 %v3713_v63, 16 }
 0xc8f   : > { %v3673_v47 = vpop.trf.xlu0 }
 0xc90   : > { %v3723_v49 = vcombine.low %v3609_v33, %v3673_v47 }
 0xc92   : > { %v3730_v53 = vrot.slane %v3723_v49, %v7902_v36 }
 0xc94   : > { %v3731_v56 = vcombine.low %v3722_v50, %v3730_v53  ;;  %v3732_v59 = vcombine.high %v3722_v50, %v3730_v53 }
 0xc96   : > { %v3739_v62 = vrot.slane %v3731_v56, %v7909_v44  ;;  %v3746_v0 = vrot.slane %v3732_v59, %v7909_v44 }
 0xc98   : > { %v3751_v2 = vpack.i.b16 %v3739_v62, %v3705_v60  ;;  %v3747_v20 = vcombine.high %v3739_v62, %v7061_v39  ;;  %v3767_v22 = vpack.i.b16 %v3746_v0, %v3712_v55  ;;  %v3754_v3 = vshrl.u32 %v3739_v62, 16 }
 0xc99   : > { %v3748_v25 = vcombine.high %v3746_v0, %v7061_v39  ;;  %v3770_v28 = vshrl.u32 %v3746_v0, 16 }
 0xc9a   : > { %3781 = vxpose.xlu0.c.b16.start.end [1/1] (short) (narrow) %v3751_v2, 16  ;;  %v3759_v21 = vpack.i.b16 %v3747_v20, %v3713_v63  ;;  %3845 = vxpose.xlu1.c.b16.start.end [1/1] (short) (narrow) %v3767_v22, 16  ;;  %v3755_v6 = vpack.i.b16 %v3754_v3, %v3753_v1  ;;  %v3762_v11 = vshrl.u32 %v3747_v20, 16 }
 0xc9b   : > { %v3778_v8 = vshrl.u32 %v3748_v25, 16  ;;  %v3775_v57 = vpack.i.b16 %v3748_v25, %v3714_v61  ;;  %v3771_v10 = vpack.i.b16 %v3770_v28, %v3769_v5 }
 0xc9c   : > { %v3763_v12 = vpack.i.b16 %v3762_v11, %v3761_v58 }
 0xc9d   : > { %v3779_v9 = vpack.i.b16 %v3778_v8, %v3777_v16 }
 0xc9e   : > { %3813 = vxpose.xlu0.c.b16.start.end [1/1] (short) (narrow) %v3759_v21, 16  ;;  %3797 = vxpose.xlu1.c.b16.start.end [1/1] (short) (narrow) %v3755_v6, 16 }
 0xca2   : > { %3861 = vxpose.xlu0.c.b16.start.end [1/1] (short) (narrow) %v3771_v10, 16 }
 0xca6   : > { %3829 = vxpose.xlu0.c.b16.start.end [1/1] (short) (narrow) %v3763_v12, 16 }
 0xcff   : > { %v3158_v14 = vpop.f32.mrb[16].mxu1 }
 0xd00   : > { %v3159_v15 = vadd.f32 %v5725_v13, %v3158_v14  ;;  %v5891_v17 = vpop.f32.mrb[17].mxu1  ;;  %v3789_v23 = vpop.trf.xlu0 }
 0xd01   : > { %v3161_v18 = vpop.f32.mrb[18].mxu1  ;;  %v3853_v26 = vpop.trf.xlu1 }
 0xd02   : > { %v5892_v19 = vpop.f32.mrb[19].mxu1  ;;  %3238 = vrot.lane.b32.xlu1 %v3159_v15, %s7057_s7  ;;  %3232 = vrot.lane.b32.xlu0 %v3159_v15, %s7056_s4  ;;  %v3909_v3 = vcombine.low %v3789_v23, %v3853_v26 }
 0xd04   : > { %v3821_v24 = vpop.trf.xlu0  ;;  %v3916_v10 = vrot.slane %v3909_v3, %v7902_v36 }
 0xd05   : > { %v3805_v30 = vpop.trf.xlu1 }
 0xd06   : > { %3235 = vrot.lane.b32.xlu0 %v3159_v15, %s7055_s24 }
 0xd08   : > { %v3869_v27 = vpop.trf.xlu0 }
 0xd09   : > { %v3934_v2 = vcombine.low %v3805_v30, %v3869_v27 }
 0xd0b   : > { %v3941_v8 = vrot.slane %v3934_v2, %v7902_v36 }
 0xd0c   : > { %v3837_v31 = vpop.trf.xlu0 }
 0xd24   : > { %3893 = vxpose.xlu0.c.b16.start.end [1/1] (short) (narrow) %v3779_v9, 16 }
 0xd25   : > { %3877 = vxpose.xlu1.c.b16.start.end [1/1] (short) (narrow) %v3775_v57, 16 }
 0xd29   : > { %3403 = vrot.lane.b32.xlu1 %v8128_v45, %s7058_s29 }
 0xd2d   : > { %3407 = vrot.lane.b32.xlu1 %v8140_v52, %s7058_s29  ;;  %3405 = vrot.lane.b32.xlu0 %v8138_v51, %s7058_s29 }
 0xd74   : > { %v3239_v32 = vpop.permute.xlu1 %3238  ;;  %v3233_v33 = vpop.permute.xlu0 %3232 }
 0xd75   : > { %v3257_v34 = vcombine.low %v3233_v33, %v3239_v32  ;;  %v3258_v35 = vcombine.high %v3233_v33, %v3239_v32 }
 0xd77   : > { %v3265_v45 = vrot.slane %v3257_v34, %v7902_v36  ;;  %v3272_v52 = vrot.slane %v3258_v35, %v7902_v36 }
 0xd78   : > { %v3236_v38 = vpop.permute.xlu0 %3235 }
 0xd79   : > { %v3241_v40 = vcombine.low %v3159_v15, %v3236_v38  ;;  %v3242_v41 = vcombine.high %v3159_v15, %v3236_v38 }
 0xd7b   : > { %v3249_v42 = vrot.slane %v3241_v40, %v7902_v36  ;;  %v3256_v51 = vrot.slane %v3242_v41, %v7902_v36 }
 0xd7d   : > { %v3273_v43 = vcombine.low %v3249_v42, %v3265_v45  ;;  %v3274_v46 = vcombine.high %v3249_v42, %v3265_v45  ;;  %v3289_v47 = vcombine.low %v3256_v51, %v3272_v52  ;;  %v3290_v48 = vcombine.high %v3256_v51, %v3272_v52 }
 0xd7f   : > { %v3281_v49 = vrot.slane %v3273_v43, %v7909_v44  ;;  %v3288_v50 = vrot.slane %v3274_v46, %v7909_v44  ;;  %v3297_v53 = vrot.slane %v3289_v47, %v7909_v44  ;;  %v3304_v55 = vrot.slane %v3290_v48, %v7909_v44 }
 0xd81   : > { %v3305_v56 = vcombine.high %v3281_v49, %v7053_v4  ;;  %v3306_v59 = vcombine.high %v3288_v50, %v7053_v4  ;;  %v3307_v60 = vcombine.high %v3297_v53, %v7053_v4  ;;  %v3308_v61 = vcombine.high %v3304_v55, %v7053_v4 }
 0xd82   : > { %v5733_v0 = vpack.c.bf16 %v3297_v53, %v3281_v49  ;;  %v5734_v1 = vpack.c.bf16 %v3304_v55, %v3288_v50  ;;  %v1057_v53 = vld [vmem:[%s894_s10] sm:$0x1]  ;;  %s6917_s10 = sshll.u32 %s7066_s9, 4  ;;  %s6918_s10 = int_to_ptr.vmem [resolvable:$false] %s6917_s10 }
 0xd83   : > { %v5735_v62 = vpack.c.bf16 %v3307_v60, %v3305_v56  ;;  %v5736_v63 = vpack.c.bf16 %v3308_v61, %v3306_v59  ;;  %vm1058_vm10 = vcmp.ne.s32.totalorder %v1057_v53, 0  ;;  %s6919_s24 = scalar_lea.vmem %s6918_s10, 256  ;;  %p6920_p5 = scmp.lt.s32.totalorder %s8368_s11, %s6918_s10 }
 0xd84   : > { %v3498_v5 = vrot.slane %v5733_v0, %v7902_v36  ;;  %v3506_v28 = vrot.slane %v5734_v1, %v7902_v36  ;;  %v4159_v55 = vsel %vm1058_vm10, 1, %v7061_v39  ;;  %p6921_p7 = scmp.lt.s32.totalorder %s6919_s24, %s6913_s12 }
 0xd85   : > { %v3523_v20 = vrot.slane %v5735_v62, %v7902_v36  ;;  %v3531_v22 = vrot.slane %v5736_v63, %v7902_v36  ;;  %v4163_v56 = vrot.slane %v4159_v55, %v1053_v7 }
 0xd86   : > { %v3507_v12 = vcombine.low %v3498_v5, %v3506_v28  ;;  %p6922_p3 = por %p6921_p7, %p6920_p5 }
 0xd87   : > { %v3532_v57 = vcombine.low %v3523_v20, %v3531_v22  ;;  %vm4164_vm11 = vcmp.eq.s32.totalorder %v4163_v56, 1 }
 0xd88   : > { %v3514_v23 = vrot.slane %v3507_v12, %v7909_v44  ;;  %p6923_p10 = pnand %p6922_p3, %p6916_p11 }
 0xd89   : > { %v3539_v15 = vrot.slane %v3532_v57, %v7909_v44 }
 0xd8a   : > { %v3901_v25 = vpop.trf.xlu0  ;;  %v3544_v41 = vshrl.u32 %v3514_v23, 16  ;;  %v3515_v46 = vcombine.high %v3514_v23, %v7061_v39 }
 0xd8b   : > { %v3942_v16 = vcombine.low %v3837_v31, %v3901_v25  ;;  %v3885_v21 = vpop.trf.xlu1  ;;  %v3545_v30 = vshrl.u32 %v3539_v15, 16  ;;  %v3543_v40 = vpack.i.b16 %v3539_v15, %v3514_v23  ;;  %v3540_v51 = vcombine.high %v3539_v15, %v7061_v39 }
 0xd8c   : > { %v3917_v6 = vcombine.low %v3821_v24, %v3885_v21  ;;  %v3550_v49 = vshrl.u32 %v3515_v46, 16 }
 0xd8d   : > { %v3949_v9 = vrot.slane %v3942_v16, %v7902_v36  ;;  %v3546_v42 = vpack.i.b16 %v3545_v30, %v3544_v41  ;;  %v3551_v47 = vshrl.u32 %v3540_v51, 16  ;;  %v3549_v48 = vpack.i.b16 %v3540_v51, %v3515_v46 }
 0xd8e   : > { %v3924_v58 = vrot.slane %v3917_v6, %v7902_v36 }
 0xd8f   : > { %v3950_v11 = vcombine.low %v3941_v8, %v3949_v9  ;;  %v3552_v50 = vpack.i.b16 %v3551_v47, %v3550_v49 }
 0xd90   : > { %v3925_v13 = vcombine.low %v3916_v10, %v3924_v58 }
 0xd91   : > { %v3957_v14 = vrot.slane %v3950_v11, %v7909_v44 }
 0xd92   : > { %v3932_v17 = vrot.slane %v3925_v13, %v7909_v44 }
 0xd93   : > { %v3963_v18 = vshrl.u32 %v3957_v14, 16  ;;  %v3958_v19 = vcombine.high %v3957_v14, %v7061_v39 }
 0xd94   : > { %v3961_v24 = vpack.i.b16 %v3957_v14, %v3932_v17  ;;  %v3962_v26 = vshrl.u32 %v3932_v17, 16  ;;  %v3933_v27 = vcombine.high %v3932_v17, %v7061_v39 }
 0xd95   : > { %v3969_v31 = vshrl.u32 %v3958_v19, 16 }
 0xd96   : > { %v3975_v32 = vsel %vm1890_vm2, %v3961_v24, 0  ;;  %v3964_v33 = vpack.i.b16 %v3963_v18, %v3962_v26  ;;  %v3967_v34 = vpack.i.b16 %v3958_v19, %v3933_v27  ;;  %v3968_v35 = vshrl.u32 %v3933_v27, 16 }
 0xd97   : > { %5902 = vmatpush3.bf16.msra.mxu1 %v3975_v32 }
 0xd98   : > { %v4021_v38 = vsel %vm1890_vm2, %v3964_v33, 0  ;;  %5913 = vmatprep.subr.bf16.mxu1 %v7053_v4  ;;  %v3970_v45 = vpack.i.b16 %v3969_v31, %v3968_v35  ;;  %v4067_v52 = vsel %vm1890_vm2, %v3967_v34, 0 }
 0xd99   : > { %5908 = vmatpush3.bf16.msra.mxu0 %v4021_v38 }
 0xd9a   : > { %5904 = vmatmul.mubr.msk.bf16.vlgmr.msra.gmra.mrb[20].mxu1 %vm1886_vm3, %v3543_v40  ;;  %5919 = vmatprep.subr.bf16.mxu0 %v7053_v4  ;;  %v4113_v43 = vsel %vm1890_vm2, %v3970_v45, 0 }
 0xd9b   : > { %5914 = vmatpush3.bf16.msra.mxu1 %v4067_v52  ;;  %5915 = vmatprep.mubr.msk.bf16.mxu1 %vm7054_vm1, %v7053_v4  ;;  %v3404_v13 = vpop.permute.xlu1 %3403 }
 0xd9c   : > { %5910 = vmatmul.mubr.msk.bf16.vlgmr.msra.gmra.mrb[28].mxu0 %vm1886_vm3, %v3546_v42  ;;  %5925 = vmatprep.subr.bf16.mxu1 %v7053_v4 }
 0xd9d   : > { %5920 = vmatpush3.bf16.msra.mxu0 %v4113_v43  ;;  %5921 = vmatprep.mubr.msk.bf16.mxu0 %vm7054_vm1, %v7053_v4 }
 0xd9e   : > { %5931 = vmatprep.subr.bf16.mxu0 %v7053_v4 }
 0xd9f   : > { %v3408_v14 = vpop.permute.xlu1 %3407  ;;  %v3406_v18 = vpop.permute.xlu0 %3405 }
 0xda0   : > { %v3415_v17 = vcombine.low %v3404_v13, %v3408_v14  ;;  %v3416_v23 = vcombine.high %v3404_v13, %v3408_v14 }
 0xda2   : > { %5916 = vmatmul.mubr.msk.bf16.vlgmr.msra.gmra.mrb[24].mxu1 %vm1886_vm3, %v3549_v48  ;;  %v3430_v31 = vrot.slane %v3416_v23, %v7902_v36 }
 0xda3   : > { %5927 = vmatprep.mubr.msk.bf16.mxu1 %vm7054_vm1, %v7053_v4 }
 0xda4   : > { %5922 = vmatmul.mubr.msk.bf16.vlgmr.msra.gmra.mrb[32].mxu0 %vm1886_vm3, %v3552_v50 }
 0xda5   : > { %5933 = vmatprep.mubr.msk.bf16.mxu0 %vm7054_vm1, %v7053_v4 }
 0xe6d   : > { %v4011_v59 = vpop.f32.mrb[20].mxu1 }
 0xe6e   : > { %v4155_v60 = vmul.f32 0.35355338, %v4011_v59  ;;  %v5905_v61 = vpop.f32.mrb[21].mxu1 }
 0xe6f   : > { %v4014_v62 = vpop.f32.mrb[22].mxu1  ;;  %v4057_v63 = vpop.f32.mrb[28].mxu0 }
 0xe70   : > { %v4156_v0 = vmul.f32 0.35355338, %v4057_v63  ;;  %v5906_v1 = vpop.f32.mrb[23].mxu1  ;;  %v5911_v2 = vpop.f32.mrb[29].mxu0  ;;  %v8243_v20 = vsel %vm4164_vm11, %v4155_v60, -1e+09 }
 0xe71   : > { %v4060_v22 = vpop.f32.mrb[30].mxu0  ;;  %v4169_v3 = vsel %vm1886_vm3, %v8243_v20, -inf }
 0xe72   : > { %4170 = vmax.xlane.f32.xlu1 %v4169_v3  ;;  %v5912_v25 = vpop.f32.mrb[31].mxu0  ;;  %v8248_v29 = vsel %vm4164_vm11, %v4156_v0, -1e+09 }
 0xe73   : > { %v4172_v43 = vsel %vm1886_vm3, %v8248_v29, -inf }
 0xe75   : > { %v4103_v7 = vpop.f32.mrb[24].mxu1 }
 0xe76   : > { %v5917_v16 = vpop.f32.mrb[25].mxu1  ;;  %v4157_v58 = vmul.f32 0.35355338, %v4103_v7 }
 0xe77   : > { %v4106_v21 = vpop.f32.mrb[26].mxu1  ;;  %v4149_v5 = vpop.f32.mrb[32].mxu0 }
 0xe78   : > { %v4158_v28 = vmul.f32 0.35355338, %v4149_v5  ;;  %v5918_v6 = vpop.f32.mrb[27].mxu1  ;;  %v5923_v8 = vpop.f32.mrb[33].mxu0  ;;  %v8256_v11 = vsel %vm4164_vm11, %v4157_v58, -1e+09 }
 0xe79   : > { %v4152_v57 = vpop.f32.mrb[34].mxu0  ;;  %v4175_v12 = vsel %vm1886_vm3, %v8256_v11, -inf }
 0xe7a   : > { %v8251_v9 = vsel %vm4164_vm11, %v4158_v28, -1e+09  ;;  %v5924_v10 = vpop.f32.mrb[35].mxu0 }
 0xe7b   : > { %v4178_v49 = vsel %vm1886_vm3, %v8251_v9, -inf }
 0xe83   : > { %3409 = vrot.lane.b32.xlu1 %v8144_v54, %s7058_s29  ;;  %v3423_v54 = vrot.slane %v3415_v17, %v7902_v36 }
 0xea7   : > { %4176 = vmax.xlane.f32.xlu1 %v4175_v12 }
 0xeff   : > { %v8260_v15 = vpop.xlane.xlu1 %4170 }
 0xf03   : > { %v3410_v19 = vpop.permute.xlu1 %3409 }
 0xf04   : > { %v3431_v24 = vcombine.low %v3406_v18, %v3410_v19  ;;  %v3432_v26 = vcombine.high %v3406_v18, %v3410_v19 }
 0xf06   : > { %v3439_v27 = vrot.slane %v3431_v24, %v7902_v36  ;;  %v3446_v30 = vrot.slane %v3432_v26, %v7902_v36 }
 0xf08   : > { %v3447_v32 = vcombine.low %v3423_v54, %v3439_v27  ;;  %v3463_v34 = vcombine.low %v3430_v31, %v3446_v30  ;;  %v3464_v45 = vcombine.high %v3430_v31, %v3446_v30  ;;  %v3448_v46 = vcombine.high %v3423_v54, %v3439_v27 }
 0xf09   : > { %v4181_v30 = vsub.f32 %v8243_v20, %v8260_v15 }
 0xf0a   : > { %v3455_v33 = vrot.slane %v3447_v32, %v7909_v44  ;;  %v3471_v41 = vrot.slane %v3463_v34, %v7909_v44  ;;  %v3478_v42 = vrot.slane %v3464_v45, %v7909_v44  ;;  %v3462_v47 = vrot.slane %v3448_v46, %v7909_v44 }
 0xf0c   : > { %v3483_v35 = vpack.c.bf16 %v3455_v33, %v3455_v33  ;;  %v3479_v38 = vcombine.high %v3455_v33, %v7053_v4  ;;  %v3487_v52 = vpack.c.bf16 %v3471_v41, %v3471_v41  ;;  %v3489_v51 = vpack.c.bf16 %v3478_v42, %v3478_v42 }
 0xf0d   : > { %v3485_v48 = vpack.c.bf16 %v3462_v47, %v3462_v47  ;;  %v3480_v50 = vcombine.high %v3462_v47, %v7053_v4  ;;  %v3481_v55 = vcombine.high %v3471_v41, %v7053_v4  ;;  %v3482_v59 = vcombine.high %v3478_v42, %v7053_v4 }
 0xf0e   : > { %4217 = vxpose.xlu0.c.b16.start.end [1/1] (short) (narrow) %v3483_v35, 16  ;;  %v3484_v40 = vpack.c.bf16 %v3479_v38, %v3479_v38  ;;  %v4185_v41 = vmul.f32 1.442695, %v4181_v30 }
 0xf0f   : > { %v3486_v53 = vpack.c.bf16 %v3480_v50, %v3480_v50  ;;  %v3488_v56 = vpack.c.bf16 %v3481_v55, %v3481_v55  ;;  %v3490_v60 = vpack.c.bf16 %v3482_v59, %v3482_v59 }
 0xf10   : > { %4233 = vxpose.xlu1.c.b16.start.end [1/1] (short) (narrow) %v3484_v40, 16  ;;  %6270 = vpow2.f32 %v4185_v41 }
 0xf14   : > { %4281 = vxpose.xlu1.c.b16.start.end [1/1] (short) (narrow) %v3487_v52, 16 }
 0xf18   : > { %4313 = vxpose.xlu1.c.b16.start.end [1/1] (short) (narrow) %v3489_v51, 16 }
 0xf1b   : > { %4173 = vmax.xlane.f32.xlu0 %v4172_v43 }
 0xf34   : > { %v4177_v61 = vpop.xlane.xlu1 %4176 }
 0xf35   : > { %v4183_v45 = vsub.f32 %v8256_v11, %v4177_v61 }
 0xf37   : > { %v4189_v46 = vmul.f32 1.442695, %v4183_v45 }
 0xf48   : > { %4249 = vxpose.xlu0.c.b16.start.end [1/1] (short) (narrow) %v3485_v48, 16  ;;  %v6271_v48 = vpop.eup %6270 }
 0xf55   : > { %4179 = vmax.xlane.f32.xlu0 %v4178_v49  ;;  %v4193_v49 = vsel %vm1886_vm3, %v6271_v48, 0.0 }
 0xf74   : > { %v4225_v62 = vpop.trf.xlu0 }
 0xf76   : > { %v4241_v63 = vpop.trf.xlu1 }
 0xf7a   : > { %v4289_v1 = vpop.trf.xlu1 }
 0xf7b   : > { %v4345_v25 = vcombine.low %v4225_v62, %v4289_v1 }
 0xf7d   : > { %v4352_v21 = vrot.slane %v4345_v25, %v7902_v36 }
 0xf7e   : > { %v4321_v3 = vpop.trf.xlu1 }
 0xf82   : > { %4265 = vxpose.xlu0.c.b16.start.end [1/1] (short) (narrow) %v3486_v53, 16 }
 0xf86   : > { %4297 = vxpose.xlu0.c.b16.start.end [1/1] (short) (narrow) %v3488_v56, 16 }
 0xf8a   : > { %4329 = vxpose.xlu0.c.b16.start.end [1/1] (short) (narrow) %v3490_v60, 16 }
 0xfa8   : > { %v4174_v0 = vpop.xlane.xlu0 %4173 }
 0xfa9   : > { %v4182_v34 = vsub.f32 %v8248_v29, %v4174_v0 }
 0xfab   : > { %v4187_v51 = vmul.f32 1.442695, %v4182_v34 }
 0xfad   : > { %6272 = vpow2.f32 %v4187_v51 }
 0xfae   : > { %v4257_v2 = vpop.trf.xlu0  ;;  %6274 = vpow2.f32 %v4189_v46 }
 0xfaf   : > { %v4353_v7 = vcombine.low %v4257_v2, %v4321_v3 }
 0xfb1   : > { %v4360_v5 = vrot.slane %v4353_v7, %v7902_v36 }
 0xfb3   : > { %v4361_v8 = vcombine.low %v4352_v21, %v4360_v5  ;;  %v4362_v19 = vcombine.high %v4352_v21, %v4360_v5 }
 0xfb5   : > { %v4369_v13 = vrot.slane %v4361_v8, %v7909_v44  ;;  %v4376_v40 = vrot.slane %v4362_v19, %v7909_v44 }
 0xfb7   : > { %v4417_v23 = vshrl.u32 %v4369_v13, 16  ;;  %v4377_v54 = vcombine.high %v4369_v13, %v7061_v39  ;;  %v4433_v43 = vshrl.u32 %v4376_v40, 16  ;;  %v6273_v11 = vpop.eup %6272  ;;  %v4378_v60 = vcombine.high %v4376_v40, %v7061_v39 }
 0xfb8   : > { %v6275_v50 = vpop.eup %6274 }
 0xfb9   : > { %v4425_v38 = vshrl.u32 %v4377_v54, 16  ;;  %v4199_v55 = vsel %vm1886_vm3, %v6275_v50, 0.0 }
 0xfe2   : > { %v4180_v22 = vpop.xlane.xlu0 %4179 }
 0xfe3   : > { %v4184_v20 = vsub.f32 %v8251_v9, %v4180_v22  ;;  %v4196_v9 = vsel %vm1886_vm3, %v6273_v11, 0.0 }
 0xfe5   : > { %v4191_v47 = vmul.f32 1.442695, %v4184_v20 }
 0xfe7   : > { %6276 = vpow2.f32 %v4191_v47 }
 0xfe8   : > { %v4273_v16 = vpop.trf.xlu0 }
 0xfec   : > { %v4305_v28 = vpop.trf.xlu0 }
 0xfed   : > { %v4379_v6 = vcombine.low %v4241_v63, %v4305_v28  ;;  %v4441_v63 = vshrl.u32 %v4378_v60, 16 }
 0xfef   : > { %v4386_v58 = vrot.slane %v4379_v6, %v7902_v36 }
 0xff0   : > { %v4337_v57 = vpop.trf.xlu0 }
 0xff1   : > { %v4387_v10 = vcombine.low %v4273_v16, %v4337_v57  ;;  %v6277_v53 = vpop.eup %6276 }
 0xff2   : > { %v4202_v56 = vsel %vm1886_vm3, %v6277_v53, 0.0 }
 0xff3   : > { %v4394_v12 = vrot.slane %v4387_v10, %v7902_v36 }
 0xff5   : > { %v4395_v14 = vcombine.low %v4386_v58, %v4394_v12  ;;  %v4396_v17 = vcombine.high %v4386_v58, %v4394_v12 }
 0xff7   : > { %v4403_v18 = vrot.slane %v4395_v14, %v7909_v44  ;;  %v4410_v33 = vrot.slane %v4396_v17, %v7909_v44 }
 0xff9   : > { %v4415_v24 = vpack.i.b16 %v4403_v18, %v4369_v13  ;;  %v4418_v26 = vshrl.u32 %v4403_v18, 16  ;;  %v4411_v27 = vcombine.high %v4403_v18, %v7061_v39  ;;  %v4434_v42 = vshrl.u32 %v4410_v33, 16 }
 0xffa   : > { %v4431_v15 = vpack.i.b16 %v4410_v33, %v4376_v40  ;;  %v4412_v59 = vcombine.high %v4410_v33, %v7061_v39 }
 0xffb   : > { %4445 = vxpose.xlu1.c.b16.start.end [1/1] (short) (narrow) %v4415_v24, 16  ;;  %v4419_v31 = vpack.i.b16 %v4418_v26, %v4417_v23  ;;  %v4426_v32 = vshrl.u32 %v4411_v27, 16  ;;  %v4423_v35 = vpack.i.b16 %v4411_v27, %v4377_v54  ;;  %v4435_v29 = vpack.i.b16 %v4434_v42, %v4433_v43 }
 0xffc   : > { %v4442_v61 = vshrl.u32 %v4412_v59, 16  ;;  %v4439_v62 = vpack.i.b16 %v4412_v59, %v4378_v60 }
 0xffd   : > { %4461 = vxpose.xlu0.c.b16.start.end [1/1] (short) (narrow) %v4419_v31, 16  ;;  %v4427_v52 = vpack.i.b16 %v4426_v32, %v4425_v38 }
 0xffe   : > { %v4443_v0 = vpack.i.b16 %v4442_v61, %v4441_v63 }
 0xfff   : > { %4477 = vxpose.xlu1.c.b16.start.end [1/1] (short) (narrow) %v4423_v35, 16 }
0x1001   : > { %4493 = vxpose.xlu0.c.b16.start.end [1/1] (short) (narrow) %v4427_v52, 16 }
0x1003   : > { %4509 = vxpose.xlu1.c.b16.start.end [1/1] (short) (narrow) %v4431_v15, 16 }
0x1005   : > { %4525 = vxpose.xlu0.c.b16.start.end [1/1] (short) (narrow) %v4435_v29, 16 }
0x1010   : > { %4194 = vadd.xlane.f32.xlu1 %v4193_v49 }
0x1012   : > { %4197 = vadd.xlane.f32.xlu0 %v4196_v9 }
0x1014   : > { %4200 = vadd.xlane.f32.xlu1 %v4199_v55 }
0x1016   : > { %4203 = vadd.xlane.f32.xlu0 %v4202_v56 }
0x1041   : > { %4541 = vxpose.xlu1.c.b16.start.end [1/1] (short) (narrow) %v4439_v62, 16 }
0x1043   : > { %4557 = vxpose.xlu0.c.b16.start.end [1/1] (short) (narrow) %v4443_v0, 16 }
0x1061   : > { %v4453_v1 = vpop.trf.xlu1 }
0x1063   : > { %v4469_v2 = vpop.trf.xlu0 }
0x1065   : > { %v4485_v22 = vpop.trf.xlu1 }
0x1067   : > { %v4501_v3 = vpop.trf.xlu0 }
0x1069   : > { %v4517_v25 = vpop.trf.xlu1 }
0x106a   : > { %v4573_v6 = vcombine.low %v4453_v1, %v4517_v25 }
0x106b   : > { %v4533_v7 = vpop.trf.xlu0 }
0x106c   : > { %v4598_v10 = vcombine.low %v4469_v2, %v4533_v7  ;;  %v4580_v17 = vrot.slane %v4573_v6, %v7902_v36 }
0x106e   : > { %v4605_v54 = vrot.slane %v4598_v10, %v7902_v36 }
0x109d   : > { %v4195_v16 = vpop.xlane.xlu1 %4194 }
0x109e   : > { %6278 = vrcp.f32 %v4195_v16 }
0x109f   : > { %v4198_v21 = vpop.xlane.xlu0 %4197 }
0x10a0   : > { %6280 = vrcp.f32 %v4198_v21 }
0x10a1   : > { %v4201_v5 = vpop.xlane.xlu1 %4200 }
0x10a2   : > { %6282 = vrcp.f32 %v4201_v5 }
0x10a3   : > { %v4204_v28 = vpop.xlane.xlu0 %4203 }
0x10a4   : > { %6284 = vrcp.f32 %v4204_v28 }
0x10a7   : > { %v4549_v8 = vpop.trf.xlu1 }
0x10a8   : > { %v6279_v57 = vpop.eup %6278  ;;  %v4581_v58 = vcombine.low %v4485_v22, %v4549_v8 }
0x10a9   : > { %v4565_v12 = vpop.trf.xlu0  ;;  %v4209_v13 = vmul.f32 %v6279_v57, %v6271_v48 }
0x10aa   : > { %v6281_v14 = vpop.eup %6280  ;;  %v4588_v18 = vrot.slane %v4581_v58, %v7902_v36  ;;  %v4606_v19 = vcombine.low %v4501_v3, %v4565_v12 }
0x10ab   : > { %v4213_v23 = vpack.c.bf16 %v4209_v13, %v4209_v13  ;;  %v4210_v24 = vmul.f32 %v6281_v14, %v6273_v11 }
0x10ac   : > { %v6283_v26 = vpop.eup %6282  ;;  %v4589_v27 = vcombine.low %v4580_v17, %v4588_v18  ;;  %v4613_v30 = vrot.slane %v4606_v19, %v7902_v36 }
0x10ad   : > { %v4639_v31 = vsel %vm1886_vm3, %v4213_v23, 0  ;;  %v4214_v32 = vpack.c.bf16 %v4210_v24, %v4210_v24  ;;  %v4211_v33 = vmul.f32 %v6283_v26, %v6275_v50  ;;  %v6242_v24 = vld [vmem:[#allocation25] sm:$0xff]  }
0x10ae   : > { %v6285_v34 = vpop.eup %6284  ;;  %v4596_v35 = vrot.slane %v4589_v27, %v7909_v44  ;;  %v4614_v38 = vcombine.low %v4605_v54, %v4613_v30  ;;  %5926 = vmatpush3.bf16.xpose.msra.mxu1 %v4639_v31 }
0x10af   : > { %v4685_v40 = vsel %vm1886_vm3, %v4214_v32, 0  ;;  %5937 = vmatprep.subr.bf16.mxu1 %v7053_v4  ;;  %v4212_v41 = vmul.f32 %v6285_v34, %v6277_v53  ;;  %v4215_v52 = vpack.c.bf16 %v4211_v33, %v4211_v33 }
0x10b0   : > { %v4621_v45 = vrot.slane %v4614_v38, %v7909_v44  ;;  %5932 = vmatpush3.bf16.xpose.msra.mxu0 %v4685_v40  ;;  %v4626_v42 = vshrl.u32 %v4596_v35, 16  ;;  %v4597_v47 = vcombine.high %v4596_v35, %v7061_v39 }
0x10b1   : > { %5943 = vmatprep.subr.bf16.mxu0 %v7053_v4  ;;  %v4216_v15 = vpack.c.bf16 %v4212_v41, %v4212_v41  ;;  %v4731_v29 = vsel %vm1886_vm3, %v4215_v52, 0 }
0x10b2   : > { %v4625_v51 = vpack.i.b16 %v4621_v45, %v4596_v35  ;;  %v4627_v20 = vshrl.u32 %v4621_v45, 16  ;;  %v4622_v46 = vcombine.high %v4621_v45, %v7061_v39  ;;  %v4632_v49 = vshrl.u32 %v4597_v47, 16  ;;  %v6243_v35 = vld [vmem:[#allocation25 + $0x8] sm:$0xff]  }
0x10b3   : > { %v4777_v48 = vsel %vm1886_vm3, %v4216_v15, 0 }
0x10b4   : > { %v4628_v43 = vpack.i.b16 %v4627_v20, %v4626_v42  ;;  %v4633_v11 = vshrl.u32 %v4622_v46, 16  ;;  %v4631_v50 = vpack.i.b16 %v4622_v46, %v4597_v47 }
0x10b5   : > { %5928 = vmatmul.mubr.msk.bf16.vlgmr.msra.gmra.mrb[28].mxu1 %vm1886_vm3, %v4625_v51 }
0x10b6   : > { %5938 = vmatpush3.bf16.xpose.msra.mxu1 %v4731_v29  ;;  %5939 = vmatprep.mubr.msk.bf16.mxu1 %vm7054_vm1, %v7053_v4  ;;  %v4634_v9 = vpack.i.b16 %v4633_v11, %v4632_v49 }
0x10b7   : > { %5934 = vmatmul.mubr.msk.bf16.vlgmr.msra.gmra.mrb[36].mxu0 %vm1886_vm3, %v4628_v43  ;;  %5949 = vmatprep.subr.bf16.mxu1 %v7053_v4 }
0x10b8   : > { %5944 = vmatpush3.bf16.xpose.msra.mxu0 %v4777_v48  ;;  %5945 = vmatprep.mubr.msk.bf16.mxu0 %vm7054_vm1, %v7053_v4 }
0x10b9   : > { %5957 = vmatprep.subr.bf16.mxu0 %v7053_v4 }
0x10bd   : > { %5940 = vmatmul.mubr.msk.bf16.vlgmr.msra.gmra.mrb[32].mxu1 %vm1886_vm3, %v4631_v50 }
0x10be   : > { %5953 = vmatprep.mubr.msk.bf16.mxu1 %vm7054_vm1, %v7053_v4  ;;  %5950 = vmatpush3.bf16.msra.mxu1 %v6242_v24 }
0x10bf   : > { %5946 = vmatmul.mubr.msk.bf16.vlgmr.msra.gmra.mrb[40].mxu0 %vm1886_vm3, %v4634_v9  ;;  %5951 = vmatprep.subr.bf16.mxu1 %v7053_v4 }
0x10c0   : > { %5961 = vmatprep.mubr.msk.bf16.mxu0 %vm7054_vm1, %v7053_v4 }
0x10c2   : > { %5952 = vmatpush3.bf16.msra.mxu1 %v6243_v35 }
0x10c3   : > { %5965 = vmatprep.subr.bf16.mxu1 %v7053_v4 }
0x1188   : > { %v4675_v39 = vpop.f32.mrb[28].mxu1 }
0x1189   : > { %4819 = vxpose.xlu1.b32.start.end [1/1] (short) (narrow) %v4675_v39, 8  ;;  %v5929_v53 = vpop.f32.mrb[29].mxu1 }
0x118a   : > { %v4678_v55 = vpop.f32.mrb[30].mxu1  ;;  %v4721_v56 = vpop.f32.mrb[36].mxu0 }
0x118b   : > { %v5930_v59 = vpop.f32.mrb[31].mxu1  ;;  %4851 = vxpose.xlu0.b32.start.end [1/1] (short) (narrow) %v4721_v56, 8  ;;  %v5935_v60 = vpop.f32.mrb[37].mxu0  ;;  %v5747_v56 = vld [vmem:[#allocation26] ss:$0 sm:$0xff] }
0x118c   : > { %v4724_v61 = vpop.f32.mrb[38].mxu0 }
0x118d   : > { %v5936_v62 = vpop.f32.mrb[39].mxu0 }
0x1190   : > { %v4767_v63 = vpop.f32.mrb[32].mxu1 }
0x1191   : > { %v5941_v0 = vpop.f32.mrb[33].mxu1  ;;  %4883 = vxpose.xlu0.b32.start.end [1/1] (short) (narrow) %v4767_v63, 8 }
0x1192   : > { %v4770_v1 = vpop.f32.mrb[34].mxu1  ;;  %v4813_v2 = vpop.f32.mrb[40].mxu0 }
0x1193   : > { %v5942_v22 = vpop.f32.mrb[35].mxu1  ;;  %4915 = vxpose.xlu1.b32.start.end [1/1] (short) (narrow) %v4813_v2, 8  ;;  %v5947_v3 = vpop.f32.mrb[41].mxu0 }
0x1194   : > { %v4816_v25 = vpop.f32.mrb[42].mxu0  ;;  %v6244_v22 = vld [vmem:[#allocation29] sm:$0xff]   ;;  %v6245_v3 = vld [vmem:[#allocation29 + $0x8] sm:$0xff]  }
0x1195   : > { %v5948_v7 = vpop.f32.mrb[43].mxu0  ;;  %5958 = vmatpush3.bf16.msra.mxu0 %v6244_v22  ;;  %v6246_v25 = vld [vmem:[#allocation32] sm:$0xff]  }
0x1196   : > { %5959 = vmatprep.subr.bf16.mxu0 %v7053_v4  ;;  %v6247_v7 = vld [vmem:[#allocation32 + $0x8] sm:$0xff]  }
0x1199   : > { %5960 = vmatpush3.bf16.msra.mxu0 %v6245_v3 }
0x1209   : > { %v4835_v21 = vpop.trf.xlu1 }
0x120b   : > { %v4867_v16 = vpop.trf.xlu0 }
0x1211   : > { %v4899_v5 = vpop.trf.xlu0 }
0x1212   : > { %v4947_v28 = vcombine.low %v4835_v21, %v4899_v5  ;;  %v4948_v6 = vcombine.high %v4835_v21, %v4899_v5 }
0x1213   : > { %v4931_v8 = vpop.trf.xlu1 }
0x1214   : > { %v4963_v57 = vcombine.low %v4867_v16, %v4931_v8  ;;  %v4964_v10 = vcombine.high %v4867_v16, %v4931_v8  ;;  %v4955_v58 = vrot.slane %v4947_v28, %v7902_v36  ;;  %v4962_v12 = vrot.slane %v4948_v6, %v7902_v36  ;;  %v5751_v28 = vld [vmem:[#allocation28] ss:$0 sm:$0xff] }
0x1216   : > { %v4971_v13 = vrot.slane %v4963_v57, %v7902_v36  ;;  %v4978_v14 = vrot.slane %v4964_v10, %v7902_v36  ;;  %v6248_v10 = vld [vmem:[#allocation32 + $0x10] sm:$0xff]  }
0x1218   : > { %v4979_v17 = vcombine.low %v4955_v58, %v4971_v13  ;;  %v4980_v18 = vcombine.high %v4955_v58, %v4971_v13  ;;  %v4995_v19 = vcombine.low %v4962_v12, %v4978_v14  ;;  %v4996_v23 = vcombine.high %v4962_v12, %v4978_v14  ;;  %v6249_v58 = vld [vmem:[#allocation32 + $0x18] sm:$0xff]  }
0x1219   : > { %v5752_v12 = vld [vmem:[#allocation31] ss:$0 sm:$0xff] }
0x121a   : > { %v4987_v26 = vrot.slane %v4979_v17, %v7909_v44  ;;  %v4994_v54 = vrot.slane %v4980_v18, %v7909_v44  ;;  %v5003_v27 = vrot.slane %v4995_v19, %v7909_v44  ;;  %v5010_v30 = vrot.slane %v4996_v23, %v7909_v44 }
0x121c   : > { %v5015_v31 = vcombine.low %v4987_v26, %v4994_v54  ;;  %v5745_v32 = vcombine.high %v4987_v26, %v4994_v54  ;;  %v5031_v33 = vcombine.low %v5003_v27, %v5010_v30  ;;  %v5746_v34 = vcombine.high %v5003_v27, %v5010_v30  ;;  %v5761_v54 = vld [vmem:[#allocation34] ss:$0 sm:$0xff] }
0x121e   : > { %v5022_v38 = vrot.slane %v5015_v31, %v7902_v36  ;;  %v5030_v40 = vrot.slane %v5745_v32, %v7902_v36  ;;  %v5038_v41 = vrot.slane %v5031_v33, %v7902_v36  ;;  %v5046_v45 = vrot.slane %v5746_v34, %v7902_v36 }
0x1220   : > { %v5048_v52 = vcombine.high %v5022_v38, %v5030_v40  ;;  %v5064_v42 = vcombine.high %v5038_v41, %v5046_v45  ;;  %v5047_v51 = vcombine.low %v5022_v38, %v5030_v40  ;;  %v5063_v20 = vcombine.low %v5038_v41, %v5046_v45 }
0x1222   : > { %v5062_v15 = vrot.slane %v5048_v52, %v7909_v44  ;;  %v5078_v43 = vrot.slane %v5064_v42, %v7909_v44  ;;  %v5055_v46 = vrot.slane %v5047_v51, %v7909_v44  ;;  %v5071_v29 = vrot.slane %v5063_v20, %v7909_v44 }
0x1224   : > { %v5081_v47 = vcombine.low %v5062_v15, %v5078_v43  ;;  %v5080_v48 = vcombine.high %v5055_v46, %v5071_v29  ;;  %v5079_v11 = vcombine.low %v5055_v46, %v5071_v29  ;;  %v5082_v36 = vcombine.high %v5062_v15, %v5078_v43 }
0x1226   : > { %5088 = vrot.lane.b32.xlu1 %v5081_v47, %s7063_s20  ;;  %5084 = vrot.lane.b32.xlu0 %v5080_v48, %s7064_s5 }
0x122a   : > { %5092 = vrot.lane.b32.xlu1 %v5082_v36, %s7065_s17 }
0x1298   : > { %v5089_v49 = vpop.permute.xlu1 %5088  ;;  %v5085_v50 = vpop.permute.xlu0 %5084 }
0x1299   : > { %v5095_v9 = vsel %vm1886_vm3, %v5079_v11, %v5085_v50 }
0x129a   : > { %v5096_v53 = vsel %vm3009_vm8, %v5095_v9, %v5089_v49 }
0x129c   : > { %v5093_v39 = vpop.permute.xlu1 %5092 }
0x129d   : > { %v5097_v55 = vsel %vm3011_vm9, %v5096_v53, %v5093_v39 }
0x129e   : > { %v5102_v44 = vpack.c.bf16 %v5097_v55, %v5097_v55 }
0x12a0   : > { %5954 = vmatmul.mubr.msk.bf16.vlgmr.msra.gmra.mrb[36].mxu1 %vm1061_vm0, %v5102_v44 }
0x12a1   : > { %5973 = vmatprep.mubr.msk.bf16.mxu1 %vm7054_vm1, %v7053_v4  ;;  %5966 = vmatpush3.bf16.msra.mxu1 %v6246_v25 }
0x12a2   : > { %5967 = vmatprep.subr.bf16.mxu1 %v7053_v4 }
0x12a5   : > { %5968 = vmatpush3.bf16.msra.mxu1 %v6247_v7 }
0x12a6   : > { %5969 = vmatprep.subr.bf16.mxu1 %v7053_v4 }
0x12a9   : > { %5970 = vmatpush3.bf16.msra.mxu1 %v6248_v10 }
0x12aa   : > { %5971 = vmatprep.subr.bf16.mxu1 %v7053_v4 }
0x12ad   : > { %5972 = vmatpush3.bf16.msra.mxu1 %v6249_v58 }
0x1373   : > { %v5159_v59 = vpop.f32.mrb[36].mxu1 }
0x1374   : > { %v5160_v60 = vadd.f32 %v5747_v56, %v5159_v59  ;;  %v5955_v61 = vpop.f32.mrb[37].mxu1 }
0x1375   : > { %v5162_v62 = vpop.f32.mrb[38].mxu1 }
0x1376   : > { %v5165_v63 = vadd.f32 %v5160_v60, %v8123_v37  ;;  %v5956_v0 = vpop.f32.mrb[39].mxu1 }
0x1378   : > { %v5167_v1 = vmul.f32 %v5165_v63, %v5165_v63 }
0x137a   : > { %v5168_v2 = vsel %vm1061_vm0, %v5167_v1, 0.0 }
0x137b   : > { %5169 = vadd.xlane.f32.xlu1 %v5168_v2 }
0x1408   : > { %v5170_v37 = vpop.xlane.xlu1 %5169 }
0x1409   : > { %v5171_v16 = vmul.f32 0.03125, %v5170_v37 }
0x140b   : > { %v5172_v21 = vadd.f32 1e-06, %v5171_v16 }
0x140d   : > { %6286 = vrsqrt.f32 %v5172_v21 }
0x1417   : > { %v6287_v5 = vpop.eup %6286 }
0x1418   : > { %v5174_v6 = vmul.f32 %v6287_v5, %v5165_v63 }
0x141a   : > { %v5181_v8 = vmul.f32 %v5751_v28, %v5174_v6 }
0x141c   : > { %v5186_v57 = vpack.c.bf16 %v5181_v8, %v5181_v8 }
0x141e   : > { %5962 = vmatmul.mubr.msk.bf16.vlgmr.msra.gmra.mrb[44].mxu0 %vm1061_vm0, %v5186_v57 }
0x14f1   : > { %v5243_v13 = vpop.f32.mrb[44].mxu0 }
0x14f2   : > { %v5244_v14 = vadd.f32 %v5752_v12, %v5243_v13  ;;  %v5963_v17 = vpop.f32.mrb[45].mxu0 }
0x14f3   : > { %v5246_v18 = vpop.f32.mrb[46].mxu0 }
0x14f4   : > { %v5249_v19 = vmax.f32 %v5244_v14, 0.0  ;;  %v5964_v23 = vpop.f32.mrb[47].mxu0 }
0x14f6   : > { %v5258_v24 = vpack.c.bf16 %v5249_v19, %v5249_v19 }
0x14f8   : > { %5974 = vmatmul.mubr.msk.bf16.vlgmr.msra.gmra.mrb[40].mxu1 %vm5283_vm12, %v5258_v24 }
0x15cb   : > { %v5321_v26 = vpop.f32.mrb[40].mxu1 }
0x15cc   : > { %v5327_v4 = vadd.f32 %v5321_v26, %v5165_v63  ;;  %v5975_v27 = vpop.f32.mrb[41].mxu1 }
0x15cd   : > { %v5324_v30 = vpop.f32.mrb[42].mxu1 }
0x15ce   : > { %v5335_v31 = vadd.f32 %v5761_v54, %v5327_v4  ;;  %v5976_v32 = vpop.f32.mrb[43].mxu1 }
0x15d0   : > { %5336 = vst.msk [vmem:[%s1039_s25] sm:$0xff] %vm1061_vm0, %v5335_v31 }
0x15d1   : > { %6926 = shalt.err (!%p6923_p10)
}
0x15d2   : > { %s6927_s13 = scalar_lea.hbm %s8366_s0, 128  ;;  %s6931_s29 = scalar_lea.hbm %s8569_s21, 256 }
0x15d3   : > { %p6928_p13 = scmp.ne.s32.totalorder %s8366_s0, %s6927_s13  ;;  %p6932_p1 = scmp.lt.u32.totalorder %s8366_s0, %s8569_s21 }
0x15d4   : > { %p6933_p6 = scmp.lt.u32.totalorder %s6931_s29, %s6927_s13  ;;  %p6935_p2 = scmp.lt.u32.totalorder %s6927_s13, %s8366_s0 }
0x15d5   : > { %p6929_p9 = pnand %p6928_p13, %p8570_p12 }
0x15d6   : > { %p6934_p0 = por %p6933_p6, %p6932_p1 }
0x15d7   : > { %p6930_p8 = pneg %p6929_p9 }
0x15d8   : > { %p6936_p4 = por %p6935_p2, %p6934_p0 }
0x15da   : > { %p6937_p11 = pnand %p6936_p4, %p6930_p8 }
0x15dc   : > { %6940 = shalt.err (!%p6937_p11)
}
0x15dd   : > { %6057 = dma.vmem_to_hbm [thread:$0]  (%p8570_p12), %s8368_s11, 128, %s8366_s0, %s5338_s23  }
0x15de PF: > { %s5363_s5 = sand.u32 1, %s7015_s3   ;;  %p8571_p5 = scmp.ne.s32.totalorder %s8518_s27, 0 }
0x15df   : > { %p8572_p7 = scmp.ge.s32.totalorder %s7027_s30, 2  ;;  %s5364_s17 = scalar_lea.sflag [#allocation4], %s5363_s5 }
0x15e1   : > { %p6128_p3 = pnand %p8572_p7, %p8571_p5 }
0x15e3   : > { %7010 = dma.done.wait (!%p6128_p3), %s5364_s17, 128  }
0x15e4   : > { %7012 = vsyncadd (!%p6128_p3), %s5364_s17, 4294967168  ;;  %s8573_s14 = sld [smem:[#allocation52_spill]]  ;;  %s8574_s29 = sld [smem:[#allocation54_spill]] }
0x15e5   : > { %p50_p10 = scmp.ge.s32.totalorder %s7425_s2, 4   ;;  %s8575_s3 = smov %s7019_s28 }
0x15e6   : > { %s8577_s30 = smov %s7425_s2 }
0x15e7   :  { %52 = sbr.rel (!%p50_p10) target bundleno = 42 (0x2a), region = 262 }
0x15ea   : > { %s8576_s28 = smov %s8573_s14 }
0x15ee   :  { %5369 = vsyncpa [#allocation3], 1 }
0x15ef   :  { %5371 = vsyncpa [#allocation3 + $0x1], 1 }
0x15f0   :  { %5372 = vsyncpa [#allocation6], 1 }
0x15f1   :  { %5374 = vsyncpa [#allocation6 + $0x1], 1 }
0x15f2   :  { %5375 = vsyncpa [#allocation9], 1 }
0x15f3   :  { %5377 = vsyncpa [#allocation9 + $0x1], 1 }
0x15f4   :  { %5378 = vsyncpa [#allocation12], 1 }
0x15f5   :  { %5379 = vsyncpa [#allocation15], 1 }
0x15f6   :  { %5380 = vsyncpa [#allocation18], 1 }
0x15f7   :  { %5381 = vsyncpa [#allocation21], 1 }
0x15f8   :  { %5382 = vsyncpa [#allocation24], 1 }
0x15f9   :  { %5383 = vsyncpa [#allocation27], 1 }
0x15fa   :  { %5384 = vsyncpa [#allocation30], 1 }
0x15fb   :  { %5385 = vsyncpa [#allocation33], 1 }
0x15fc   :  { %5386 = vsyncpa [#allocation36], 1 }
0x15fd   :  { %5387 = vsyncpa [#allocation4], 1 }
0x15fe   :  { %5389 = vsyncpa [#allocation4 + $0x1], 1 }

</bundles_post_ra>
